<compile_context>
chip_gen: v5e
topology: v5e:2x2
jax: 0.10.0
libtpu: 0.0.40
codegen_flags: <defaults>
</compile_context>

<pallas_src>
import jax
import jax.numpy as jnp
from jax import lax
from jax.experimental import pallas as pl
from jax.experimental.pallas import tpu as pltpu

C_IN = 4        # input channels of x (synthetic)
KSIZE = 7
PAD = KSIZE // 2


def _spatial_attn_kernel(w_ref, b_ref, x_ref, o_ref):
    # w_ref: SMEM (2*7*7,)      flattened conv weight, layout [cin, kh, kw]
    # b_ref: SMEM (1,)          conv bias
    # x_ref: VMEM (B, C, H, W)  batch tile
    # o_ref: VMEM (B, H, W)     output tile (channel dim squeezed by BlockSpec)
    B, C, H, W = x_ref.shape

    # --- Channel reduction, streamed per channel (never holds full x tile). ---
    x0 = x_ref[:, 0, :, :]                         # (B, H, W)
    s = x0
    m = x0
    for c in range(1, C):
        xc = x_ref[:, c, :, :]
        s = s + xc
        m = jnp.maximum(m, xc)
    avg = s * (1.0 / C)

    # --- Zero-padded maps as register values (no VMEM scratch). ---
    def pad_hw(t):                                  # (B, H, W) -> (B, H+6, W+6)
        zc = jnp.zeros((B, H, PAD), jnp.float32)
        t = jnp.concatenate([zc, t, zc], axis=2)    # lane-dim concat
        zr = jnp.zeros((B, PAD, W + 2 * PAD), jnp.float32)
        return jnp.concatenate([zr, t, zr], axis=1)  # sublane-dim concat

    padded = (pad_hw(avg), pad_hw(m))               # 2 x (B, H+6, W+6)

    # --- 7x7 conv (2 -> 1 channel), fully unrolled: scalar-weight FMAs on the
    # VPU; ki/kj shifts are in-register slices (XLU slot).  One partial
    # accumulator per input channel keeps the VALU dependency chain short. ---
    partial = []
    for c in range(2):
        ch = padded[c]                              # (B, H+6, W+6)
        acc = jnp.zeros((B, H, W), jnp.float32)
        for ki in range(KSIZE):
            rows = ch[:, ki:ki + H, :]              # sublane shift, hoisted
            for kj in range(KSIZE):
                w = w_ref[(c * KSIZE + ki) * KSIZE + kj]
                acc = acc + w * rows[:, :, kj:kj + W]   # lane shift + mul + add
        partial.append(acc)

    out = partial[0] + partial[1] + b_ref[0]
    o_ref[...] = jax.nn.sigmoid(out)


def spatial_attention3(x, weight, bias, *, batch_tile=None):
    """x: (N, C, H, W) f32; weight: (1, 2, 7, 7) f32; bias: (1,) f32."""
    N, C, H, W = x.shape
    if batch_tile is None:
        # <= N // 2 so the parallel axis has >= 2 steps (v7x megacore); <= 2 so
        # the padded register values + accumulators stay far under 64 vregs.
        batch_tile = max(1, min(2, N // 2))
    w_flat = weight.reshape(-1).astype(jnp.float32)        # (98,)
    b = bias.astype(jnp.float32)                           # (1,)

    return pl.pallas_call(
        _spatial_attn_kernel,
        out_shape=jax.ShapeDtypeStruct((N, 1, H, W), jnp.float32),
        grid_spec=pltpu.PrefetchScalarGridSpec(
            num_scalar_prefetch=0,
            grid=(pl.cdiv(N, batch_tile),),
            in_specs=[
                pl.BlockSpec(memory_space=pltpu.SMEM),                    # weights
                pl.BlockSpec(memory_space=pltpu.SMEM),                    # bias
                pl.BlockSpec((batch_tile, C, H, W), lambda n: (n, 0, 0, 0)),
            ],
            # Channel dim squeezed out of the kernel view -> plain (B,H,W) store.
            out_specs=pl.BlockSpec((batch_tile, None, H, W),
                                   lambda n: (n, 0, 0, 0)),
        ),
        compiler_params=pltpu.CompilerParams(
            dimension_semantics=("parallel",)),
    )(w_flat, b, x.astype(jnp.float32))


def _reference(x, weight, bias):
    avg = jnp.mean(x, axis=1, keepdims=True)
    mx = jnp.max(x, axis=1, keepdims=True)
    out = jnp.concatenate([avg, mx], axis=1)           # (N, 2, H, W)
    out = lax.conv_general_dilated(
        out, weight, window_strides=(1, 1), padding=((PAD, PAD), (PAD, PAD)),
        dimension_numbers=("NCHW", "OIHW", "NCHW"))
    out = out + bias.reshape(1, 1, 1, 1)
    return jax.nn.sigmoid(out)


if __name__ == "__main__":
    key = jax.random.PRNGKey(0)
    kx, kw, kb = jax.random.split(key, 3)

    N, H, W = 2, 16, 16
    x = jax.random.normal(kx, (N, C_IN, H, W), dtype=jnp.float32)

    # Deterministic conv parameters (Conv2d(2, 1, 7) -> weight (1,2,7,7), bias (1,))
    fan_in = 2 * KSIZE * KSIZE
    bound = 1.0 / (fan_in ** 0.5)
    weight = jax.random.uniform(kw, (1, 2, KSIZE, KSIZE), jnp.float32, -bound, bound)
    bias = jax.random.uniform(kb, (1,), jnp.float32, -bound, bound)

    out = spatial_attention3(x, weight, bias)
    out = jax.block_until_ready(out)

    ref = _reference(x, weight, bias)
    assert out.shape == (N, 1, H, W)
    assert jnp.allclose(out, ref, atol=1e-5, rtol=1e-5)

    print("KERNEL_OK")
</pallas_src>

<mosaic_0001>
module attributes {stable_mosaic.version = 11 : i64} {
  func.func @_spatial_attn_kernel(%arg0: i32, %arg1: memref<98xf32, #tpu.memory_space<smem>>, %arg2: memref<1xf32, #tpu.memory_space<smem>>, %arg3: memref<1x4x16x16xf32, #tpu.memory_space<vmem>>, %arg4: memref<1x1x16x16xf32, #tpu.memory_space<vmem>>) attributes {dimension_semantics = [#tpu.dimension_semantics<parallel>], iteration_bounds = array<i64: 2>, scalar_prefetch = 0 : i64, scratch_operands = 0 : i64, tpu.core_type = #tpu.core_type<tc>, window_params = [{transform_indices = @transform_0, window_bounds = array<i64: 98>}, {transform_indices = @transform_1, window_bounds = array<i64: 1>}, {transform_indices = @transform_2, window_bounds = array<i64: 1, 4, 16, 16>}, {transform_indices = @transform_3, window_bounds = array<i64: 1, 1, 16, 16>}]} {
    %c0 = arith.constant 0 : index
    %c0_0 = arith.constant 0 : index
    %c0_1 = arith.constant 0 : index
    %c0_2 = arith.constant 0 : index
    %0 = vector.load %arg3[%c0, %c0_0, %c0_1, %c0_2] : memref<1x4x16x16xf32, #tpu.memory_space<vmem>>, vector<1x1x16x16xf32>
    %1 = vector.shape_cast %0 : vector<1x1x16x16xf32> to vector<1x16x16xf32>
    %c0_3 = arith.constant 0 : index
    %c1 = arith.constant 1 : index
    %c0_4 = arith.constant 0 : index
    %c0_5 = arith.constant 0 : index
    %2 = vector.load %arg3[%c0_3, %c1, %c0_4, %c0_5] : memref<1x4x16x16xf32, #tpu.memory_space<vmem>>, vector<1x1x16x16xf32>
    %3 = vector.shape_cast %2 : vector<1x1x16x16xf32> to vector<1x16x16xf32>
    %4 = arith.addf %1, %3 : vector<1x16x16xf32>
    %5 = arith.maximumf %1, %3 : vector<1x16x16xf32>
    %c0_6 = arith.constant 0 : index
    %c2 = arith.constant 2 : index
    %c0_7 = arith.constant 0 : index
    %c0_8 = arith.constant 0 : index
    %6 = vector.load %arg3[%c0_6, %c2, %c0_7, %c0_8] : memref<1x4x16x16xf32, #tpu.memory_space<vmem>>, vector<1x1x16x16xf32>
    %7 = vector.shape_cast %6 : vector<1x1x16x16xf32> to vector<1x16x16xf32>
    %8 = arith.addf %4, %7 : vector<1x16x16xf32>
    %9 = arith.maximumf %5, %7 : vector<1x16x16xf32>
    %c0_9 = arith.constant 0 : index
    %c3 = arith.constant 3 : index
    %c0_10 = arith.constant 0 : index
    %c0_11 = arith.constant 0 : index
    %10 = vector.load %arg3[%c0_9, %c3, %c0_10, %c0_11] : memref<1x4x16x16xf32, #tpu.memory_space<vmem>>, vector<1x1x16x16xf32>
    %11 = vector.shape_cast %10 : vector<1x1x16x16xf32> to vector<1x16x16xf32>
    %12 = arith.addf %8, %11 : vector<1x16x16xf32>
    %13 = arith.maximumf %9, %11 : vector<1x16x16xf32>
    %cst = arith.constant 2.500000e-01 : f32
    %14 = vector.broadcast %cst : f32 to vector<1x16x16xf32>
    %15 = arith.mulf %12, %14 : vector<1x16x16xf32>
    %cst_12 = arith.constant 0.000000e+00 : f32
    %16 = vector.broadcast %cst_12 : f32 to vector<1x16x3xf32>
    %17 = tpu.concatenate %16, %15, %16 in 2 : vector<1x16x3xf32>, vector<1x16x16xf32>, vector<1x16x3xf32> -> vector<1x16x22xf32>
    %cst_13 = arith.constant 0.000000e+00 : f32
    %18 = vector.broadcast %cst_13 : f32 to vector<1x3x22xf32>
    %19 = tpu.concatenate %18, %17, %18 in 1 : vector<1x3x22xf32>, vector<1x16x22xf32>, vector<1x3x22xf32> -> vector<1x22x22xf32>
    %cst_14 = arith.constant 0.000000e+00 : f32
    %20 = vector.broadcast %cst_14 : f32 to vector<1x16x3xf32>
    %21 = tpu.concatenate %20, %13, %20 in 2 : vector<1x16x3xf32>, vector<1x16x16xf32>, vector<1x16x3xf32> -> vector<1x16x22xf32>
    %cst_15 = arith.constant 0.000000e+00 : f32
    %22 = vector.broadcast %cst_15 : f32 to vector<1x3x22xf32>
    %23 = tpu.concatenate %22, %21, %22 in 1 : vector<1x3x22xf32>, vector<1x16x22xf32>, vector<1x3x22xf32> -> vector<1x22x22xf32>
    %cst_16 = arith.constant 0.000000e+00 : f32
    %24 = vector.broadcast %cst_16 : f32 to vector<1x16x16xf32>
    %25 = vector.extract_strided_slice %19 {offsets = [0, 0, 0], sizes = [1, 16, 22], strides = [1, 1, 1]} : vector<1x22x22xf32> to vector<1x16x22xf32>
    %c0_17 = arith.constant 0 : index
    %26 = memref.load %arg1[%c0_17] : memref<98xf32, #tpu.memory_space<smem>>
    %27 = vector.extract_strided_slice %25 {offsets = [0, 0, 0], sizes = [1, 16, 16], strides = [1, 1, 1]} : vector<1x16x22xf32> to vector<1x16x16xf32>
    %28 = vector.broadcast %26 : f32 to vector<1x16x16xf32>
    %29 = arith.mulf %28, %27 : vector<1x16x16xf32>
    %30 = arith.addf %24, %29 : vector<1x16x16xf32>
    %c1_18 = arith.constant 1 : index
    %31 = memref.load %arg1[%c1_18] : memref<98xf32, #tpu.memory_space<smem>>
    %32 = vector.extract_strided_slice %25 {offsets = [0, 0, 1], sizes = [1, 16, 16], strides = [1, 1, 1]} : vector<1x16x22xf32> to vector<1x16x16xf32>
    %33 = vector.broadcast %31 : f32 to vector<1x16x16xf32>
    %34 = arith.mulf %33, %32 : vector<1x16x16xf32>
    %35 = arith.addf %30, %34 : vector<1x16x16xf32>
    %c2_19 = arith.constant 2 : index
    %36 = memref.load %arg1[%c2_19] : memref<98xf32, #tpu.memory_space<smem>>
    %37 = vector.extract_strided_slice %25 {offsets = [0, 0, 2], sizes = [1, 16, 16], strides = [1, 1, 1]} : vector<1x16x22xf32> to vector<1x16x16xf32>
    %38 = vector.broadcast %36 : f32 to vector<1x16x16xf32>
    %39 = arith.mulf %38, %37 : vector<1x16x16xf32>
    %40 = arith.addf %35, %39 : vector<1x16x16xf32>
    %c3_20 = arith.constant 3 : index
    %41 = memref.load %arg1[%c3_20] : memref<98xf32, #tpu.memory_space<smem>>
    %42 = vector.extract_strided_slice %25 {offsets = [0, 0, 3], sizes = [1, 16, 16], strides = [1, 1, 1]} : vector<1x16x22xf32> to vector<1x16x16xf32>
    %43 = vector.broadcast %41 : f32 to vector<1x16x16xf32>
    %44 = arith.mulf %43, %42 : vector<1x16x16xf32>
    %45 = arith.addf %40, %44 : vector<1x16x16xf32>
    %c4 = arith.constant 4 : index
    %46 = memref.load %arg1[%c4] : memref<98xf32, #tpu.memory_space<smem>>
    %47 = vector.extract_strided_slice %25 {offsets = [0, 0, 4], sizes = [1, 16, 16], strides = [1, 1, 1]} : vector<1x16x22xf32> to vector<1x16x16xf32>
    %48 = vector.broadcast %46 : f32 to vector<1x16x16xf32>
    %49 = arith.mulf %48, %47 : vector<1x16x16xf32>
    %50 = arith.addf %45, %49 : vector<1x16x16xf32>
    %c5 = arith.constant 5 : index
    %51 = memref.load %arg1[%c5] : memref<98xf32, #tpu.memory_space<smem>>
    %52 = vector.extract_strided_slice %25 {offsets = [0, 0, 5], sizes = [1, 16, 16], strides = [1, 1, 1]} : vector<1x16x22xf32> to vector<1x16x16xf32>
    %53 = vector.broadcast %51 : f32 to vector<1x16x16xf32>
    %54 = arith.mulf %53, %52 : vector<1x16x16xf32>
    %55 = arith.addf %50, %54 : vector<1x16x16xf32>
    %c6 = arith.constant 6 : index
    %56 = memref.load %arg1[%c6] : memref<98xf32, #tpu.memory_space<smem>>
    %57 = vector.extract_strided_slice %25 {offsets = [0, 0, 6], sizes = [1, 16, 16], strides = [1, 1, 1]} : vector<1x16x22xf32> to vector<1x16x16xf32>
    %58 = vector.broadcast %56 : f32 to vector<1x16x16xf32>
    %59 = arith.mulf %58, %57 : vector<1x16x16xf32>
    %60 = arith.addf %55, %59 : vector<1x16x16xf32>
    %61 = vector.extract_strided_slice %19 {offsets = [0, 1, 0], sizes = [1, 16, 22], strides = [1, 1, 1]} : vector<1x22x22xf32> to vector<1x16x22xf32>
    %c7 = arith.constant 7 : index
    %62 = memref.load %arg1[%c7] : memref<98xf32, #tpu.memory_space<smem>>
    %63 = vector.extract_strided_slice %61 {offsets = [0, 0, 0], sizes = [1, 16, 16], strides = [1, 1, 1]} : vector<1x16x22xf32> to vector<1x16x16xf32>
    %64 = vector.broadcast %62 : f32 to vector<1x16x16xf32>
    %65 = arith.mulf %64, %63 : vector<1x16x16xf32>
    %66 = arith.addf %60, %65 : vector<1x16x16xf32>
    %c8 = arith.constant 8 : index
    %67 = memref.load %arg1[%c8] : memref<98xf32, #tpu.memory_space<smem>>
    %68 = vector.extract_strided_slice %61 {offsets = [0, 0, 1], sizes = [1, 16, 16], strides = [1, 1, 1]} : vector<1x16x22xf32> to vector<1x16x16xf32>
    %69 = vector.broadcast %67 : f32 to vector<1x16x16xf32>
    %70 = arith.mulf %69, %68 : vector<1x16x16xf32>
    %71 = arith.addf %66, %70 : vector<1x16x16xf32>
    %c9 = arith.constant 9 : index
    %72 = memref.load %arg1[%c9] : memref<98xf32, #tpu.memory_space<smem>>
    %73 = vector.extract_strided_slice %61 {offsets = [0, 0, 2], sizes = [1, 16, 16], strides = [1, 1, 1]} : vector<1x16x22xf32> to vector<1x16x16xf32>
    %74 = vector.broadcast %72 : f32 to vector<1x16x16xf32>
    %75 = arith.mulf %74, %73 : vector<1x16x16xf32>
    %76 = arith.addf %71, %75 : vector<1x16x16xf32>
    %c10 = arith.constant 10 : index
    %77 = memref.load %arg1[%c10] : memref<98xf32, #tpu.memory_space<smem>>
    %78 = vector.extract_strided_slice %61 {offsets = [0, 0, 3], sizes = [1, 16, 16], strides = [1, 1, 1]} : vector<1x16x22xf32> to vector<1x16x16xf32>
    %79 = vector.broadcast %77 : f32 to vector<1x16x16xf32>
    %80 = arith.mulf %79, %78 : vector<1x16x16xf32>
    %81 = arith.addf %76, %80 : vector<1x16x16xf32>
    %c11 = arith.constant 11 : index
    %82 = memref.load %arg1[%c11] : memref<98xf32, #tpu.memory_space<smem>>
    %83 = vector.extract_strided_slice %61 {offsets = [0, 0, 4], sizes = [1, 16, 16], strides = [1, 1, 1]} : vector<1x16x22xf32> to vector<1x16x16xf32>
    %84 = vector.broadcast %82 : f32 to vector<1x16x16xf32>
    %85 = arith.mulf %84, %83 : vector<1x16x16xf32>
    %86 = arith.addf %81, %85 : vector<1x16x16xf32>
    %c12 = arith.constant 12 : index
    %87 = memref.load %arg1[%c12] : memref<98xf32, #tpu.memory_space<smem>>
    %88 = vector.extract_strided_slice %61 {offsets = [0, 0, 5], sizes = [1, 16, 16], strides = [1, 1, 1]} : vector<1x16x22xf32> to vector<1x16x16xf32>
    %89 = vector.broadcast %87 : f32 to vector<1x16x16xf32>
    %90 = arith.mulf %89, %88 : vector<1x16x16xf32>
    %91 = arith.addf %86, %90 : vector<1x16x16xf32>
    %c13 = arith.constant 13 : index
    %92 = memref.load %arg1[%c13] : memref<98xf32, #tpu.memory_space<smem>>
    %93 = vector.extract_strided_slice %61 {offsets = [0, 0, 6], sizes = [1, 16, 16], strides = [1, 1, 1]} : vector<1x16x22xf32> to vector<1x16x16xf32>
    %94 = vector.broadcast %92 : f32 to vector<1x16x16xf32>
    %95 = arith.mulf %94, %93 : vector<1x16x16xf32>
    %96 = arith.addf %91, %95 : vector<1x16x16xf32>
    %97 = vector.extract_strided_slice %19 {offsets = [0, 2, 0], sizes = [1, 16, 22], strides = [1, 1, 1]} : vector<1x22x22xf32> to vector<1x16x22xf32>
    %c14 = arith.constant 14 : index
    %98 = memref.load %arg1[%c14] : memref<98xf32, #tpu.memory_space<smem>>
    %99 = vector.extract_strided_slice %97 {offsets = [0, 0, 0], sizes = [1, 16, 16], strides = [1, 1, 1]} : vector<1x16x22xf32> to vector<1x16x16xf32>
    %100 = vector.broadcast %98 : f32 to vector<1x16x16xf32>
    %101 = arith.mulf %100, %99 : vector<1x16x16xf32>
    %102 = arith.addf %96, %101 : vector<1x16x16xf32>
    %c15 = arith.constant 15 : index
    %103 = memref.load %arg1[%c15] : memref<98xf32, #tpu.memory_space<smem>>
    %104 = vector.extract_strided_slice %97 {offsets = [0, 0, 1], sizes = [1, 16, 16], strides = [1, 1, 1]} : vector<1x16x22xf32> to vector<1x16x16xf32>
    %105 = vector.broadcast %103 : f32 to vector<1x16x16xf32>
    %106 = arith.mulf %105, %104 : vector<1x16x16xf32>
    %107 = arith.addf %102, %106 : vector<1x16x16xf32>
    %c16 = arith.constant 16 : index
    %108 = memref.load %arg1[%c16] : memref<98xf32, #tpu.memory_space<smem>>
    %109 = vector.extract_strided_slice %97 {offsets = [0, 0, 2], sizes = [1, 16, 16], strides = [1, 1, 1]} : vector<1x16x22xf32> to vector<1x16x16xf32>
    %110 = vector.broadcast %108 : f32 to vector<1x16x16xf32>
    %111 = arith.mulf %110, %109 : vector<1x16x16xf32>
    %112 = arith.addf %107, %111 : vector<1x16x16xf32>
    %c17 = arith.constant 17 : index
    %113 = memref.load %arg1[%c17] : memref<98xf32, #tpu.memory_space<smem>>
    %114 = vector.extract_strided_slice %97 {offsets = [0, 0, 3], sizes = [1, 16, 16], strides = [1, 1, 1]} : vector<1x16x22xf32> to vector<1x16x16xf32>
    %115 = vector.broadcast %113 : f32 to vector<1x16x16xf32>
    %116 = arith.mulf %115, %114 : vector<1x16x16xf32>
    %117 = arith.addf %112, %116 : vector<1x16x16xf32>
    %c18 = arith.constant 18 : index
    %118 = memref.load %arg1[%c18] : memref<98xf32, #tpu.memory_space<smem>>
    %119 = vector.extract_strided_slice %97 {offsets = [0, 0, 4], sizes = [1, 16, 16], strides = [1, 1, 1]} : vector<1x16x22xf32> to vector<1x16x16xf32>
    %120 = vector.broadcast %118 : f32 to vector<1x16x16xf32>
    %121 = arith.mulf %120, %119 : vector<1x16x16xf32>
    %122 = arith.addf %117, %121 : vector<1x16x16xf32>
    %c19 = arith.constant 19 : index
    %123 = memref.load %arg1[%c19] : memref<98xf32, #tpu.memory_space<smem>>
    %124 = vector.extract_strided_slice %97 {offsets = [0, 0, 5], sizes = [1, 16, 16], strides = [1, 1, 1]} : vector<1x16x22xf32> to vector<1x16x16xf32>
    %125 = vector.broadcast %123 : f32 to vector<1x16x16xf32>
    %126 = arith.mulf %125, %124 : vector<1x16x16xf32>
    %127 = arith.addf %122, %126 : vector<1x16x16xf32>
    %c20 = arith.constant 20 : index
    %128 = memref.load %arg1[%c20] : memref<98xf32, #tpu.memory_space<smem>>
    %129 = vector.extract_strided_slice %97 {offsets = [0, 0, 6], sizes = [1, 16, 16], strides = [1, 1, 1]} : vector<1x16x22xf32> to vector<1x16x16xf32>
    %130 = vector.broadcast %128 : f32 to vector<1x16x16xf32>
    %131 = arith.mulf %130, %129 : vector<1x16x16xf32>
    %132 = arith.addf %127, %131 : vector<1x16x16xf32>
    %133 = vector.extract_strided_slice %19 {offsets = [0, 3, 0], sizes = [1, 16, 22], strides = [1, 1, 1]} : vector<1x22x22xf32> to vector<1x16x22xf32>
    %c21 = arith.constant 21 : index
    %134 = memref.load %arg1[%c21] : memref<98xf32, #tpu.memory_space<smem>>
    %135 = vector.extract_strided_slice %133 {offsets = [0, 0, 0], sizes = [1, 16, 16], strides = [1, 1, 1]} : vector<1x16x22xf32> to vector<1x16x16xf32>
    %136 = vector.broadcast %134 : f32 to vector<1x16x16xf32>
    %137 = arith.mulf %136, %135 : vector<1x16x16xf32>
    %138 = arith.addf %132, %137 : vector<1x16x16xf32>
    %c22 = arith.constant 22 : index
    %139 = memref.load %arg1[%c22] : memref<98xf32, #tpu.memory_space<smem>>
    %140 = vector.extract_strided_slice %133 {offsets = [0, 0, 1], sizes = [1, 16, 16], strides = [1, 1, 1]} : vector<1x16x22xf32> to vector<1x16x16xf32>
    %141 = vector.broadcast %139 : f32 to vector<1x16x16xf32>
    %142 = arith.mulf %141, %140 : vector<1x16x16xf32>
    %143 = arith.addf %138, %142 : vector<1x16x16xf32>
    %c23 = arith.constant 23 : index
    %144 = memref.load %arg1[%c23] : memref<98xf32, #tpu.memory_space<smem>>
    %145 = vector.extract_strided_slice %133 {offsets = [0, 0, 2], sizes = [1, 16, 16], strides = [1, 1, 1]} : vector<1x16x22xf32> to vector<1x16x16xf32>
    %146 = vector.broadcast %144 : f32 to vector<1x16x16xf32>
    %147 = arith.mulf %146, %145 : vector<1x16x16xf32>
    %148 = arith.addf %143, %147 : vector<1x16x16xf32>
    %c24 = arith.constant 24 : index
    %149 = memref.load %arg1[%c24] : memref<98xf32, #tpu.memory_space<smem>>
    %150 = vector.extract_strided_slice %133 {offsets = [0, 0, 3], sizes = [1, 16, 16], strides = [1, 1, 1]} : vector<1x16x22xf32> to vector<1x16x16xf32>
    %151 = vector.broadcast %149 : f32 to vector<1x16x16xf32>
    %152 = arith.mulf %151, %150 : vector<1x16x16xf32>
    %153 = arith.addf %148, %152 : vector<1x16x16xf32>
    %c25 = arith.constant 25 : index
    %154 = memref.load %arg1[%c25] : memref<98xf32, #tpu.memory_space<smem>>
    %155 = vector.extract_strided_slice %133 {offsets = [0, 0, 4], sizes = [1, 16, 16], strides = [1, 1, 1]} : vector<1x16x22xf32> to vector<1x16x16xf32>
    %156 = vector.broadcast %154 : f32 to vector<1x16x16xf32>
    %157 = arith.mulf %156, %155 : vector<1x16x16xf32>
    %158 = arith.addf %153, %157 : vector<1x16x16xf32>
    %c26 = arith.constant 26 : index
    %159 = memref.load %arg1[%c26] : memref<98xf32, #tpu.memory_space<smem>>
    %160 = vector.extract_strided_slice %133 {offsets = [0, 0, 5], sizes = [1, 16, 16], strides = [1, 1, 1]} : vector<1x16x22xf32> to vector<1x16x16xf32>
    %161 = vector.broadcast %159 : f32 to vector<1x16x16xf32>
    %162 = arith.mulf %161, %160 : vector<1x16x16xf32>
    %163 = arith.addf %158, %162 : vector<1x16x16xf32>
    %c27 = arith.constant 27 : index
    %164 = memref.load %arg1[%c27] : memref<98xf32, #tpu.memory_space<smem>>
    %165 = vector.extract_strided_slice %133 {offsets = [0, 0, 6], sizes = [1, 16, 16], strides = [1, 1, 1]} : vector<1x16x22xf32> to vector<1x16x16xf32>
    %166 = vector.broadcast %164 : f32 to vector<1x16x16xf32>
    %167 = arith.mulf %166, %165 : vector<1x16x16xf32>
    %168 = arith.addf %163, %167 : vector<1x16x16xf32>
    %169 = vector.extract_strided_slice %19 {offsets = [0, 4, 0], sizes = [1, 16, 22], strides = [1, 1, 1]} : vector<1x22x22xf32> to vector<1x16x22xf32>
    %c28 = arith.constant 28 : index
    %170 = memref.load %arg1[%c28] : memref<98xf32, #tpu.memory_space<smem>>
    %171 = vector.extract_strided_slice %169 {offsets = [0, 0, 0], sizes = [1, 16, 16], strides = [1, 1, 1]} : vector<1x16x22xf32> to vector<1x16x16xf32>
    %172 = vector.broadcast %170 : f32 to vector<1x16x16xf32>
    %173 = arith.mulf %172, %171 : vector<1x16x16xf32>
    %174 = arith.addf %168, %173 : vector<1x16x16xf32>
    %c29 = arith.constant 29 : index
    %175 = memref.load %arg1[%c29] : memref<98xf32, #tpu.memory_space<smem>>
    %176 = vector.extract_strided_slice %169 {offsets = [0, 0, 1], sizes = [1, 16, 16], strides = [1, 1, 1]} : vector<1x16x22xf32> to vector<1x16x16xf32>
    %177 = vector.broadcast %175 : f32 to vector<1x16x16xf32>
    %178 = arith.mulf %177, %176 : vector<1x16x16xf32>
    %179 = arith.addf %174, %178 : vector<1x16x16xf32>
    %c30 = arith.constant 30 : index
    %180 = memref.load %arg1[%c30] : memref<98xf32, #tpu.memory_space<smem>>
    %181 = vector.extract_strided_slice %169 {offsets = [0, 0, 2], sizes = [1, 16, 16], strides = [1, 1, 1]} : vector<1x16x22xf32> to vector<1x16x16xf32>
    %182 = vector.broadcast %180 : f32 to vector<1x16x16xf32>
    %183 = arith.mulf %182, %181 : vector<1x16x16xf32>
    %184 = arith.addf %179, %183 : vector<1x16x16xf32>
    %c31 = arith.constant 31 : index
    %185 = memref.load %arg1[%c31] : memref<98xf32, #tpu.memory_space<smem>>
    %186 = vector.extract_strided_slice %169 {offsets = [0, 0, 3], sizes = [1, 16, 16], strides = [1, 1, 1]} : vector<1x16x22xf32> to vector<1x16x16xf32>
    %187 = vector.broadcast %185 : f32 to vector<1x16x16xf32>
    %188 = arith.mulf %187, %186 : vector<1x16x16xf32>
    %189 = arith.addf %184, %188 : vector<1x16x16xf32>
    %c32 = arith.constant 32 : index
    %190 = memref.load %arg1[%c32] : memref<98xf32, #tpu.memory_space<smem>>
    %191 = vector.extract_strided_slice %169 {offsets = [0, 0, 4], sizes = [1, 16, 16], strides = [1, 1, 1]} : vector<1x16x22xf32> to vector<1x16x16xf32>
    %192 = vector.broadcast %190 : f32 to vector<1x16x16xf32>
    %193 = arith.mulf %192, %191 : vector<1x16x16xf32>
    %194 = arith.addf %189, %193 : vector<1x16x16xf32>
    %c33 = arith.constant 33 : index
    %195 = memref.load %arg1[%c33] : memref<98xf32, #tpu.memory_space<smem>>
    %196 = vector.extract_strided_slice %169 {offsets = [0, 0, 5], sizes = [1, 16, 16], strides = [1, 1, 1]} : vector<1x16x22xf32> to vector<1x16x16xf32>
    %197 = vector.broadcast %195 : f32 to vector<1x16x16xf32>
    %198 = arith.mulf %197, %196 : vector<1x16x16xf32>
    %199 = arith.addf %194, %198 : vector<1x16x16xf32>
    %c34 = arith.constant 34 : index
    %200 = memref.load %arg1[%c34] : memref<98xf32, #tpu.memory_space<smem>>
    %201 = vector.extract_strided_slice %169 {offsets = [0, 0, 6], sizes = [1, 16, 16], strides = [1, 1, 1]} : vector<1x16x22xf32> to vector<1x16x16xf32>
    %202 = vector.broadcast %200 : f32 to vector<1x16x16xf32>
    %203 = arith.mulf %202, %201 : vector<1x16x16xf32>
    %204 = arith.addf %199, %203 : vector<1x16x16xf32>
    %205 = vector.extract_strided_slice %19 {offsets = [0, 5, 0], sizes = [1, 16, 22], strides = [1, 1, 1]} : vector<1x22x22xf32> to vector<1x16x22xf32>
    %c35 = arith.constant 35 : index
    %206 = memref.load %arg1[%c35] : memref<98xf32, #tpu.memory_space<smem>>
    %207 = vector.extract_strided_slice %205 {offsets = [0, 0, 0], sizes = [1, 16, 16], strides = [1, 1, 1]} : vector<1x16x22xf32> to vector<1x16x16xf32>
    %208 = vector.broadcast %206 : f32 to vector<1x16x16xf32>
    %209 = arith.mulf %208, %207 : vector<1x16x16xf32>
    %210 = arith.addf %204, %209 : vector<1x16x16xf32>
    %c36 = arith.constant 36 : index
    %211 = memref.load %arg1[%c36] : memref<98xf32, #tpu.memory_space<smem>>
    %212 = vector.extract_strided_slice %205 {offsets = [0, 0, 1], sizes = [1, 16, 16], strides = [1, 1, 1]} : vector<1x16x22xf32> to vector<1x16x16xf32>
    %213 = vector.broadcast %211 : f32 to vector<1x16x16xf32>
    %214 = arith.mulf %213, %212 : vector<1x16x16xf32>
    %215 = arith.addf %210, %214 : vector<1x16x16xf32>
    %c37 = arith.constant 37 : index
    %216 = memref.load %arg1[%c37] : memref<98xf32, #tpu.memory_space<smem>>
    %217 = vector.extract_strided_slice %205 {offsets = [0, 0, 2], sizes = [1, 16, 16], strides = [1, 1, 1]} : vector<1x16x22xf32> to vector<1x16x16xf32>
    %218 = vector.broadcast %216 : f32 to vector<1x16x16xf32>
    %219 = arith.mulf %218, %217 : vector<1x16x16xf32>
    %220 = arith.addf %215, %219 : vector<1x16x16xf32>
    %c38 = arith.constant 38 : index
    %221 = memref.load %arg1[%c38] : memref<98xf32, #tpu.memory_space<smem>>
    %222 = vector.extract_strided_slice %205 {offsets = [0, 0, 3], sizes = [1, 16, 16], strides = [1, 1, 1]} : vector<1x16x22xf32> to vector<1x16x16xf32>
    %223 = vector.broadcast %221 : f32 to vector<1x16x16xf32>
    %224 = arith.mulf %223, %222 : vector<1x16x16xf32>
    %225 = arith.addf %220, %224 : vector<1x16x16xf32>
    %c39 = arith.constant 39 : index
    %226 = memref.load %arg1[%c39] : memref<98xf32, #tpu.memory_space<smem>>
    %227 = vector.extract_strided_slice %205 {offsets = [0, 0, 4], sizes = [1, 16, 16], strides = [1, 1, 1]} : vector<1x16x22xf32> to vector<1x16x16xf32>
    %228 = vector.broadcast %226 : f32 to vector<1x16x16xf32>
    %229 = arith.mulf %228, %227 : vector<1x16x16xf32>
    %230 = arith.addf %225, %229 : vector<1x16x16xf32>
    %c40 = arith.constant 40 : index
    %231 = memref.load %arg1[%c40] : memref<98xf32, #tpu.memory_space<smem>>
    %232 = vector.extract_strided_slice %205 {offsets = [0, 0, 5], sizes = [1, 16, 16], strides = [1, 1, 1]} : vector<1x16x22xf32> to vector<1x16x16xf32>
    %233 = vector.broadcast %231 : f32 to vector<1x16x16xf32>
    %234 = arith.mulf %233, %232 : vector<1x16x16xf32>
    %235 = arith.addf %230, %234 : vector<1x16x16xf32>
    %c41 = arith.constant 41 : index
    %236 = memref.load %arg1[%c41] : memref<98xf32, #tpu.memory_space<smem>>
    %237 = vector.extract_strided_slice %205 {offsets = [0, 0, 6], sizes = [1, 16, 16], strides = [1, 1, 1]} : vector<1x16x22xf32> to vector<1x16x16xf32>
    %238 = vector.broadcast %236 : f32 to vector<1x16x16xf32>
    %239 = arith.mulf %238, %237 : vector<1x16x16xf32>
    %240 = arith.addf %235, %239 : vector<1x16x16xf32>
    %241 = vector.extract_strided_slice %19 {offsets = [0, 6, 0], sizes = [1, 16, 22], strides = [1, 1, 1]} : vector<1x22x22xf32> to vector<1x16x22xf32>
    %c42 = arith.constant 42 : index
    %242 = memref.load %arg1[%c42] : memref<98xf32, #tpu.memory_space<smem>>
    %243 = vector.extract_strided_slice %241 {offsets = [0, 0, 0], sizes = [1, 16, 16], strides = [1, 1, 1]} : vector<1x16x22xf32> to vector<1x16x16xf32>
    %244 = vector.broadcast %242 : f32 to vector<1x16x16xf32>
    %245 = arith.mulf %244, %243 : vector<1x16x16xf32>
    %246 = arith.addf %240, %245 : vector<1x16x16xf32>
    %c43 = arith.constant 43 : index
    %247 = memref.load %arg1[%c43] : memref<98xf32, #tpu.memory_space<smem>>
    %248 = vector.extract_strided_slice %241 {offsets = [0, 0, 1], sizes = [1, 16, 16], strides = [1, 1, 1]} : vector<1x16x22xf32> to vector<1x16x16xf32>
    %249 = vector.broadcast %247 : f32 to vector<1x16x16xf32>
    %250 = arith.mulf %249, %248 : vector<1x16x16xf32>
    %251 = arith.addf %246, %250 : vector<1x16x16xf32>
    %c44 = arith.constant 44 : index
    %252 = memref.load %arg1[%c44] : memref<98xf32, #tpu.memory_space<smem>>
    %253 = vector.extract_strided_slice %241 {offsets = [0, 0, 2], sizes = [1, 16, 16], strides = [1, 1, 1]} : vector<1x16x22xf32> to vector<1x16x16xf32>
    %254 = vector.broadcast %252 : f32 to vector<1x16x16xf32>
    %255 = arith.mulf %254, %253 : vector<1x16x16xf32>
    %256 = arith.addf %251, %255 : vector<1x16x16xf32>
    %c45 = arith.constant 45 : index
    %257 = memref.load %arg1[%c45] : memref<98xf32, #tpu.memory_space<smem>>
    %258 = vector.extract_strided_slice %241 {offsets = [0, 0, 3], sizes = [1, 16, 16], strides = [1, 1, 1]} : vector<1x16x22xf32> to vector<1x16x16xf32>
    %259 = vector.broadcast %257 : f32 to vector<1x16x16xf32>
    %260 = arith.mulf %259, %258 : vector<1x16x16xf32>
    %261 = arith.addf %256, %260 : vector<1x16x16xf32>
    %c46 = arith.constant 46 : index
    %262 = memref.load %arg1[%c46] : memref<98xf32, #tpu.memory_space<smem>>
    %263 = vector.extract_strided_slice %241 {offsets = [0, 0, 4], sizes = [1, 16, 16], strides = [1, 1, 1]} : vector<1x16x22xf32> to vector<1x16x16xf32>
    %264 = vector.broadcast %262 : f32 to vector<1x16x16xf32>
    %265 = arith.mulf %264, %263 : vector<1x16x16xf32>
    %266 = arith.addf %261, %265 : vector<1x16x16xf32>
    %c47 = arith.constant 47 : index
    %267 = memref.load %arg1[%c47] : memref<98xf32, #tpu.memory_space<smem>>
    %268 = vector.extract_strided_slice %241 {offsets = [0, 0, 5], sizes = [1, 16, 16], strides = [1, 1, 1]} : vector<1x16x22xf32> to vector<1x16x16xf32>
    %269 = vector.broadcast %267 : f32 to vector<1x16x16xf32>
    %270 = arith.mulf %269, %268 : vector<1x16x16xf32>
    %271 = arith.addf %266, %270 : vector<1x16x16xf32>
    %c48 = arith.constant 48 : index
    %272 = memref.load %arg1[%c48] : memref<98xf32, #tpu.memory_space<smem>>
    %273 = vector.extract_strided_slice %241 {offsets = [0, 0, 6], sizes = [1, 16, 16], strides = [1, 1, 1]} : vector<1x16x22xf32> to vector<1x16x16xf32>
    %274 = vector.broadcast %272 : f32 to vector<1x16x16xf32>
    %275 = arith.mulf %274, %273 : vector<1x16x16xf32>
    %276 = arith.addf %271, %275 : vector<1x16x16xf32>
    %cst_21 = arith.constant 0.000000e+00 : f32
    %277 = vector.broadcast %cst_21 : f32 to vector<1x16x16xf32>
    %278 = vector.extract_strided_slice %23 {offsets = [0, 0, 0], sizes = [1, 16, 22], strides = [1, 1, 1]} : vector<1x22x22xf32> to vector<1x16x22xf32>
    %c49 = arith.constant 49 : index
    %279 = memref.load %arg1[%c49] : memref<98xf32, #tpu.memory_space<smem>>
    %280 = vector.extract_strided_slice %278 {offsets = [0, 0, 0], sizes = [1, 16, 16], strides = [1, 1, 1]} : vector<1x16x22xf32> to vector<1x16x16xf32>
    %281 = vector.broadcast %279 : f32 to vector<1x16x16xf32>
    %282 = arith.mulf %281, %280 : vector<1x16x16xf32>
    %283 = arith.addf %277, %282 : vector<1x16x16xf32>
    %c50 = arith.constant 50 : index
    %284 = memref.load %arg1[%c50] : memref<98xf32, #tpu.memory_space<smem>>
    %285 = vector.extract_strided_slice %278 {offsets = [0, 0, 1], sizes = [1, 16, 16], strides = [1, 1, 1]} : vector<1x16x22xf32> to vector<1x16x16xf32>
    %286 = vector.broadcast %284 : f32 to vector<1x16x16xf32>
    %287 = arith.mulf %286, %285 : vector<1x16x16xf32>
    %288 = arith.addf %283, %287 : vector<1x16x16xf32>
    %c51 = arith.constant 51 : index
    %289 = memref.load %arg1[%c51] : memref<98xf32, #tpu.memory_space<smem>>
    %290 = vector.extract_strided_slice %278 {offsets = [0, 0, 2], sizes = [1, 16, 16], strides = [1, 1, 1]} : vector<1x16x22xf32> to vector<1x16x16xf32>
    %291 = vector.broadcast %289 : f32 to vector<1x16x16xf32>
    %292 = arith.mulf %291, %290 : vector<1x16x16xf32>
    %293 = arith.addf %288, %292 : vector<1x16x16xf32>
    %c52 = arith.constant 52 : index
    %294 = memref.load %arg1[%c52] : memref<98xf32, #tpu.memory_space<smem>>
    %295 = vector.extract_strided_slice %278 {offsets = [0, 0, 3], sizes = [1, 16, 16], strides = [1, 1, 1]} : vector<1x16x22xf32> to vector<1x16x16xf32>
    %296 = vector.broadcast %294 : f32 to vector<1x16x16xf32>
    %297 = arith.mulf %296, %295 : vector<1x16x16xf32>
    %298 = arith.addf %293, %297 : vector<1x16x16xf32>
    %c53 = arith.constant 53 : index
    %299 = memref.load %arg1[%c53] : memref<98xf32, #tpu.memory_space<smem>>
    %300 = vector.extract_strided_slice %278 {offsets = [0, 0, 4], sizes = [1, 16, 16], strides = [1, 1, 1]} : vector<1x16x22xf32> to vector<1x16x16xf32>
    %301 = vector.broadcast %299 : f32 to vector<1x16x16xf32>
    %302 = arith.mulf %301, %300 : vector<1x16x16xf32>
    %303 = arith.addf %298, %302 : vector<1x16x16xf32>
    %c54 = arith.constant 54 : index
    %304 = memref.load %arg1[%c54] : memref<98xf32, #tpu.memory_space<smem>>
    %305 = vector.extract_strided_slice %278 {offsets = [0, 0, 5], sizes = [1, 16, 16], strides = [1, 1, 1]} : vector<1x16x22xf32> to vector<1x16x16xf32>
    %306 = vector.broadcast %304 : f32 to vector<1x16x16xf32>
    %307 = arith.mulf %306, %305 : vector<1x16x16xf32>
    %308 = arith.addf %303, %307 : vector<1x16x16xf32>
    %c55 = arith.constant 55 : index
    %309 = memref.load %arg1[%c55] : memref<98xf32, #tpu.memory_space<smem>>
    %310 = vector.extract_strided_slice %278 {offsets = [0, 0, 6], sizes = [1, 16, 16], strides = [1, 1, 1]} : vector<1x16x22xf32> to vector<1x16x16xf32>
    %311 = vector.broadcast %309 : f32 to vector<1x16x16xf32>
    %312 = arith.mulf %311, %310 : vector<1x16x16xf32>
    %313 = arith.addf %308, %312 : vector<1x16x16xf32>
    %314 = vector.extract_strided_slice %23 {offsets = [0, 1, 0], sizes = [1, 16, 22], strides = [1, 1, 1]} : vector<1x22x22xf32> to vector<1x16x22xf32>
    %c56 = arith.constant 56 : index
    %315 = memref.load %arg1[%c56] : memref<98xf32, #tpu.memory_space<smem>>
    %316 = vector.extract_strided_slice %314 {offsets = [0, 0, 0], sizes = [1, 16, 16], strides = [1, 1, 1]} : vector<1x16x22xf32> to vector<1x16x16xf32>
    %317 = vector.broadcast %315 : f32 to vector<1x16x16xf32>
    %318 = arith.mulf %317, %316 : vector<1x16x16xf32>
    %319 = arith.addf %313, %318 : vector<1x16x16xf32>
    %c57 = arith.constant 57 : index
    %320 = memref.load %arg1[%c57] : memref<98xf32, #tpu.memory_space<smem>>
    %321 = vector.extract_strided_slice %314 {offsets = [0, 0, 1], sizes = [1, 16, 16], strides = [1, 1, 1]} : vector<1x16x22xf32> to vector<1x16x16xf32>
    %322 = vector.broadcast %320 : f32 to vector<1x16x16xf32>
    %323 = arith.mulf %322, %321 : vector<1x16x16xf32>
    %324 = arith.addf %319, %323 : vector<1x16x16xf32>
    %c58 = arith.constant 58 : index
    %325 = memref.load %arg1[%c58] : memref<98xf32, #tpu.memory_space<smem>>
    %326 = vector.extract_strided_slice %314 {offsets = [0, 0, 2], sizes = [1, 16, 16], strides = [1, 1, 1]} : vector<1x16x22xf32> to vector<1x16x16xf32>
    %327 = vector.broadcast %325 : f32 to vector<1x16x16xf32>
    %328 = arith.mulf %327, %326 : vector<1x16x16xf32>
    %329 = arith.addf %324, %328 : vector<1x16x16xf32>
    %c59 = arith.constant 59 : index
    %330 = memref.load %arg1[%c59] : memref<98xf32, #tpu.memory_space<smem>>
    %331 = vector.extract_strided_slice %314 {offsets = [0, 0, 3], sizes = [1, 16, 16], strides = [1, 1, 1]} : vector<1x16x22xf32> to vector<1x16x16xf32>
    %332 = vector.broadcast %330 : f32 to vector<1x16x16xf32>
    %333 = arith.mulf %332, %331 : vector<1x16x16xf32>
    %334 = arith.addf %329, %333 : vector<1x16x16xf32>
    %c60 = arith.constant 60 : index
    %335 = memref.load %arg1[%c60] : memref<98xf32, #tpu.memory_space<smem>>
    %336 = vector.extract_strided_slice %314 {offsets = [0, 0, 4], sizes = [1, 16, 16], strides = [1, 1, 1]} : vector<1x16x22xf32> to vector<1x16x16xf32>
    %337 = vector.broadcast %335 : f32 to vector<1x16x16xf32>
    %338 = arith.mulf %337, %336 : vector<1x16x16xf32>
    %339 = arith.addf %334, %338 : vector<1x16x16xf32>
    %c61 = arith.constant 61 : index
    %340 = memref.load %arg1[%c61] : memref<98xf32, #tpu.memory_space<smem>>
    %341 = vector.extract_strided_slice %314 {offsets = [0, 0, 5], sizes = [1, 16, 16], strides = [1, 1, 1]} : vector<1x16x22xf32> to vector<1x16x16xf32>
    %342 = vector.broadcast %340 : f32 to vector<1x16x16xf32>
    %343 = arith.mulf %342, %341 : vector<1x16x16xf32>
    %344 = arith.addf %339, %343 : vector<1x16x16xf32>
    %c62 = arith.constant 62 : index
    %345 = memref.load %arg1[%c62] : memref<98xf32, #tpu.memory_space<smem>>
    %346 = vector.extract_strided_slice %314 {offsets = [0, 0, 6], sizes = [1, 16, 16], strides = [1, 1, 1]} : vector<1x16x22xf32> to vector<1x16x16xf32>
    %347 = vector.broadcast %345 : f32 to vector<1x16x16xf32>
    %348 = arith.mulf %347, %346 : vector<1x16x16xf32>
    %349 = arith.addf %344, %348 : vector<1x16x16xf32>
    %350 = vector.extract_strided_slice %23 {offsets = [0, 2, 0], sizes = [1, 16, 22], strides = [1, 1, 1]} : vector<1x22x22xf32> to vector<1x16x22xf32>
    %c63 = arith.constant 63 : index
    %351 = memref.load %arg1[%c63] : memref<98xf32, #tpu.memory_space<smem>>
    %352 = vector.extract_strided_slice %350 {offsets = [0, 0, 0], sizes = [1, 16, 16], strides = [1, 1, 1]} : vector<1x16x22xf32> to vector<1x16x16xf32>
    %353 = vector.broadcast %351 : f32 to vector<1x16x16xf32>
    %354 = arith.mulf %353, %352 : vector<1x16x16xf32>
    %355 = arith.addf %349, %354 : vector<1x16x16xf32>
    %c64 = arith.constant 64 : index
    %356 = memref.load %arg1[%c64] : memref<98xf32, #tpu.memory_space<smem>>
    %357 = vector.extract_strided_slice %350 {offsets = [0, 0, 1], sizes = [1, 16, 16], strides = [1, 1, 1]} : vector<1x16x22xf32> to vector<1x16x16xf32>
    %358 = vector.broadcast %356 : f32 to vector<1x16x16xf32>
    %359 = arith.mulf %358, %357 : vector<1x16x16xf32>
    %360 = arith.addf %355, %359 : vector<1x16x16xf32>
    %c65 = arith.constant 65 : index
    %361 = memref.load %arg1[%c65] : memref<98xf32, #tpu.memory_space<smem>>
    %362 = vector.extract_strided_slice %350 {offsets = [0, 0, 2], sizes = [1, 16, 16], strides = [1, 1, 1]} : vector<1x16x22xf32> to vector<1x16x16xf32>
    %363 = vector.broadcast %361 : f32 to vector<1x16x16xf32>
    %364 = arith.mulf %363, %362 : vector<1x16x16xf32>
    %365 = arith.addf %360, %364 : vector<1x16x16xf32>
    %c66 = arith.constant 66 : index
    %366 = memref.load %arg1[%c66] : memref<98xf32, #tpu.memory_space<smem>>
    %367 = vector.extract_strided_slice %350 {offsets = [0, 0, 3], sizes = [1, 16, 16], strides = [1, 1, 1]} : vector<1x16x22xf32> to vector<1x16x16xf32>
    %368 = vector.broadcast %366 : f32 to vector<1x16x16xf32>
    %369 = arith.mulf %368, %367 : vector<1x16x16xf32>
    %370 = arith.addf %365, %369 : vector<1x16x16xf32>
    %c67 = arith.constant 67 : index
    %371 = memref.load %arg1[%c67] : memref<98xf32, #tpu.memory_space<smem>>
    %372 = vector.extract_strided_slice %350 {offsets = [0, 0, 4], sizes = [1, 16, 16], strides = [1, 1, 1]} : vector<1x16x22xf32> to vector<1x16x16xf32>
    %373 = vector.broadcast %371 : f32 to vector<1x16x16xf32>
    %374 = arith.mulf %373, %372 : vector<1x16x16xf32>
    %375 = arith.addf %370, %374 : vector<1x16x16xf32>
    %c68 = arith.constant 68 : index
    %376 = memref.load %arg1[%c68] : memref<98xf32, #tpu.memory_space<smem>>
    %377 = vector.extract_strided_slice %350 {offsets = [0, 0, 5], sizes = [1, 16, 16], strides = [1, 1, 1]} : vector<1x16x22xf32> to vector<1x16x16xf32>
    %378 = vector.broadcast %376 : f32 to vector<1x16x16xf32>
    %379 = arith.mulf %378, %377 : vector<1x16x16xf32>
    %380 = arith.addf %375, %379 : vector<1x16x16xf32>
    %c69 = arith.constant 69 : index
    %381 = memref.load %arg1[%c69] : memref<98xf32, #tpu.memory_space<smem>>
    %382 = vector.extract_strided_slice %350 {offsets = [0, 0, 6], sizes = [1, 16, 16], strides = [1, 1, 1]} : vector<1x16x22xf32> to vector<1x16x16xf32>
    %383 = vector.broadcast %381 : f32 to vector<1x16x16xf32>
    %384 = arith.mulf %383, %382 : vector<1x16x16xf32>
    %385 = arith.addf %380, %384 : vector<1x16x16xf32>
    %386 = vector.extract_strided_slice %23 {offsets = [0, 3, 0], sizes = [1, 16, 22], strides = [1, 1, 1]} : vector<1x22x22xf32> to vector<1x16x22xf32>
    %c70 = arith.constant 70 : index
    %387 = memref.load %arg1[%c70] : memref<98xf32, #tpu.memory_space<smem>>
    %388 = vector.extract_strided_slice %386 {offsets = [0, 0, 0], sizes = [1, 16, 16], strides = [1, 1, 1]} : vector<1x16x22xf32> to vector<1x16x16xf32>
    %389 = vector.broadcast %387 : f32 to vector<1x16x16xf32>
    %390 = arith.mulf %389, %388 : vector<1x16x16xf32>
    %391 = arith.addf %385, %390 : vector<1x16x16xf32>
    %c71 = arith.constant 71 : index
    %392 = memref.load %arg1[%c71] : memref<98xf32, #tpu.memory_space<smem>>
    %393 = vector.extract_strided_slice %386 {offsets = [0, 0, 1], sizes = [1, 16, 16], strides = [1, 1, 1]} : vector<1x16x22xf32> to vector<1x16x16xf32>
    %394 = vector.broadcast %392 : f32 to vector<1x16x16xf32>
    %395 = arith.mulf %394, %393 : vector<1x16x16xf32>
    %396 = arith.addf %391, %395 : vector<1x16x16xf32>
    %c72 = arith.constant 72 : index
    %397 = memref.load %arg1[%c72] : memref<98xf32, #tpu.memory_space<smem>>
    %398 = vector.extract_strided_slice %386 {offsets = [0, 0, 2], sizes = [1, 16, 16], strides = [1, 1, 1]} : vector<1x16x22xf32> to vector<1x16x16xf32>
    %399 = vector.broadcast %397 : f32 to vector<1x16x16xf32>
    %400 = arith.mulf %399, %398 : vector<1x16x16xf32>
    %401 = arith.addf %396, %400 : vector<1x16x16xf32>
    %c73 = arith.constant 73 : index
    %402 = memref.load %arg1[%c73] : memref<98xf32, #tpu.memory_space<smem>>
    %403 = vector.extract_strided_slice %386 {offsets = [0, 0, 3], sizes = [1, 16, 16], strides = [1, 1, 1]} : vector<1x16x22xf32> to vector<1x16x16xf32>
    %404 = vector.broadcast %402 : f32 to vector<1x16x16xf32>
    %405 = arith.mulf %404, %403 : vector<1x16x16xf32>
    %406 = arith.addf %401, %405 : vector<1x16x16xf32>
    %c74 = arith.constant 74 : index
    %407 = memref.load %arg1[%c74] : memref<98xf32, #tpu.memory_space<smem>>
    %408 = vector.extract_strided_slice %386 {offsets = [0, 0, 4], sizes = [1, 16, 16], strides = [1, 1, 1]} : vector<1x16x22xf32> to vector<1x16x16xf32>
    %409 = vector.broadcast %407 : f32 to vector<1x16x16xf32>
    %410 = arith.mulf %409, %408 : vector<1x16x16xf32>
    %411 = arith.addf %406, %410 : vector<1x16x16xf32>
    %c75 = arith.constant 75 : index
    %412 = memref.load %arg1[%c75] : memref<98xf32, #tpu.memory_space<smem>>
    %413 = vector.extract_strided_slice %386 {offsets = [0, 0, 5], sizes = [1, 16, 16], strides = [1, 1, 1]} : vector<1x16x22xf32> to vector<1x16x16xf32>
    %414 = vector.broadcast %412 : f32 to vector<1x16x16xf32>
    %415 = arith.mulf %414, %413 : vector<1x16x16xf32>
    %416 = arith.addf %411, %415 : vector<1x16x16xf32>
    %c76 = arith.constant 76 : index
    %417 = memref.load %arg1[%c76] : memref<98xf32, #tpu.memory_space<smem>>
    %418 = vector.extract_strided_slice %386 {offsets = [0, 0, 6], sizes = [1, 16, 16], strides = [1, 1, 1]} : vector<1x16x22xf32> to vector<1x16x16xf32>
    %419 = vector.broadcast %417 : f32 to vector<1x16x16xf32>
    %420 = arith.mulf %419, %418 : vector<1x16x16xf32>
    %421 = arith.addf %416, %420 : vector<1x16x16xf32>
    %422 = vector.extract_strided_slice %23 {offsets = [0, 4, 0], sizes = [1, 16, 22], strides = [1, 1, 1]} : vector<1x22x22xf32> to vector<1x16x22xf32>
    %c77 = arith.constant 77 : index
    %423 = memref.load %arg1[%c77] : memref<98xf32, #tpu.memory_space<smem>>
    %424 = vector.extract_strided_slice %422 {offsets = [0, 0, 0], sizes = [1, 16, 16], strides = [1, 1, 1]} : vector<1x16x22xf32> to vector<1x16x16xf32>
    %425 = vector.broadcast %423 : f32 to vector<1x16x16xf32>
    %426 = arith.mulf %425, %424 : vector<1x16x16xf32>
    %427 = arith.addf %421, %426 : vector<1x16x16xf32>
    %c78 = arith.constant 78 : index
    %428 = memref.load %arg1[%c78] : memref<98xf32, #tpu.memory_space<smem>>
    %429 = vector.extract_strided_slice %422 {offsets = [0, 0, 1], sizes = [1, 16, 16], strides = [1, 1, 1]} : vector<1x16x22xf32> to vector<1x16x16xf32>
    %430 = vector.broadcast %428 : f32 to vector<1x16x16xf32>
    %431 = arith.mulf %430, %429 : vector<1x16x16xf32>
    %432 = arith.addf %427, %431 : vector<1x16x16xf32>
    %c79 = arith.constant 79 : index
    %433 = memref.load %arg1[%c79] : memref<98xf32, #tpu.memory_space<smem>>
    %434 = vector.extract_strided_slice %422 {offsets = [0, 0, 2], sizes = [1, 16, 16], strides = [1, 1, 1]} : vector<1x16x22xf32> to vector<1x16x16xf32>
    %435 = vector.broadcast %433 : f32 to vector<1x16x16xf32>
    %436 = arith.mulf %435, %434 : vector<1x16x16xf32>
    %437 = arith.addf %432, %436 : vector<1x16x16xf32>
    %c80 = arith.constant 80 : index
    %438 = memref.load %arg1[%c80] : memref<98xf32, #tpu.memory_space<smem>>
    %439 = vector.extract_strided_slice %422 {offsets = [0, 0, 3], sizes = [1, 16, 16], strides = [1, 1, 1]} : vector<1x16x22xf32> to vector<1x16x16xf32>
    %440 = vector.broadcast %438 : f32 to vector<1x16x16xf32>
    %441 = arith.mulf %440, %439 : vector<1x16x16xf32>
    %442 = arith.addf %437, %441 : vector<1x16x16xf32>
    %c81 = arith.constant 81 : index
    %443 = memref.load %arg1[%c81] : memref<98xf32, #tpu.memory_space<smem>>
    %444 = vector.extract_strided_slice %422 {offsets = [0, 0, 4], sizes = [1, 16, 16], strides = [1, 1, 1]} : vector<1x16x22xf32> to vector<1x16x16xf32>
    %445 = vector.broadcast %443 : f32 to vector<1x16x16xf32>
    %446 = arith.mulf %445, %444 : vector<1x16x16xf32>
    %447 = arith.addf %442, %446 : vector<1x16x16xf32>
    %c82 = arith.constant 82 : index
    %448 = memref.load %arg1[%c82] : memref<98xf32, #tpu.memory_space<smem>>
    %449 = vector.extract_strided_slice %422 {offsets = [0, 0, 5], sizes = [1, 16, 16], strides = [1, 1, 1]} : vector<1x16x22xf32> to vector<1x16x16xf32>
    %450 = vector.broadcast %448 : f32 to vector<1x16x16xf32>
    %451 = arith.mulf %450, %449 : vector<1x16x16xf32>
    %452 = arith.addf %447, %451 : vector<1x16x16xf32>
    %c83 = arith.constant 83 : index
    %453 = memref.load %arg1[%c83] : memref<98xf32, #tpu.memory_space<smem>>
    %454 = vector.extract_strided_slice %422 {offsets = [0, 0, 6], sizes = [1, 16, 16], strides = [1, 1, 1]} : vector<1x16x22xf32> to vector<1x16x16xf32>
    %455 = vector.broadcast %453 : f32 to vector<1x16x16xf32>
    %456 = arith.mulf %455, %454 : vector<1x16x16xf32>
    %457 = arith.addf %452, %456 : vector<1x16x16xf32>
    %458 = vector.extract_strided_slice %23 {offsets = [0, 5, 0], sizes = [1, 16, 22], strides = [1, 1, 1]} : vector<1x22x22xf32> to vector<1x16x22xf32>
    %c84 = arith.constant 84 : index
    %459 = memref.load %arg1[%c84] : memref<98xf32, #tpu.memory_space<smem>>
    %460 = vector.extract_strided_slice %458 {offsets = [0, 0, 0], sizes = [1, 16, 16], strides = [1, 1, 1]} : vector<1x16x22xf32> to vector<1x16x16xf32>
    %461 = vector.broadcast %459 : f32 to vector<1x16x16xf32>
    %462 = arith.mulf %461, %460 : vector<1x16x16xf32>
    %463 = arith.addf %457, %462 : vector<1x16x16xf32>
    %c85 = arith.constant 85 : index
    %464 = memref.load %arg1[%c85] : memref<98xf32, #tpu.memory_space<smem>>
    %465 = vector.extract_strided_slice %458 {offsets = [0, 0, 1], sizes = [1, 16, 16], strides = [1, 1, 1]} : vector<1x16x22xf32> to vector<1x16x16xf32>
    %466 = vector.broadcast %464 : f32 to vector<1x16x16xf32>
    %467 = arith.mulf %466, %465 : vector<1x16x16xf32>
    %468 = arith.addf %463, %467 : vector<1x16x16xf32>
    %c86 = arith.constant 86 : index
    %469 = memref.load %arg1[%c86] : memref<98xf32, #tpu.memory_space<smem>>
    %470 = vector.extract_strided_slice %458 {offsets = [0, 0, 2], sizes = [1, 16, 16], strides = [1, 1, 1]} : vector<1x16x22xf32> to vector<1x16x16xf32>
    %471 = vector.broadcast %469 : f32 to vector<1x16x16xf32>
    %472 = arith.mulf %471, %470 : vector<1x16x16xf32>
    %473 = arith.addf %468, %472 : vector<1x16x16xf32>
    %c87 = arith.constant 87 : index
    %474 = memref.load %arg1[%c87] : memref<98xf32, #tpu.memory_space<smem>>
    %475 = vector.extract_strided_slice %458 {offsets = [0, 0, 3], sizes = [1, 16, 16], strides = [1, 1, 1]} : vector<1x16x22xf32> to vector<1x16x16xf32>
    %476 = vector.broadcast %474 : f32 to vector<1x16x16xf32>
    %477 = arith.mulf %476, %475 : vector<1x16x16xf32>
    %478 = arith.addf %473, %477 : vector<1x16x16xf32>
    %c88 = arith.constant 88 : index
    %479 = memref.load %arg1[%c88] : memref<98xf32, #tpu.memory_space<smem>>
    %480 = vector.extract_strided_slice %458 {offsets = [0, 0, 4], sizes = [1, 16, 16], strides = [1, 1, 1]} : vector<1x16x22xf32> to vector<1x16x16xf32>
    %481 = vector.broadcast %479 : f32 to vector<1x16x16xf32>
    %482 = arith.mulf %481, %480 : vector<1x16x16xf32>
    %483 = arith.addf %478, %482 : vector<1x16x16xf32>
    %c89 = arith.constant 89 : index
    %484 = memref.load %arg1[%c89] : memref<98xf32, #tpu.memory_space<smem>>
    %485 = vector.extract_strided_slice %458 {offsets = [0, 0, 5], sizes = [1, 16, 16], strides = [1, 1, 1]} : vector<1x16x22xf32> to vector<1x16x16xf32>
    %486 = vector.broadcast %484 : f32 to vector<1x16x16xf32>
    %487 = arith.mulf %486, %485 : vector<1x16x16xf32>
    %488 = arith.addf %483, %487 : vector<1x16x16xf32>
    %c90 = arith.constant 90 : index
    %489 = memref.load %arg1[%c90] : memref<98xf32, #tpu.memory_space<smem>>
    %490 = vector.extract_strided_slice %458 {offsets = [0, 0, 6], sizes = [1, 16, 16], strides = [1, 1, 1]} : vector<1x16x22xf32> to vector<1x16x16xf32>
    %491 = vector.broadcast %489 : f32 to vector<1x16x16xf32>
    %492 = arith.mulf %491, %490 : vector<1x16x16xf32>
    %493 = arith.addf %488, %492 : vector<1x16x16xf32>
    %494 = vector.extract_strided_slice %23 {offsets = [0, 6, 0], sizes = [1, 16, 22], strides = [1, 1, 1]} : vector<1x22x22xf32> to vector<1x16x22xf32>
    %c91 = arith.constant 91 : index
    %495 = memref.load %arg1[%c91] : memref<98xf32, #tpu.memory_space<smem>>
    %496 = vector.extract_strided_slice %494 {offsets = [0, 0, 0], sizes = [1, 16, 16], strides = [1, 1, 1]} : vector<1x16x22xf32> to vector<1x16x16xf32>
    %497 = vector.broadcast %495 : f32 to vector<1x16x16xf32>
    %498 = arith.mulf %497, %496 : vector<1x16x16xf32>
    %499 = arith.addf %493, %498 : vector<1x16x16xf32>
    %c92 = arith.constant 92 : index
    %500 = memref.load %arg1[%c92] : memref<98xf32, #tpu.memory_space<smem>>
    %501 = vector.extract_strided_slice %494 {offsets = [0, 0, 1], sizes = [1, 16, 16], strides = [1, 1, 1]} : vector<1x16x22xf32> to vector<1x16x16xf32>
    %502 = vector.broadcast %500 : f32 to vector<1x16x16xf32>
    %503 = arith.mulf %502, %501 : vector<1x16x16xf32>
    %504 = arith.addf %499, %503 : vector<1x16x16xf32>
    %c93 = arith.constant 93 : index
    %505 = memref.load %arg1[%c93] : memref<98xf32, #tpu.memory_space<smem>>
    %506 = vector.extract_strided_slice %494 {offsets = [0, 0, 2], sizes = [1, 16, 16], strides = [1, 1, 1]} : vector<1x16x22xf32> to vector<1x16x16xf32>
    %507 = vector.broadcast %505 : f32 to vector<1x16x16xf32>
    %508 = arith.mulf %507, %506 : vector<1x16x16xf32>
    %509 = arith.addf %504, %508 : vector<1x16x16xf32>
    %c94 = arith.constant 94 : index
    %510 = memref.load %arg1[%c94] : memref<98xf32, #tpu.memory_space<smem>>
    %511 = vector.extract_strided_slice %494 {offsets = [0, 0, 3], sizes = [1, 16, 16], strides = [1, 1, 1]} : vector<1x16x22xf32> to vector<1x16x16xf32>
    %512 = vector.broadcast %510 : f32 to vector<1x16x16xf32>
    %513 = arith.mulf %512, %511 : vector<1x16x16xf32>
    %514 = arith.addf %509, %513 : vector<1x16x16xf32>
    %c95 = arith.constant 95 : index
    %515 = memref.load %arg1[%c95] : memref<98xf32, #tpu.memory_space<smem>>
    %516 = vector.extract_strided_slice %494 {offsets = [0, 0, 4], sizes = [1, 16, 16], strides = [1, 1, 1]} : vector<1x16x22xf32> to vector<1x16x16xf32>
    %517 = vector.broadcast %515 : f32 to vector<1x16x16xf32>
    %518 = arith.mulf %517, %516 : vector<1x16x16xf32>
    %519 = arith.addf %514, %518 : vector<1x16x16xf32>
    %c96 = arith.constant 96 : index
    %520 = memref.load %arg1[%c96] : memref<98xf32, #tpu.memory_space<smem>>
    %521 = vector.extract_strided_slice %494 {offsets = [0, 0, 5], sizes = [1, 16, 16], strides = [1, 1, 1]} : vector<1x16x22xf32> to vector<1x16x16xf32>
    %522 = vector.broadcast %520 : f32 to vector<1x16x16xf32>
    %523 = arith.mulf %522, %521 : vector<1x16x16xf32>
    %524 = arith.addf %519, %523 : vector<1x16x16xf32>
    %c97 = arith.constant 97 : index
    %525 = memref.load %arg1[%c97] : memref<98xf32, #tpu.memory_space<smem>>
    %526 = vector.extract_strided_slice %494 {offsets = [0, 0, 6], sizes = [1, 16, 16], strides = [1, 1, 1]} : vector<1x16x22xf32> to vector<1x16x16xf32>
    %527 = vector.broadcast %525 : f32 to vector<1x16x16xf32>
    %528 = arith.mulf %527, %526 : vector<1x16x16xf32>
    %529 = arith.addf %524, %528 : vector<1x16x16xf32>
    %530 = arith.addf %276, %529 : vector<1x16x16xf32>
    %c0_22 = arith.constant 0 : index
    %531 = memref.load %arg2[%c0_22] : memref<1xf32, #tpu.memory_space<smem>>
    %532 = vector.broadcast %531 : f32 to vector<1x16x16xf32>
    %533 = arith.addf %530, %532 : vector<1x16x16xf32>
    %534 = arith.negf %533 : vector<1x16x16xf32>
    %535 = math.exp %534 : vector<1x16x16xf32>
    %cst_23 = arith.constant 1.000000e+00 : f32
    %536 = vector.broadcast %cst_23 : f32 to vector<1x16x16xf32>
    %537 = arith.addf %536, %535 : vector<1x16x16xf32>
    %538 = arith.divf %536, %537 : vector<1x16x16xf32>
    %c0_24 = arith.constant 0 : index
    %c0_25 = arith.constant 0 : index
    %c0_26 = arith.constant 0 : index
    %c0_27 = arith.constant 0 : index
    %539 = vector.load %arg4[%c0_24, %c0_25, %c0_26, %c0_27] : memref<1x1x16x16xf32, #tpu.memory_space<vmem>>, vector<1x1x16x16xf32>
    %540 = vector.shape_cast %539 : vector<1x1x16x16xf32> to vector<1x16x16xf32>
    %541 = vector.shape_cast %538 : vector<1x16x16xf32> to vector<1x1x16x16xf32>
    tpu.vector_store %arg4[%c0_24, %c0_25, %c0_26, %c0_27], %541 {strides = array<i32>} : memref<1x1x16x16xf32, #tpu.memory_space<vmem>>, vector<1x1x16x16xf32>,
    return
  }
  func.func @transform_0(%arg0: i32) -> i32 {
    %c0_i32 = arith.constant 0 : i32
    %c0_i32_0 = arith.constant 0 : i32
    return %c0_i32 : i32
  }
  func.func @transform_1(%arg0: i32) -> i32 {
    %c0_i32 = arith.constant 0 : i32
    %c0_i32_0 = arith.constant 0 : i32
    return %c0_i32 : i32
  }
  func.func @transform_2(%arg0: i32) -> (i32, i32, i32, i32) {
    %c0_i32 = arith.constant 0 : i32
    %c0_i32_0 = arith.constant 0 : i32
    %c0_i32_1 = arith.constant 0 : i32
    %c0_i32_2 = arith.constant 0 : i32
    return %arg0, %c0_i32, %c0_i32_0, %c0_i32_1 : i32, i32, i32, i32
  }
  func.func @transform_3(%arg0: i32) -> (i32, i32, i32, i32) {
    %c0_i32 = arith.constant 0 : i32
    %c0_i32_0 = arith.constant 0 : i32
    %c0_i32_1 = arith.constant 0 : i32
    %c0_i32_2 = arith.constant 0 : i32
    return %arg0, %c0_i32, %c0_i32_0, %c0_i32_1 : i32, i32, i32, i32
  }
}

</mosaic_0001>

<bundles_post_ra>
// kernel: tpu_custom_call.1
= control target key start
LH: loop header
LB: loop body
LE: loop exit
PB: predicated region body
PF: predicated region fallthrough
CT: control target
= control target key end

     0   :  { %s3571_s0 = inlined_call_operand.vmem [shape: f32[98], index: 0, kind: input, shape index: {}]   ;;  %s3572_s1 = inlined_call_operand.<no memory space> [shape: f32[1], index: 1, kind: input, shape index: {}]   ;;  %s3573_s2 = inlined_call_operand.hbm [shape: f32[2,4,16,16], index: 2, kind: input, shape index: {}]   ;;  %s3574_s3 = inlined_call_operand.hbm [shape: f32[2,1,16,16], index: 3, kind: output, shape index: {}]  }
   0x1   :  { %8 = sst [smem:[#allocation2]] %s3572_s1 }
   0x2   :  { %9 = vsyncpa [#allocation6], 0 }
   0x3   :  { %10 = vsyncpa [#allocation4], 0 }
   0x4   :  { %12 = vsyncpa [#allocation4 + $0x1], 0 }
   0x5   :  { %13 = vsyncpa [#allocation5], 0 }
   0x6   :  { %15 = vsyncpa [#allocation5 + $0x1], 0  ;;  %s2678_s14 = smov 0   ;;  %s2680_s15 = smov 0  }
   0x7   :  { %s2682_s16 = smov 0   ;;  %s2684_s17 = smov 0  }
   0x8 LB: > { %s2699_s1 = sadd.s32 4294967295, %s2641_s17   ;;  %s2327_s18 = sadd.s32 4294967294, %s2641_s17   ;;  %s2641_s17 = sphi %s2684_s17, %s3585_s17   ;;  %s2637_s16 = sphi %s2682_s16, %s3584_s16   ;;  %s2633_s15 = sphi %s2680_s15, %s3583_s15   ;;  %s2629_s14 = sphi %s2678_s14, %s3582_s14  }
   0x9   : > { %s2703_s19 = sadd.s32 1, %s2641_s17   ;;  %s70_s20 = sadd.s32 1, %s2637_s16 }
   0xa   : > { %s67_s21 = ssub.s32 %s2641_s17, %s2703_s19  ;;  %p77_p0 = scmp.ne.s32.totalorder %s2637_s16, %s2633_s15 }
   0xb   : > { %p68_p1 = scmp.eq.s32.totalorder %s67_s21, 0  ;;  %p78_p2 = scmp.eq.s32.totalorder %s2641_s17, 0 }
   0xc   : > { %p83_p3 = scmp.ne.s32.totalorder %s2633_s15, %s2629_s14  ;;  %p84_p4 = scmp.eq.s32.totalorder %s2699_s1, 0 }
   0xd   : > { %s2715_s22 = scalar_select %p68_p1, %s2637_s16, %s70_s20  }
   0xe   : > { %p2717_p5 = por %p78_p2, %p77_p0  ;;  %p2723_p6 = por %p84_p4, %p83_p3 }
   0xf   : > { %p107_p7 = scmp.eq.s32.totalorder %s2699_s1, 1  ;;  %p113_p8 = scmp.eq.s32.totalorder %s2327_s18, 1 }
  0x10   : > { %p2328_p9 = scmp.ge.s32.totalorder %s2641_s17, 1  ;;  %p120_p10 = scmp.lt.s32.totalorder %s2641_s17, 3 }
  0x11   : > { %p2730_p11 = por %p107_p7, %p77_p0  ;;  %p2734_p12 = por %p113_p8, %p83_p3 }
  0x12   : > { %p2738_p13 = pnand %p2328_p9, %p120_p10  ;;  %s132_s30 = sshll.u32 %s3571_s0, 4  ;;  %s133_s30 = int_to_ptr.vmem [resolvable:$true] %s132_s30 }
  0x13   : > { %p2471_p2 = scmp.lt.s32.totalorder %s2641_s17, 2  ;;  %s146_s4 = sand.u32 1, %s2637_s16  }
  0x14   : > { %p2458_p1 = pneg %p2738_p13  ;;  %s2331_s6 = sshll.u32 %s146_s4, 6 }
  0x15   : > { %p2754_p3 = pnand %p2471_p2, %p2717_p5  ;;  %s2643_s7 = smov [#allocation3]  }
  0x16   : > { %p2459_p7 = pnand %p2458_p1, %p84_p4  ;;  %s2448_s8 = sshll.u32 %s2641_s17, 6 }
  0x17   : > { %s150_s9 = scalar_lea.vmem [#allocation7], %s2331_s6  ;;  %s155_s13 = scalar_lea.hbm %s3573_s2, %s2448_s8 }
  0x18   : > { %2461 = dma.vmem_to_smem (!%p2459_p7), %s133_s30, 16, %s2643_s7, [#allocation6]  }
  0x19   : > { %s158_s10 = sshll.u32 %s150_s9, 4  ;;  %s156_s18 = sshll.u32 %s155_s13, 4  ;;  %s159_s10 = int_to_ptr.vmem [resolvable:$true] %s158_s10  ;;  %s157_s18 = int_to_ptr.hbm [resolvable:$true] %s156_s18 }
  0x1a   : > { %s147_s20 = scalar_lea.sflag [#allocation4], %s146_s4  ;;  %s2541_s21 = sshra.s32 %s157_s18, 4  ;;  %s2542_s21 = int_to_ptr.hbm [resolvable:$true] %s2541_s21 }
  0x1b   : > { %s2543_s23 = scalar_lea.hbm %s2542_s21, 64  ;;  %p2545_p8 = pneg %p2754_p3 }
  0x1c   : > { %p2544_p5 = scmp.ne.s32.totalorder %s2542_s21, %s2543_s23  ;;  %s2548_s30 = scalar_lea.hbm %s3573_s2, 128 }
  0x1d   : > { %p2549_p1 = scmp.lt.s32.totalorder %s2542_s21, %s3573_s2  ;;  %p2550_p2 = scmp.lt.s32.totalorder %s2548_s30, %s2543_s23 }
  0x1e   : > { %p2546_p9 = pnand %p2545_p8, %p2544_p5 }
  0x1f   : > { %p2551_p7 = por %p2550_p2, %p2549_p1 }
  0x20   : > { %p2547_p10 = pneg %p2546_p9 }
  0x22   : > { %p2552_p0 = pnand %p2551_p7, %p2547_p10 }
  0x24   : > { %2555 = shalt.err (!%p2552_p0)
}
  0x25   : > { %s2644_s4 = smov 128   ;;  %s2645_s8 = smov 8  }
  0x26   : > { %2465 = dma.hbm_to_vmem [thread:$0]  (!%p2754_p3), %s157_s18, 1024, %s159_s10, %s147_s20, %s2644_s4, %s2644_s4, %s2645_s8  }
  0x27   : > { %170 = sbr.rel (%p2738_p13) target bundleno = 777 (0x309), region = 32 }
  0x2c   : > { %2616 = dma.done.wait (%p84_p4), [#allocation6], 16  }
  0x2d   : > { %2618 = vsyncadd (%p84_p4), [#allocation6], 4294967280  ;;  %s2779_s9 = sand.u32 1, %s2633_s15  }
  0x2e   : > { %s2336_s11 = sshll.u32 %s2779_s9, 6  ;;  %s178_s12 = scalar_lea.sflag [#allocation4], %s2779_s9 }
  0x2f   : > { %s181_s13 = scalar_lea.vmem [#allocation7], %s2336_s11 }
  0x30   : > { %2620 = dma.done.wait (%p2723_p6), %s178_s12, 1024  }
  0x31   : > { %2622 = vsyncadd (%p2723_p6), %s178_s12, 4294966272 }
  0x32   : > { %187 = sfence }
  0x33   : > { %v206_v0 = vld [vmem:[%s181_s13] sm:$0xff]  ;;  %v2338_v1 = vld [vmem:[%s181_s13 + $0x10] sm:$0xff]  ;;  %v207_v4 = vld [vmem:[%s181_s13 + $0x8] sm:$0xff]  ;;  %s2646_s24 = smov 3   ;;  %s2345_s27 = sld [smem:[#allocation3 + $0x2]]  ;;  %vm239_vm0 = vcmask 23552  }
  0x34   : > { %v2340_v2 = vld [vmem:[%s181_s13 + $0x20] sm:$0xff]  ;;  %v211_v3 = vadd.f32 %v2338_v1, %v206_v0  ;;  %v2339_v5 = vld [vmem:[%s181_s13 + $0x18] sm:$0xff]  ;;  %v213_v6 = vmax.f32 %v206_v0, %v2338_v1  ;;  %v2342_v7 = vld [vmem:[%s181_s13 + $0x30] sm:$0xff]  ;;  %s2344_s5 = sld [smem:[#allocation3 + $0x1]]  ;;  %vm242_vm1 = vcmask 154624   ;;  %vm247_vm2 = vcmask 1042432  }
  0x35   : > { %v212_v8 = vadd.f32 %v2339_v5, %v207_v4  ;;  %v2341_v9 = vld [vmem:[%s181_s13 + $0x28] sm:$0xff]  ;;  %v214_v12 = vmax.f32 %v207_v4, %v2339_v5  ;;  %v2343_v16 = vld [vmem:[%s181_s13 + $0x38] sm:$0xff]  ;;  %s2346_s10 = sld [smem:[#allocation3 + $0x3]]  ;;  %s2647_s18 = smov 126   ;;  %vm376_vm3 = vcmask 1046528   ;;  %vm520_vm4 = vcmask 1045504  }
  0x36   : > { %v218_v10 = vadd.f32 %v2340_v2, %v211_v3  ;;  %v220_v11 = vmax.f32 %v213_v6, %v2340_v2  ;;  %s2648_s20 = smov 127   ;;  %s2348_s21 = sld [smem:[#allocation3 + $0x5]]  ;;  %vm664_vm5 = vcmask 1044480   ;;  %vm808_vm6 = vcmask 1043456  }
  0x37   : > { %v219_v14 = vadd.f32 %v2341_v9, %v212_v8  ;;  %v221_v18 = vmax.f32 %v214_v12, %v2341_v9  ;;  %s2347_s23 = sld [smem:[#allocation3 + $0x4]]  ;;  %s2649_s28 = smov 125   ;;  %vm1095_vm7 = vcmask 1041408   ;;  %vm2223_vm11 = vcmask 130048  }
  0x38   : > { %v225_v13 = vadd.f32 %v2342_v7, %v218_v10  ;;  %v227_v15 = vmax.f32 %v220_v11, %v2342_v7  ;;  %s2807_s29 = sld [smem:[#allocation3 + $0x6]]  ;;  %s2650_s7 = smov 123  }
  0x39   : > { %v226_v19 = vadd.f32 %v2343_v16, %v219_v14  ;;  %v228_v20 = vmax.f32 %v221_v18, %v2343_v16  ;;  %v299_v26 = vstv %s2345_s27  ;;  %s2352_s30 = sld [smem:[#allocation3 + $0x9]]  ;;  %s2651_s4 = smov 124  }
  0x3a   : > { %v229_v17 = vmul.f32 0.25, %v225_v13  ;;  %258 = vrot.lane.b32.xlu1 %v227_v15, %s2646_s24  ;;  %v285_v27 = vstv %s2344_s5  ;;  %s2351_s6 = sld [smem:[#allocation3 + $0x8]]  ;;  %s2652_s11 = smov 122  }
  0x3b   : > { %v230_v21 = vmul.f32 0.25, %v226_v19  ;;  %v313_v36 = vstv %s2346_s10  ;;  %s2353_s8 = sld [smem:[#allocation3 + $0xa]] }
  0x3c   : > { %233 = vrot.lane.b32.xlu0 %v229_v17, %s2646_s24  ;;  %v341_v40 = vstv %s2348_s21  ;;  %s2355_s12 = sld [smem:[#allocation3 + $0xc]] }
  0x3d   : > { %v327_v41 = vstv %s2347_s23  ;;  %s2354_s13 = sld [smem:[#allocation3 + $0xb]] }
  0x3e   : > { %v355_v45 = vstv %s2807_s29  ;;  %s2359_s27 = sld [smem:[#allocation3 + $0x10]] }
  0x3f   : > { %v408_v48 = vstv %s2352_s30  ;;  %s2358_s5 = sld [smem:[#allocation3 + $0xf]] }
  0x40   : > { %v387_v49 = vstv %s2351_s6  ;;  %s2360_s10 = sld [smem:[#allocation3 + $0x11]] }
  0x41   : > { %v429_v60 = vstv %s2353_s8  ;;  %s2362_s21 = sld [smem:[#allocation3 + $0x13]] }
  0x42   : > { %260 = vrot.lane.b32.xlu1 %v228_v20, %s2646_s24  ;;  %v471_v8 = vstv %s2355_s12  ;;  %s2361_s23 = sld [smem:[#allocation3 + $0x12]] }
  0x43   : > { %v450_v10 = vstv %s2354_s13  ;;  %s2363_s29 = sld [smem:[#allocation3 + $0x14]] }
  0x44   : > { %235 = vrot.lane.b32.xlu0 %v230_v21, %s2646_s24  ;;  %s2356_s24 = sld [smem:[#allocation3 + $0xd]] }
  0x45   : > { %s2366_s30 = sld [smem:[#allocation3 + $0x17]] }
  0x46   : > { %s2365_s6 = sld [smem:[#allocation3 + $0x16]] }
  0x47   : > { %s2367_s8 = sld [smem:[#allocation3 + $0x18]] }
  0x48   : > { %s2369_s12 = sld [smem:[#allocation3 + $0x1a]] }
  0x49   : > { %s2368_s13 = sld [smem:[#allocation3 + $0x19]] }
  0xae   : > { %v234_v22 = vpop.permute.xlu0 %233 }
  0xaf   : > { %v240_v23 = vsel %vm239_vm0, 0.0, %v234_v22 }
  0xb0   : > { %v243_v24 = vsel %vm242_vm1, %v240_v23, 0.0 }
  0xb1   : > { %v248_v25 = vrot.slane %v243_v24, 5  ;;  %v492_v24 = vstv %s2356_s24  ;;  %s2370_s24 = sld [smem:[#allocation3 + $0x1b]] }
  0xb3   : > { %v2790_v28 = vsel %vm247_vm2, 0.0, %v248_v25 }
  0xb4   : > { %v300_v29 = vmul.f32 %v299_v26, %v2790_v28  ;;  %v286_v30 = vmul.f32 %v285_v27, %v2790_v28  ;;  %v342_v42 = vmul.f32 %v341_v40, %v2790_v28  ;;  %v328_v43 = vmul.f32 %v327_v41, %v2790_v28 }
  0xb5   : > { %v314_v44 = vmul.f32 %v313_v36, %v2790_v28  ;;  %v409_v53 = vmul.f32 %v408_v48, %v2790_v28  ;;  %v388_v54 = vmul.f32 %v387_v49, %v2790_v28  ;;  %v356_v61 = vmul.f32 %v355_v45, %v2790_v28 }
  0xb6   : > { %304 = vrot.lane.b32.xlu0 %v300_v29, %s2647_s18  ;;  %290 = vrot.lane.b32.xlu2 %v286_v30, %s2648_s20  ;;  %v236_v31 = vpop.permute.xlu0 %235  ;;  %v472_v15 = vmul.f32 %v471_v8, %v2790_v28  ;;  %v451_v16 = vmul.f32 %v450_v10, %v2790_v28  ;;  %v430_v18 = vmul.f32 %v429_v60, %v2790_v28 }
  0xb7   : > { %v241_v32 = vsel %vm239_vm0, 0.0, %v236_v31  ;;  %v415_v58 = vrot.slane %v409_v53, 1  ;;  %v394_v59 = vrot.slane %v388_v54, 1 }
  0xb8   : > { %v244_v33 = vsel %vm242_vm1, %v241_v32, 0.0  ;;  %v478_v20 = vrot.slane %v472_v15, 1  ;;  %v457_v21 = vrot.slane %v451_v16, 1  ;;  %v436_v23 = vrot.slane %v430_v18, 1 }
  0xb9   : > { %v249_v34 = vrot.slane %v244_v33, 5  ;;  %v636_v15 = vstv %s2363_s29  ;;  %s2375_s29 = sld [smem:[#allocation3 + $0x20]] }
  0xbb   : > { %v2799_v35 = vsel %vm247_vm2, %v248_v25, %v249_v34  ;;  %v2827_v57 = vsel %vm247_vm2, %v249_v34, 0.0 }
  0xbc   : > { %v287_v37 = vmul.f32 %v285_v27, %v2799_v35  ;;  %v315_v38 = vmul.f32 %v313_v36, %v2799_v35  ;;  %v301_v39 = vmul.f32 %v299_v26, %v2799_v35  ;;  %v357_v46 = vmul.f32 %v355_v45, %v2799_v35 }
  0xbd   : > { %v343_v47 = vmul.f32 %v341_v40, %v2799_v35  ;;  %v329_v50 = vmul.f32 %v327_v41, %v2799_v35  ;;  %v410_v51 = vmul.f32 %v408_v48, %v2799_v35  ;;  %v389_v52 = vmul.f32 %v387_v49, %v2799_v35 }
  0xbe   : > { %320 = vrot.lane.b32.xlu0 %v315_v38, %s2649_s28  ;;  %306 = vrot.lane.b32.xlu1 %v301_v39, %s2647_s18  ;;  %v431_v62 = vmul.f32 %v429_v60, %v2799_v35  ;;  %v432_v1 = vmul.f32 %v429_v60, %v2827_v57  ;;  %v411_v2 = vmul.f32 %v408_v48, %v2827_v57  ;;  %v531_v38 = vstv %s2358_s5  ;;  %s2372_s5 = sld [smem:[#allocation3 + $0x1d]] }
  0xbf   : > { %292 = vrot.lane.b32.xlu2 %v287_v37, %s2648_s20  ;;  %v416_v55 = vrot.slane %v410_v51, 1  ;;  %v395_v56 = vrot.slane %v389_v52, 1  ;;  %v390_v3 = vmul.f32 %v387_v49, %v2827_v57  ;;  %v473_v9 = vmul.f32 %v471_v8, %v2799_v35 }
  0xc0   : > { %v437_v4 = vrot.slane %v431_v62, 1  ;;  %v439_v5 = vrot.slane %v432_v1, 1  ;;  %v418_v6 = vrot.slane %v411_v2, 1  ;;  %v452_v13 = vmul.f32 %v450_v10, %v2799_v35 }
  0xc1   : > { %v417_v63 = vsel %vm376_vm3, %v415_v58, %v416_v55  ;;  %v396_v0 = vsel %vm376_vm3, %v394_v59, %v395_v56  ;;  %v397_v7 = vrot.slane %v390_v3, 1  ;;  %v479_v17 = vrot.slane %v473_v9, 1 }
  0xc2   : > { %v440_v11 = vsel %vm376_vm3, %v437_v4, %v439_v5  ;;  %v419_v12 = vsel %vm376_vm3, %v416_v55, %v418_v6  ;;  %v458_v19 = vrot.slane %v452_v13, 1  ;;  %v494_v26 = vmul.f32 %v492_v24, %v2799_v35 }
  0xc3   : > { %v398_v14 = vsel %vm376_vm3, %v395_v56, %v397_v7  ;;  %v480_v22 = vsel %vm376_vm3, %v478_v20, %v479_v17  ;;  %v495_v27 = vmul.f32 %v492_v24, %v2827_v57  ;;  %v474_v29 = vmul.f32 %v471_v8, %v2827_v57 }
  0xc4   : > { %v459_v25 = vsel %vm376_vm3, %v457_v21, %v458_v19  ;;  %v438_v30 = vsel %vm376_vm3, %v436_v23, %v437_v4  ;;  %v453_v31 = vmul.f32 %v450_v10, %v2827_v57  ;;  %v500_v32 = vrot.slane %v494_v26, 1 }
  0xc5   : > { %v502_v33 = vrot.slane %v495_v27, 1  ;;  %v481_v34 = vrot.slane %v474_v29, 1  ;;  %v552_v37 = vstv %s2359_s27  ;;  %v532_v45 = vmul.f32 %v531_v38, %v2790_v28  ;;  %s2373_s27 = sld [smem:[#allocation3 + $0x1e]] }
  0xc6   : > { %346 = vrot.lane.b32.xlu0 %v342_v42, %s2650_s7  ;;  %332 = vrot.lane.b32.xlu1 %v328_v43, %s2651_s4  ;;  %v460_v36 = vrot.slane %v453_v31, 1  ;;  %v554_v41 = vmul.f32 %v552_v37, %v2799_v35  ;;  %v533_v42 = vmul.f32 %v531_v38, %v2799_v35  ;;  %v573_v51 = vstv %s2360_s10  ;;  %s2374_s10 = sld [smem:[#allocation3 + $0x1f]] }
  0xc7   : > { %318 = vrot.lane.b32.xlu2 %v314_v44, %s2649_s28  ;;  %v503_v39 = vsel %vm376_vm3, %v500_v32, %v502_v33  ;;  %v482_v40 = vsel %vm376_vm3, %v479_v17, %v481_v34  ;;  %v553_v44 = vmul.f32 %v552_v37, %v2790_v28  ;;  %v575_v53 = vmul.f32 %v573_v51, %v2799_v35 }
  0xc8   : > { %v461_v43 = vsel %vm376_vm3, %v458_v19, %v460_v36  ;;  %v539_v48 = vrot.slane %v533_v42, 2  ;;  %v576_v56 = vmul.f32 %v573_v51, %v2827_v57  ;;  %v555_v58 = vmul.f32 %v552_v37, %v2827_v57 }
  0xc9   : > { %v559_v49 = vrot.slane %v553_v44, 2  ;;  %v534_v60 = vmul.f32 %v531_v38, %v2827_v57  ;;  %v615_v1 = vstv %s2362_s21  ;;  %v594_v2 = vstv %s2361_s23  ;;  %s2960_s21 = sld [smem:[#allocation3]] }
  0xca   : > { %v583_v62 = vrot.slane %v576_v56, 2  ;;  %v617_v5 = vmul.f32 %v615_v1, %v2799_v35  ;;  %v596_v6 = vmul.f32 %v594_v2, %v2799_v35  ;;  %v616_v8 = vmul.f32 %v615_v1, %v2790_v28  ;;  %s2376_s23 = sld [smem:[#allocation3 + $0x21]] }
  0xcb   : > { %v595_v9 = vmul.f32 %v594_v2, %v2790_v28  ;;  %v574_v10 = vmul.f32 %v573_v51, %v2790_v28  ;;  %v638_v17 = vmul.f32 %v636_v15, %v2799_v35  ;;  %v639_v20 = vmul.f32 %v636_v15, %v2827_v57 }
  0xcc   : > { %v622_v13 = vrot.slane %v616_v8, 2  ;;  %v618_v21 = vmul.f32 %v615_v1, %v2827_v57  ;;  %v597_v23 = vmul.f32 %v594_v2, %v2827_v57  ;;  %v696_v29 = vstv %s2366_s30  ;;  %v2931_v2 = vpop.permute.xlu1 %258  ;;  %s2350_s30 = sld [smem:[#allocation3 + $0x7]] }
  0xcd   : > { %v580_v16 = vrot.slane %v574_v10, 2  ;;  %v698_v33 = vmul.f32 %v696_v29, %v2799_v35  ;;  %v697_v37 = vmul.f32 %v696_v29, %v2790_v28  ;;  %v699_v51 = vmul.f32 %v696_v29, %v2827_v57 }
  0xce   : > { %362 = vrot.lane.b32.xlu0 %v357_v46, %s2652_s11  ;;  %348 = vrot.lane.b32.xlu1 %v343_v47, %s2650_s7  ;;  %v493_v46 = vmul.f32 %v492_v24, %v2790_v28  ;;  %v560_v47 = vrot.slane %v554_v41, 2  ;;  %v644_v24 = vrot.slane %v638_v17, 2  ;;  %v625_v26 = vrot.slane %v618_v21, 2 }
  0xcf   : > { %334 = vrot.lane.b32.xlu2 %v329_v50, %s2651_s4  ;;  %v538_v50 = vrot.slane %v532_v45, 2  ;;  %v604_v27 = vrot.slane %v597_v23, 2  ;;  %v704_v41 = vrot.slane %v698_v33, 3  ;;  %v717_v45 = vstv %s2367_s8  ;;  %s2380_s8 = sld [smem:[#allocation3 + $0x25]] }
  0xd0   : > { %v499_v52 = vrot.slane %v493_v46, 1  ;;  %v561_v54 = vsel %vm520_vm4, %v559_v49, %v560_v47  ;;  %v840_v29 = vstv %s2373_s27  ;;  %s2383_s27 = sld [smem:[#allocation3 + $0x28]] }
  0xd1   : > { %v540_v55 = vsel %vm520_vm4, %v538_v50, %v539_v48  ;;  %v720_v50 = vmul.f32 %v717_v45, %v2827_v57  ;;  %v842_v33 = vmul.f32 %v840_v29, %v2799_v35 }
  0xd2   : > { %v501_v59 = vsel %vm376_vm3, %v499_v52, %v500_v32 }
  0xd3   : > { %v727_v56 = vrot.slane %v720_v50, 3  ;;  %v843_v50 = vmul.f32 %v840_v29, %v2827_v57 }
  0xd4   : > { %v2952_v21 = vpop.permute.xlu1 %260 }
  0xd6   : > { %420 = vrot.lane.b32.xlu0 %v417_v63, %s2647_s18  ;;  %399 = vrot.lane.b32.xlu1 %v396_v0, %s2648_s20  ;;  %v562_v63 = vrot.slane %v555_v58, 2  ;;  %v541_v0 = vrot.slane %v534_v60, 2  ;;  %v706_v58 = vrot.slane %v699_v51, 3  ;;  %v759_v60 = vstv %s2369_s12  ;;  %s2379_s12 = sld [smem:[#allocation3 + $0x24]] }
  0xd7   : > { %360 = vrot.lane.b32.xlu2 %v356_v61, %s2652_s11  ;;  %v581_v61 = vrot.slane %v575_v53, 2 }
  0xd8   : > { %v563_v4 = vsel %vm520_vm4, %v560_v47, %v562_v63  ;;  %v542_v7 = vsel %vm520_vm4, %v539_v48, %v541_v0  ;;  %v719_v47 = vmul.f32 %v717_v45, %v2799_v35  ;;  %v707_v63 = vsel %vm664_vm5, %v704_v41, %v706_v58 }
  0xd9   : > { %v584_v3 = vsel %vm520_vm4, %v581_v61, %v583_v62  ;;  %v761_v0 = vmul.f32 %v759_v60, %v2799_v35 }
  0xdb   : > { %v767_v8 = vrot.slane %v761_v0, 3 }
  0xde   : > { %443 = vrot.lane.b32.xlu0 %v440_v11, %s2649_s28  ;;  %422 = vrot.lane.b32.xlu1 %v419_v12, %s2647_s18  ;;  %v623_v11 = vrot.slane %v617_v5, 2  ;;  %v602_v12 = vrot.slane %v596_v6, 2  ;;  %v718_v6 = vmul.f32 %v717_v45, %v2790_v28 }
  0xdf   : > { %401 = vrot.lane.b32.xlu2 %v398_v14, %s2648_s20  ;;  %v601_v14 = vrot.slane %v595_v9, 2 }
  0xe0   : > { %v624_v18 = vsel %vm520_vm4, %v622_v13, %v623_v11  ;;  %v626_v32 = vsel %vm520_vm4, %v623_v11, %v625_v26  ;;  %v605_v36 = vsel %vm520_vm4, %v602_v12, %v604_v27  ;;  %v724_v13 = vrot.slane %v718_v6, 3 }
  0xe1   : > { %v603_v19 = vsel %vm520_vm4, %v601_v14, %v602_v12  ;;  %v780_v12 = vstv %s2370_s24  ;;  %s2357_s24 = sld [smem:[#allocation3 + $0xe]] }
  0xe2   : > { %v782_v14 = vmul.f32 %v780_v12, %v2799_v35  ;;  %v783_v17 = vmul.f32 %v780_v12, %v2827_v57 }
  0xe6   : > { %483 = vrot.lane.b32.xlu0 %v480_v22, %s2650_s7  ;;  %462 = vrot.lane.b32.xlu1 %v459_v25, %s2651_s4  ;;  %v582_v22 = vsel %vm520_vm4, %v580_v16, %v581_v61  ;;  %v646_v25 = vrot.slane %v639_v20, 2  ;;  %v738_v61 = vstv %s2368_s13  ;;  %s2381_s13 = sld [smem:[#allocation3 + $0x26]] }
  0xe7   : > { %441 = vrot.lane.b32.xlu2 %v438_v30, %s2649_s28  ;;  %v675_v30 = vstv %s2365_s6  ;;  %v740_v1 = vmul.f32 %v738_v61, %v2799_v35  ;;  %v739_v5 = vmul.f32 %v738_v61, %v2790_v28  ;;  %v741_v20 = vmul.f32 %v738_v61, %v2827_v57  ;;  %s2377_s6 = sld [smem:[#allocation3 + $0x22]] }
  0xe8   : > { %v647_v31 = vsel %vm520_vm4, %v644_v24, %v646_v25  ;;  %v677_v34 = vmul.f32 %v675_v30, %v2799_v35  ;;  %v676_v38 = vmul.f32 %v675_v30, %v2790_v28  ;;  %v678_v53 = vmul.f32 %v675_v30, %v2827_v57 }
  0xe9   : > { %v746_v9 = vrot.slane %v740_v1, 3  ;;  %v745_v11 = vrot.slane %v739_v5, 3  ;;  %v790_v25 = vrot.slane %v783_v17, 3  ;;  %v748_v27 = vrot.slane %v741_v20, 3 }
  0xea   : > { %v683_v42 = vrot.slane %v677_v34, 3  ;;  %v682_v44 = vrot.slane %v676_v38, 3  ;;  %v819_v30 = vstv %s2372_s5  ;;  %s2382_s5 = sld [smem:[#allocation3 + $0x27]] }
  0xeb   : > { %v747_v16 = vsel %vm664_vm5, %v745_v11, %v746_v9  ;;  %v821_v34 = vmul.f32 %v819_v30, %v2799_v35  ;;  %v820_v38 = vmul.f32 %v819_v30, %v2790_v28  ;;  %v882_v11 = vstv %s2375_s29  ;;  %s2388_s29 = sld [smem:[#allocation3 + $0x2d]] }
  0xec   : > { %v684_v49 = vsel %vm664_vm5, %v682_v44, %v683_v42  ;;  %v848_v44 = vrot.slane %v842_v33, 4 }
  0xed   : > { %v827_v45 = vrot.slane %v821_v34, 4 }
  0xee   : > { %506 = vrot.lane.b32.xlu0 %v503_v39, %s2652_s11  ;;  %485 = vrot.lane.b32.xlu1 %v482_v40, %s2650_s7  ;;  %v637_v40 = vmul.f32 %v636_v15, %v2790_v28 }
  0xef   : > { %464 = vrot.lane.b32.xlu2 %v461_v43, %s2651_s4  ;;  %v703_v43 = vrot.slane %v697_v37, 3  ;;  %v841_v37 = vmul.f32 %v840_v29, %v2790_v28 }
  0xf0   : > { %v643_v46 = vrot.slane %v637_v40, 2 }
  0xf1   : > { %v705_v48 = vsel %vm664_vm5, %v703_v43, %v704_v41 }
  0xf2   : > { %v645_v52 = vsel %vm520_vm4, %v643_v46, %v644_v24  ;;  %v788_v24 = vrot.slane %v782_v14, 3  ;;  %v847_v46 = vrot.slane %v841_v37, 4 }
  0xf4   : > { %v849_v51 = vsel %vm808_vm6, %v847_v46, %v848_v44 }
  0xf6   : > { %564 = vrot.lane.b32.xlu0 %v561_v54, %s2647_s18  ;;  %543 = vrot.lane.b32.xlu1 %v540_v55, %s2648_s20  ;;  %v725_v55 = vrot.slane %v719_v47, 3  ;;  %v826_v47 = vrot.slane %v820_v38, 4 }
  0xf7   : > { %504 = vrot.lane.b32.xlu2 %v501_v59, %s2652_s11  ;;  %v685_v59 = vrot.slane %v678_v53, 3 }
  0xf8   : > { %v728_v62 = vsel %vm664_vm5, %v725_v55, %v727_v56  ;;  %v279_v56 = vstv %s2960_s21  ;;  %s2387_s21 = sld [smem:[#allocation3 + $0x2c]] }
  0xf9   : > { %v281_v6 = vmul.f32 %v279_v56, %v2799_v35 }
  0xfe   : > { %587 = vrot.lane.b32.xlu0 %v584_v3, %s2649_s28  ;;  %566 = vrot.lane.b32.xlu1 %v563_v4, %s2647_s18  ;;  %v686_v3 = vsel %vm664_vm5, %v683_v42, %v685_v59  ;;  %v760_v4 = vmul.f32 %v759_v60, %v2790_v28  ;;  %v781_v42 = vmul.f32 %v780_v12, %v2790_v28 }
  0xff   : > { %545 = vrot.lane.b32.xlu2 %v542_v7, %s2648_s20  ;;  %v822_v59 = vmul.f32 %v819_v30, %v2827_v57 }
 0x100   : > { %v766_v10 = vrot.slane %v760_v4, 3 }
 0x101   : > { %v829_v4 = vrot.slane %v822_v59, 4 }
 0x102   : > { %v768_v15 = vsel %vm664_vm5, %v766_v10, %v767_v8 }
 0x106   : > { %627 = vrot.lane.b32.xlu0 %v624_v18, %s2650_s7  ;;  %606 = vrot.lane.b32.xlu1 %v603_v19, %s2651_s4  ;;  %v762_v18 = vmul.f32 %v759_v60, %v2827_v57  ;;  %v726_v19 = vsel %vm664_vm5, %v724_v13, %v725_v55 }
 0x107   : > { %585 = vrot.lane.b32.xlu2 %v582_v22, %s2649_s28 }
 0x108   : > { %v769_v26 = vrot.slane %v762_v18, 3  ;;  %v883_v18 = vmul.f32 %v882_v11, %v2790_v28 }
 0x10e   : > { %650 = vrot.lane.b32.xlu0 %v647_v31, %s2652_s11  ;;  %629 = vrot.lane.b32.xlu1 %v626_v32, %s2650_s7  ;;  %v791_v31 = vsel %vm664_vm5, %v788_v24, %v790_v25  ;;  %v770_v32 = vsel %vm664_vm5, %v767_v8, %v769_v26  ;;  %v903_v8 = vstv %s2376_s23  ;;  %s2386_s23 = sld [smem:[#allocation3 + $0x2b]] }
 0x10f   : > { %608 = vrot.lane.b32.xlu2 %v605_v36, %s2651_s4  ;;  %v749_v36 = vsel %vm664_vm5, %v746_v9, %v748_v27  ;;  %v2989_v10 = vmul.f32 %v903_v8, %v2799_v35 }
 0x110   : > { %v2912_v39 = vpop.permute.xlu2 %290 }
 0x111   : > { %v911_v20 = vrot.slane %v2989_v10, 4 }
 0x116   : > { %708 = vrot.lane.b32.xlu0 %v705_v48, %s2647_s18  ;;  %687 = vrot.lane.b32.xlu1 %v684_v49, %s2648_s20  ;;  %v787_v48 = vrot.slane %v781_v42, 3  ;;  %v861_v49 = vstv %s2374_s10  ;;  %s2384_s10 = sld [smem:[#allocation3 + $0x29]] }
 0x117   : > { %648 = vrot.lane.b32.xlu2 %v645_v52, %s2652_s11  ;;  %v828_v52 = vsel %vm808_vm6, %v826_v47, %v827_v45  ;;  %v863_v53 = vmul.f32 %v861_v49, %v2799_v35  ;;  %v864_v55 = vmul.f32 %v861_v49, %v2827_v57 }
 0x118   : > { %v789_v58 = vsel %vm664_vm5, %v787_v48, %v788_v24 }
 0x119   : > { %v2925_v54 = vpop.permute.xlu2 %292  ;;  %v869_v1 = vrot.slane %v863_v53, 4 }
 0x11a   : > { %v297_v12 = vadd.f32 %v2925_v54, %v281_v6 }
 0x11e   : > { %731 = vrot.lane.b32.xlu0 %v728_v62, %s2649_s28  ;;  %710 = vrot.lane.b32.xlu1 %v707_v63, %s2647_s18  ;;  %v850_v62 = vrot.slane %v843_v50, 4  ;;  %v280_v63 = vmul.f32 %v279_v56, %v2790_v28 }
 0x11f   : > { %689 = vrot.lane.b32.xlu2 %v686_v3, %s2648_s20  ;;  %v871_v3 = vrot.slane %v864_v55, 4 }
 0x120   : > { %v296_v5 = vadd.f32 %v2912_v39, %v280_v63  ;;  %v851_v9 = vsel %vm808_vm6, %v848_v44, %v850_v62  ;;  %v830_v39 = vsel %vm808_vm6, %v827_v45, %v829_v4  ;;  %v885_v44 = vmul.f32 %v882_v11, %v2827_v57 }
 0x121   : > { %v2940_v7 = vpop.permute.xlu2 %318  ;;  %v872_v14 = vsel %vm808_vm6, %v869_v1, %v871_v3 }
 0x122   : > { %v892_v59 = vrot.slane %v885_v44, 4 }
 0x126   : > { %771 = vrot.lane.b32.xlu0 %v768_v15, %s2650_s7  ;;  %750 = vrot.lane.b32.xlu1 %v747_v16, %s2651_s4  ;;  %v2994_v15 = vmul.f32 %v882_v11, %v2799_v35  ;;  %v904_v16 = vmul.f32 %v903_v8, %v2790_v28 }
 0x127   : > { %729 = vrot.lane.b32.xlu2 %v726_v19, %s2649_s28 }
 0x128   : > { %v305_v22 = vpop.permute.xlu0 %304  ;;  %v890_v26 = vrot.slane %v2994_v15, 4  ;;  %v910_v27 = vrot.slane %v904_v16, 4 }
 0x129   : > { %v2954_v23 = vpop.permute.xlu2 %334  ;;  %v310_v13 = vadd.f32 %v305_v22, %v296_v5  ;;  %v862_v22 = vmul.f32 %v861_v49, %v2790_v28 }
 0x12a   : > { %v912_v33 = vsel %vm808_vm6, %v910_v27, %v911_v20 }
 0x12b   : > { %v324_v24 = vadd.f32 %v2940_v7, %v310_v13  ;;  %v868_v34 = vrot.slane %v862_v22, 4  ;;  %v1004_v22 = vstv %s2381_s13  ;;  %s3141_s13 = sld [smem:[#allocation3 + $0x33]] }
 0x12c   : > { %v3043_v27 = vmul.f32 %v1004_v22, %v2799_v35 }
 0x12d   : > { %v870_v42 = vsel %vm808_vm6, %v868_v34, %v869_v1  ;;  %v962_v1 = vstv %s2379_s12  ;;  %s2391_s12 = sld [smem:[#allocation3 + $0x30]] }
 0x12e   : > { %794 = vrot.lane.b32.xlu0 %v791_v31, %s2652_s11  ;;  %773 = vrot.lane.b32.xlu1 %v770_v32, %s2650_s7  ;;  %v889_v31 = vrot.slane %v883_v18, 4  ;;  %v369_v32 = vstv %s2350_s30  ;;  %v964_v6 = vmul.f32 %v962_v1, %v2799_v35  ;;  %v963_v11 = vmul.f32 %v962_v1, %v2790_v28  ;;  %s2364_s30 = sld [smem:[#allocation3 + $0x15]] }
 0x12f   : > { %752 = vrot.lane.b32.xlu2 %v749_v36, %s2651_s4  ;;  %v924_v36 = vstv %s2377_s6  ;;  %v372_v47 = vmul.f32 %v369_v32, %v2827_v57  ;;  %v370_v48 = vmul.f32 %v369_v32, %v2790_v28  ;;  %s2390_s6 = sld [smem:[#allocation3 + $0x2f]] }
 0x130   : > { %v307_v40 = vpop.permute.xlu1 %306  ;;  %v321_v41 = vpop.permute.xlu0 %320  ;;  %v891_v37 = vsel %vm808_vm6, %v889_v31, %v890_v26  ;;  %v3011_v38 = vmul.f32 %v924_v36, %v2799_v35  ;;  %v927_v7 = vmul.f32 %v924_v36, %v2827_v57 }
 0x131   : > { %v2969_v43 = vpop.permute.xlu2 %360  ;;  %v311_v17 = vadd.f32 %v307_v40, %v297_v12  ;;  %v906_v40 = vmul.f32 %v903_v8, %v2827_v57  ;;  %v377_v62 = vrot.slane %v370_v48, 1 }
 0x132   : > { %v932_v53 = vrot.slane %v3011_v38, 4  ;;  %v934_v55 = vrot.slane %v927_v7, 4 }
 0x133   : > { %v325_v29 = vadd.f32 %v321_v41, %v311_v17  ;;  %v371_v41 = vmul.f32 %v369_v32, %v2799_v35  ;;  %v913_v56 = vrot.slane %v906_v40, 4  ;;  %v1012_v40 = vrot.slane %v3043_v27, 5 }
 0x134   : > { %v935_v4 = vsel %vm808_vm6, %v932_v53, %v934_v55 }
 0x135   : > { %v339_v46 = vadd.f32 %v2954_v23, %v325_v29  ;;  %v983_v23 = vstv %s2380_s8  ;;  %v914_v5 = vsel %vm808_vm6, %v911_v20, %v913_v56  ;;  %v969_v20 = vrot.slane %v963_v11, 5  ;;  %s2389_s8 = sld [smem:[#allocation3 + $0x2e]] }
 0x136   : > { %852 = vrot.lane.b32.xlu0 %v849_v51, %s2647_s18  ;;  %831 = vrot.lane.b32.xlu1 %v828_v52, %s2648_s20  ;;  %v985_v63 = vmul.f32 %v983_v23, %v2799_v35  ;;  %v1007_v29 = vmul.f32 %v1004_v22, %v2827_v57 }
 0x137   : > { %792 = vrot.lane.b32.xlu2 %v789_v58, %s2652_s11  ;;  %v378_v58 = vrot.slane %v371_v41, 1 }
 0x138   : > { %v333_v60 = vpop.permute.xlu1 %332  ;;  %v347_v61 = vpop.permute.xlu0 %346  ;;  %v991_v15 = vrot.slane %v985_v63, 5 }
 0x139   : > { %v2983_v0 = vpop.permute.xlu2 %401  ;;  %v338_v30 = vadd.f32 %v333_v60, %v324_v24  ;;  %v379_v8 = vsel %vm376_vm3, %v377_v62, %v378_v58 }
 0x13b   : > { %v352_v45 = vadd.f32 %v347_v61, %v338_v30  ;;  %v380_v61 = vrot.slane %v372_v47, 1 }
 0x13d   : > { %v366_v60 = vadd.f32 %v2969_v43, %v352_v45  ;;  %v893_v43 = vsel %vm808_vm6, %v890_v26, %v892_v59  ;;  %v381_v12 = vsel %vm376_vm3, %v378_v58, %v380_v61  ;;  %v513_v45 = vstv %s2357_s24  ;;  %s3143_s24 = sld [smem:[#allocation3 + $0x32]] }
 0x13e   : > { %875 = vrot.lane.b32.xlu0 %v872_v14, %s2649_s28  ;;  %854 = vrot.lane.b32.xlu1 %v851_v9, %s2647_s18  ;;  %v984_v9 = vmul.f32 %v983_v23, %v2790_v28  ;;  %v515_v47 = vmul.f32 %v513_v45, %v2799_v35 }
 0x13f   : > { %833 = vrot.lane.b32.xlu2 %v830_v39, %s2648_s20  ;;  %v384_v10 = vadd.f32 %v379_v8, %v366_v60  ;;  %v925_v39 = vmul.f32 %v924_v36, %v2790_v28  ;;  %v965_v36 = vmul.f32 %v962_v1, %v2827_v57 }
 0x140   : > { %v349_v54 = vpop.permute.xlu1 %348  ;;  %v363_v19 = vpop.permute.xlu0 %362  ;;  %v522_v60 = vrot.slane %v515_v47, 2 }
 0x141   : > { %v3005_v25 = vpop.permute.xlu2 %441  ;;  %v353_v51 = vadd.f32 %v349_v54, %v339_v46  ;;  %v970_v54 = vrot.slane %v964_v6, 5  ;;  %v931_v26 = vrot.slane %v925_v39, 4  ;;  %v972_v46 = vrot.slane %v965_v36, 5 }
 0x142   : > { %v514_v6 = vmul.f32 %v513_v45, %v2790_v28 }
 0x143   : > { %v367_v3 = vadd.f32 %v363_v19, %v353_v51  ;;  %v990_v19 = vrot.slane %v984_v9, 5  ;;  %v971_v32 = vsel %vm247_vm2, %v969_v20, %v970_v54  ;;  %v933_v34 = vsel %vm808_vm6, %v931_v26, %v932_v53 }
 0x144   : > { %v1046_v51 = vstv %s2383_s27  ;;  %v1025_v53 = vstv %s2382_s5  ;;  %v973_v59 = vsel %vm247_vm2, %v970_v54, %v972_v46  ;;  %s3160_s27 = sld [smem:[#allocation3 + $0x34]] }
 0x145   : > { %v385_v16 = vadd.f32 %v381_v12, %v367_v3  ;;  %v992_v24 = vsel %vm247_vm2, %v990_v19, %v991_v15  ;;  %v3062_v58 = vmul.f32 %v1025_v53, %v2799_v35  ;;  %v1026_v1 = vmul.f32 %v1025_v53, %v2790_v28  ;;  %s2371_s5 = sld [smem:[#allocation3 + $0x1c]] }
 0x146   : > { %915 = vrot.lane.b32.xlu0 %v912_v33, %s2650_s7  ;;  %894 = vrot.lane.b32.xlu1 %v891_v37, %s2651_s4  ;;  %v986_v33 = vmul.f32 %v983_v23, %v2827_v57  ;;  %v1047_v23 = vmul.f32 %v1046_v51, %v2790_v28  ;;  %v1067_v12 = vstv %s2384_s10  ;;  %v1028_v27 = vmul.f32 %v1025_v53, %v2827_v57  ;;  %s3172_s10 = sld [smem:[#allocation3 + $0x36]] }
 0x147   : > { %873 = vrot.lane.b32.xlu2 %v870_v42, %s2649_s28  ;;  %v406_v31 = vadd.f32 %v2983_v0, %v385_v16  ;;  %v1014_v42 = vrot.slane %v1007_v29, 5  ;;  %v521_v16 = vrot.slane %v514_v6, 2  ;;  %v1070_v54 = vmul.f32 %v1067_v12, %v2827_v57 }
 0x148   : > { %v400_v49 = vpop.permute.xlu1 %399  ;;  %v421_v50 = vpop.permute.xlu0 %420  ;;  %v993_v44 = vrot.slane %v986_v33, 5  ;;  %v1053_v11 = vrot.slane %v1047_v23, 5 }
 0x149   : > { %v3024_v52 = vpop.permute.xlu2 %464  ;;  %v405_v17 = vadd.f32 %v400_v49, %v384_v10  ;;  %v1015_v55 = vsel %vm247_vm2, %v1012_v40, %v1014_v42  ;;  %v1033_v10 = vrot.slane %v3062_v58, 5  ;;  %v523_v26 = vsel %vm520_vm4, %v521_v16, %v522_v60 }
 0x14a   : > { %v994_v56 = vsel %vm247_vm2, %v991_v15, %v993_v44  ;;  %v1032_v15 = vrot.slane %v1026_v1, 5  ;;  %v1127_v42 = vstv %s2387_s21  ;;  %v1106_v44 = vstv %s2386_s23  ;;  %s3180_s21 = sld [smem:[#allocation3 + $0x35]] }
 0x14b   : > { %v426_v30 = vadd.f32 %v421_v50, %v405_v17  ;;  %v516_v50 = vmul.f32 %v513_v45, %v2827_v57  ;;  %v3076_v17 = vmul.f32 %v1067_v12, %v2799_v35  ;;  %v1129_v46 = vmul.f32 %v1127_v42, %v2799_v35  ;;  %s3191_s23 = sld [smem:[#allocation3 + $0x37]] }
 0x14c   : > { %v657_v16 = vstv %s2364_s30  ;;  %s2400_s30 = sld [smem:[#allocation3 + $0x39]] }
 0x14d   : > { %v447_v0 = vadd.f32 %v3005_v25, %v426_v30  ;;  %v1048_v25 = vmul.f32 %v1046_v51, %v2799_v35  ;;  %v524_v63 = vrot.slane %v516_v50, 2  ;;  %v1075_v33 = vrot.slane %v3076_v17, 5 }
 0x14e   : > { %938 = vrot.lane.b32.xlu0 %v935_v4, %s2652_s11  ;;  %917 = vrot.lane.b32.xlu1 %v914_v5, %s2650_s7  ;;  %v1005_v5 = vmul.f32 %v1004_v22, %v2790_v28  ;;  %v1034_v22 = vsel %vm247_vm2, %v1032_v15, %v1033_v10  ;;  %v1107_v50 = vmul.f32 %v1106_v44, %v2790_v28  ;;  %v1135_v58 = vrot.slane %v1129_v46, 6 }
 0x14f   : > { %896 = vrot.lane.b32.xlu2 %v893_v43, %s2651_s4  ;;  %v1054_v9 = vrot.slane %v1048_v25, 5 }
 0x150   : > { %v423_v13 = vpop.permute.xlu1 %422  ;;  %v444_v14 = vpop.permute.xlu0 %443  ;;  %v1011_v39 = vrot.slane %v1005_v5, 5 }
 0x151   : > { %v505_v18 = vpop.permute.xlu2 %504  ;;  %v427_v37 = vadd.f32 %v423_v13, %v406_v31  ;;  %v1055_v20 = vsel %vm247_vm2, %v1053_v11, %v1054_v9 }
 0x153   : > { %v448_v48 = vadd.f32 %v444_v14, %v427_v37  ;;  %v525_v14 = vsel %vm520_vm4, %v522_v60, %v524_v63 }
 0x155   : > { %v469_v62 = vadd.f32 %v3024_v52, %v448_v48 }
 0x156   : > { %995 = vrot.lane.b32.xlu0 %v992_v24, %s2647_s18  ;;  %974 = vrot.lane.b32.xlu1 %v971_v32, %s2648_s20  ;;  %v1013_v24 = vsel %vm247_vm2, %v1011_v39, %v1012_v40 }
 0x157   : > { %936 = vrot.lane.b32.xlu2 %v933_v34, %s2652_s11  ;;  %v1077_v34 = vrot.slane %v1070_v54, 5  ;;  %v659_v54 = vmul.f32 %v657_v16, %v2799_v35 }
 0x158   : > { %v463_v38 = vpop.permute.xlu1 %462  ;;  %v484_v7 = vpop.permute.xlu0 %483 }
 0x159   : > { %v546_v41 = vpop.permute.xlu2 %545  ;;  %v468_v49 = vadd.f32 %v463_v38, %v447_v0  ;;  %v1078_v40 = vsel %vm247_vm2, %v1075_v33, %v1077_v34 }
 0x15b   : > { %v489_v61 = vadd.f32 %v484_v7, %v468_v49  ;;  %v1035_v7 = vrot.slane %v1028_v27, 5  ;;  %v1128_v49 = vmul.f32 %v1127_v42, %v2790_v28 }
 0x15d   : > { %v510_v13 = vadd.f32 %v505_v18, %v489_v61  ;;  %v1049_v18 = vmul.f32 %v1046_v51, %v2827_v57  ;;  %v1036_v48 = vsel %vm247_vm2, %v1033_v10, %v1035_v7  ;;  %v1134_v23 = vrot.slane %v1128_v49, 6 }
 0x15e   : > { %1018 = vrot.lane.b32.xlu0 %v1015_v55, %s2649_s28  ;;  %997 = vrot.lane.b32.xlu1 %v994_v56, %s2647_s18  ;;  %v1068_v55 = vmul.f32 %v1067_v12, %v2790_v28  ;;  %v1113_v61 = vrot.slane %v1107_v50, 6 }
 0x15f   : > { %976 = vrot.lane.b32.xlu2 %v973_v59, %s2648_s20  ;;  %v528_v29 = vadd.f32 %v523_v26, %v510_v13  ;;  %v1056_v38 = vrot.slane %v1049_v18, 5  ;;  %v1169_v18 = vstv %s2389_s8  ;;  %s2378_s8 = sld [smem:[#allocation3 + $0x23]] }
 0x160   : > { %v486_v3 = vpop.permute.xlu1 %485  ;;  %v507_v4 = vpop.permute.xlu0 %506  ;;  %v1074_v63 = vrot.slane %v1068_v55, 5  ;;  %v1170_v34 = vmul.f32 %v1169_v18, %v2790_v28 }
 0x161   : > { %v490_v8 = vadd.f32 %v486_v3, %v469_v62  ;;  %v586_v43 = vpop.permute.xlu2 %585  ;;  %v1057_v45 = vsel %vm247_vm2, %v1054_v9, %v1056_v38  ;;  %v1148_v62 = vstv %s2388_s29  ;;  %v1130_v3 = vmul.f32 %v1127_v42, %v2827_v57  ;;  %s2401_s29 = sld [smem:[#allocation3 + $0x3a]] }
 0x162   : > { %v3101_v1 = vmul.f32 %v1148_v62, %v2799_v35  ;;  %v1151_v6 = vmul.f32 %v1148_v62, %v2827_v57  ;;  %v1109_v9 = vmul.f32 %v1106_v44, %v2827_v57  ;;  %v1149_v7 = vmul.f32 %v1148_v62, %v2790_v28 }
 0x163   : > { %v511_v52 = vadd.f32 %v507_v4, %v490_v8  ;;  %v1136_v4 = vsel %vm1095_vm7, %v1134_v23, %v1135_v58  ;;  %v1137_v15 = vrot.slane %v1130_v3, 6  ;;  %v1172_v23 = vmul.f32 %v1169_v18, %v2827_v57 }
 0x164   : > { %v1116_v39 = vrot.slane %v1109_v9, 6  ;;  %v1155_v50 = vrot.slane %v1149_v7, 6  ;;  %v1266_v7 = vstv %s3160_s27  ;;  %s2408_s27 = sld [smem:[#allocation3 + $0x41]] }
 0x165   : > { %v529_v19 = vadd.f32 %v525_v14, %v511_v52  ;;  %v1156_v14 = vrot.slane %v3101_v1, 6  ;;  %v1158_v52 = vrot.slane %v1151_v6, 6  ;;  %v1138_v27 = vsel %vm1095_vm7, %v1135_v58, %v1137_v15 }
 0x166   : > { %1058 = vrot.lane.b32.xlu0 %v1055_v20, %s2650_s7  ;;  %1037 = vrot.lane.b32.xlu1 %v1034_v22, %s2651_s4  ;;  %v1190_v20 = vstv %s2390_s6  ;;  %v265_v15 = vsel %vm239_vm0, 0.0, %v2952_v21  ;;  %s2402_s6 = sld [smem:[#allocation3 + $0x3b]] }
 0x167   : > { %1016 = vrot.lane.b32.xlu2 %v1013_v24, %s2649_s28  ;;  %v550_v30 = vadd.f32 %v546_v41, %v529_v19  ;;  %v1108_v41 = vmul.f32 %v1106_v44, %v2799_v35  ;;  %v660_v19 = vmul.f32 %v657_v16, %v2827_v57  ;;  %v1192_v22 = vmul.f32 %v1190_v20, %v2799_v35 }
 0x168   : > { %v544_v31 = vpop.permute.xlu1 %543  ;;  %v565_v32 = vpop.permute.xlu0 %564  ;;  %v1159_v26 = vsel %vm1095_vm7, %v1156_v14, %v1158_v52  ;;  %v1193_v58 = vmul.f32 %v1190_v20, %v2827_v57 }
 0x169   : > { %v549_v36 = vadd.f32 %v544_v31, %v528_v29  ;;  %v609_v37 = vpop.permute.xlu2 %608  ;;  %v1114_v59 = vrot.slane %v1108_v41, 6  ;;  %v1171_v29 = vmul.f32 %v1169_v18, %v2799_v35  ;;  %v1191_v31 = vmul.f32 %v1190_v20, %v2790_v28 }
 0x16a   : > { %v1198_v38 = vrot.slane %v1192_v22, 6  ;;  %v1252_v22 = vstv %s3141_s13  ;;  %v1238_v18 = vstv %s3143_s24  ;;  %s2403_s13 = sld [smem:[#allocation3 + $0x3c]] }
 0x16b   : > { %v570_v0 = vadd.f32 %v565_v32, %v549_v36  ;;  %v1115_v5 = vsel %vm1095_vm7, %v1113_v61, %v1114_v59  ;;  %v666_v32 = vrot.slane %v659_v54, 3  ;;  %v1177_v44 = vrot.slane %v1171_v29, 6  ;;  %s2405_s24 = sld [smem:[#allocation3 + $0x3e]] }
 0x16c   : > { %v264_v61 = vsel %vm239_vm0, 0.0, %v2931_v2 }
 0x16d   : > { %v591_v47 = vadd.f32 %v586_v43, %v570_v0  ;;  %v1076_v43 = vsel %vm247_vm2, %v1074_v63, %v1075_v33  ;;  %v668_v33 = vrot.slane %v660_v19, 3  ;;  %v658_v0 = vmul.f32 %v657_v16, %v2790_v28 }
 0x16e   : > { %1081 = vrot.lane.b32.xlu0 %v1078_v40, %s2652_s11  ;;  %1060 = vrot.lane.b32.xlu1 %v1057_v45, %s2650_s7  ;;  %v1197_v45 = vrot.slane %v1191_v31, 6  ;;  %v266_v9 = vsel %vm242_vm1, %v264_v61, 0.0 }
 0x16f   : > { %1039 = vrot.lane.b32.xlu2 %v1036_v48, %s2651_s4  ;;  %v669_v46 = vsel %vm664_vm5, %v666_v32, %v668_v33  ;;  %v1211_v48 = vstv %s2391_s12  ;;  %v270_v2 = vrot.slane %v266_v9, 5  ;;  %s2404_s12 = sld [smem:[#allocation3 + $0x3d]] }
 0x170   : > { %v567_v51 = vpop.permute.xlu1 %566  ;;  %v588_v53 = vpop.permute.xlu0 %587  ;;  %v1199_v49 = vsel %vm1095_vm7, %v1197_v45, %v1198_v38 }
 0x171   : > { %v571_v56 = vadd.f32 %v567_v51, %v550_v30  ;;  %v649_v25 = vpop.permute.xlu2 %648  ;;  %v1117_v30 = vsel %vm1095_vm7, %v1114_v59, %v1116_v39  ;;  %v665_v51 = vrot.slane %v658_v0, 3  ;;  %v1157_v59 = vsel %vm1095_vm7, %v1155_v50, %v1156_v14 }
 0x172   : > { %v3156_v54 = vsel %vm247_vm2, 0.0, %v270_v2 }
 0x173   : > { %v592_v60 = vadd.f32 %v588_v53, %v571_v56  ;;  %v1213_v53 = vmul.f32 %v1211_v48, %v2799_v35  ;;  %v1253_v21 = vmul.f32 %v1252_v22, %v3156_v54 }
 0x175   : > { %v613_v8 = vadd.f32 %v609_v37, %v592_v60  ;;  %v667_v60 = vsel %vm664_vm5, %v665_v51, %v666_v32  ;;  %v1219_v6 = vrot.slane %v1213_v53, 6 }
 0x176   : > { %1139 = vrot.lane.b32.xlu0 %v1136_v4, %s2647_s18  ;;  %1118 = vrot.lane.b32.xlu1 %v1115_v5, %s2648_s20 }
 0x177   : > { %1079 = vrot.lane.b32.xlu2 %v1076_v43, %s2652_s11  ;;  %v1200_v43 = vrot.slane %v1193_v58, 6  ;;  %v1280_v58 = vstv %s3180_s21  ;;  %s2385_s21 = sld [smem:[#allocation3 + $0x2a]] }
 0x178   : > { %v607_v10 = vpop.permute.xlu1 %606  ;;  %v628_v11 = vpop.permute.xlu0 %627  ;;  %v1281_v61 = vmul.f32 %v1280_v58, %v3156_v54 }
 0x179   : > { %v612_v12 = vadd.f32 %v607_v10, %v591_v47  ;;  %v690_v13 = vpop.permute.xlu2 %689  ;;  %v1176_v47 = vrot.slane %v1170_v34, 6  ;;  %v1179_v10 = vrot.slane %v1172_v23, 6 }
 0x17b   : > { %v633_v17 = vadd.f32 %v628_v11, %v612_v12  ;;  %v1178_v56 = vsel %vm1095_vm7, %v1176_v47, %v1177_v44  ;;  %v1180_v52 = vsel %vm1095_vm7, %v1177_v44, %v1179_v10  ;;  %v1308_v10 = vstv %s3191_s23  ;;  %s2411_s23 = sld [smem:[#allocation3 + $0x44]] }
 0x17d   : > { %v654_v24 = vadd.f32 %v649_v25, %v633_v17  ;;  %v1214_v25 = vmul.f32 %v1211_v48, %v2827_v57  ;;  %v1212_v17 = vmul.f32 %v1211_v48, %v2790_v28 }
 0x17e   : > { %1162 = vrot.lane.b32.xlu0 %v1159_v26, %s2649_s28  ;;  %1141 = vrot.lane.b32.xlu1 %v1138_v27, %s2647_s18  ;;  %v1239_v27 = vmul.f32 %v1238_v18, %v3156_v54 }
 0x17f   : > { %1120 = vrot.lane.b32.xlu2 %v1117_v30, %s2648_s20  ;;  %v672_v62 = vadd.f32 %v667_v60, %v654_v24  ;;  %v3163_v24 = vsel %vm242_vm1, %v265_v15, 0.0  ;;  %v1218_v29 = vrot.slane %v1212_v17, 6 }
 0x180   : > { %v630_v36 = vpop.permute.xlu1 %629  ;;  %v651_v37 = vpop.permute.xlu0 %650  ;;  %v271_v30 = vrot.slane %v3163_v24, 5 }
 0x181   : > { %v634_v40 = vadd.f32 %v630_v36, %v613_v8  ;;  %v730_v42 = vpop.permute.xlu2 %729  ;;  %v1221_v8 = vrot.slane %v1214_v25, 6  ;;  %v1220_v32 = vsel %vm1095_vm7, %v1218_v29, %v1219_v6  ;;  %v1294_v25 = vstv %s3172_s10  ;;  %s2409_s10 = sld [smem:[#allocation3 + $0x42]] }
 0x182   : > { %v3177_v36 = vsel %vm247_vm2, %v270_v2, %v271_v30  ;;  %v1295_v23 = vmul.f32 %v1294_v25, %v3156_v54  ;;  %v1339_v2 = vstv %s2400_s30  ;;  %s2412_s30 = sld [smem:[#allocation3 + $0x45]] }
 0x183   : > { %v655_v41 = vadd.f32 %v651_v37, %v634_v40  ;;  %v1222_v12 = vsel %vm1095_vm7, %v1219_v6, %v1221_v8  ;;  %v801_v40 = vstv %s2371_s5  ;;  %v1254_v44 = vmul.f32 %v1252_v22, %v3177_v36  ;;  %s2407_s5 = sld [smem:[#allocation3 + $0x40]] }
 0x184   : > { %v803_v45 = vmul.f32 %v801_v40, %v2799_v35  ;;  %v1240_v47 = vmul.f32 %v1238_v18, %v3177_v36  ;;  %v802_v53 = vmul.f32 %v801_v40, %v2790_v28  ;;  %v1341_v17 = vmul.f32 %v1339_v2, %v3177_v36 }
 0x185   : > { %v673_v55 = vadd.f32 %v669_v46, %v655_v41  ;;  %v804_v46 = vmul.f32 %v801_v40, %v2827_v57 }
 0x186   : > { %1202 = vrot.lane.b32.xlu0 %v1199_v49, %s2650_s7  ;;  %1181 = vrot.lane.b32.xlu1 %v1178_v56, %s2651_s4  ;;  %v810_v49 = vrot.slane %v803_v45, 4 }
 0x187   : > { %1160 = vrot.lane.b32.xlu2 %v1157_v59, %s2649_s28  ;;  %v694_v63 = vadd.f32 %v690_v13, %v673_v55  ;;  %v1201_v13 = vsel %vm1095_vm7, %v1198_v38, %v1200_v43  ;;  %v812_v50 = vrot.slane %v804_v46, 4 }
 0x188   : > { %v688_v1 = vpop.permute.xlu1 %687  ;;  %v709_v3 = vpop.permute.xlu0 %708 }
 0x189   : > { %v693_v4 = vadd.f32 %v688_v1, %v672_v62  ;;  %v753_v5 = vpop.permute.xlu2 %752  ;;  %v813_v60 = vsel %vm808_vm6, %v810_v49, %v812_v50  ;;  %v809_v62 = vrot.slane %v802_v53, 4  ;;  %v1267_v1 = vmul.f32 %v1266_v7, %v3156_v54 }
 0x18a   : > { %v1423_v50 = vstv %s2404_s12  ;;  %v945_v53 = vstv %s2378_s8  ;;  %s2414_s8 = sld [smem:[#allocation3 + $0x47]] }
 0x18b   : > { %v714_v11 = vadd.f32 %v709_v3, %v693_v4  ;;  %v811_v3 = vsel %vm808_vm6, %v809_v62, %v810_v49  ;;  %s2416_s12 = sld [smem:[#allocation3 + $0x49]] }
 0x18d   : > { %v735_v14 = vadd.f32 %v730_v42, %v714_v11  ;;  %v1268_v42 = vmul.f32 %v1266_v7, %v3177_v36  ;;  %v1360_v11 = vstv %s2401_s29  ;;  %s2410_s29 = sld [smem:[#allocation3 + $0x43]] }
 0x18e   : > { %1225 = vrot.lane.b32.xlu0 %v1222_v12, %s2652_s11  ;;  %1204 = vrot.lane.b32.xlu1 %v1201_v13, %s2650_s7  ;;  %v1310_v13 = vmul.f32 %v1308_v10, %v3177_v36  ;;  %v1361_v15 = vmul.f32 %v1360_v11, %v3156_v54 }
 0x18f   : > { %1183 = vrot.lane.b32.xlu2 %v1180_v52, %s2651_s4  ;;  %v1282_v52 = vmul.f32 %v1280_v58, %v3177_v36 }
 0x190   : > { %v711_v39 = vpop.permute.xlu1 %710  ;;  %v732_v16 = vpop.permute.xlu0 %731 }
 0x191   : > { %v715_v19 = vadd.f32 %v711_v39, %v694_v63  ;;  %v793_v20 = vpop.permute.xlu2 %792  ;;  %v1362_v39 = vmul.f32 %v1360_v11, %v3177_v36 }
 0x193   : > { %v736_v26 = vadd.f32 %v732_v16, %v715_v19  ;;  %v1340_v16 = vmul.f32 %v1339_v2, %v3156_v54 }
 0x195   : > { %v757_v31 = vadd.f32 %v753_v5, %v736_v26  ;;  %v1367_v26 = vrot.slane %v1361_v15, 1 }
 0x196   : > { %1257 = vrot.lane.b32.xlu0 %v1253_v21, %s2647_s18  ;;  %1243 = vrot.lane.b32.xlu1 %v1239_v27, %s2648_s20  ;;  %v1381_v21 = vstv %s2402_s6  ;;  %s2415_s6 = sld [smem:[#allocation3 + $0x48]] }
 0x197   : > { %1223 = vrot.lane.b32.xlu2 %v1220_v32, %s2652_s11  ;;  %v1346_v32 = vrot.slane %v1340_v16, 1  ;;  %v3221_v24 = vmul.f32 %v1381_v21, %v3177_v36 }
 0x198   : > { %v751_v33 = vpop.permute.xlu1 %750  ;;  %v772_v34 = vpop.permute.xlu0 %771 }
 0x199   : > { %v756_v37 = vadd.f32 %v751_v33, %v735_v14  ;;  %v834_v38 = vpop.permute.xlu2 %833  ;;  %v1296_v14 = vmul.f32 %v1294_v25, %v3177_v36  ;;  %v1347_v33 = vrot.slane %v1341_v17, 1  ;;  %v1389_v46 = vrot.slane %v3221_v24, 1 }
 0x19a   : > { %v947_v25 = vmul.f32 %v945_v53, %v2799_v35 }
 0x19b   : > { %v777_v0 = vadd.f32 %v772_v34, %v756_v37  ;;  %v1309_v37 = vmul.f32 %v1308_v10, %v3156_v54  ;;  %v1348_v7 = vsel %vm376_vm3, %v1346_v32, %v1347_v33 }
 0x19d   : > { %v798_v41 = vadd.f32 %v793_v20, %v777_v0  ;;  %v3217_v20 = vsel %vm247_vm2, %v271_v30, 0.0 }
 0x19e   : > { %1273 = vrot.lane.b32.xlu0 %v1268_v42, %s2649_s28  ;;  %1259 = vrot.lane.b32.xlu1 %v1254_v44, %s2647_s18  ;;  %v1384_v30 = vmul.f32 %v1381_v21, %v3217_v20  ;;  %v1363_v0 = vmul.f32 %v1360_v11, %v3217_v20  ;;  %v1342_v42 = vmul.f32 %v1339_v2, %v3217_v20 }
 0x19f   : > { %1245 = vrot.lane.b32.xlu2 %v1240_v47, %s2648_s20  ;;  %v816_v4 = vadd.f32 %v811_v3, %v798_v41 }
 0x1a0   : > { %v774_v48 = vpop.permute.xlu1 %773  ;;  %v795_v51 = vpop.permute.xlu0 %794  ;;  %v1391_v41 = vrot.slane %v1384_v30, 1  ;;  %v1370_v49 = vrot.slane %v1363_v0, 1 }
 0x1a1   : > { %v778_v55 = vadd.f32 %v774_v48, %v757_v31  ;;  %v874_v56 = vpop.permute.xlu2 %873  ;;  %v1368_v31 = vrot.slane %v1362_v39, 1 }
 0x1a2   : > { %v1392_v58 = vsel %vm376_vm3, %v1389_v46, %v1391_v41 }
 0x1a3   : > { %v799_v59 = vadd.f32 %v795_v51, %v778_v55  ;;  %v1349_v51 = vrot.slane %v1342_v42, 1  ;;  %v1402_v55 = vstv %s2403_s13  ;;  %v1371_v62 = vsel %vm376_vm3, %v1368_v31, %v1370_v49  ;;  %s2418_s13 = sld [smem:[#allocation3 + $0x4b]] }
 0x1a4   : > { %v1405_v32 = vmul.f32 %v1402_v55, %v3217_v20  ;;  %v1503_v42 = vstv %s2408_s27  ;;  %s2419_s27 = sld [smem:[#allocation3 + $0x4c]] }
 0x1a5   : > { %v817_v63 = vadd.f32 %v813_v60, %v799_v59  ;;  %v948_v59 = vmul.f32 %v945_v53, %v2827_v57  ;;  %v1424_v60 = vmul.f32 %v1423_v50, %v3156_v54  ;;  %v1350_v3 = vsel %vm376_vm3, %v1347_v33, %v1349_v51 }
 0x1a6   : > { %1299 = vrot.lane.b32.xlu0 %v1295_v23, %s2650_s7  ;;  %1285 = vrot.lane.b32.xlu1 %v1281_v61, %s2651_s4  ;;  %v1425_v23 = vmul.f32 %v1423_v50, %v3177_v36  ;;  %v1505_v49 = vmul.f32 %v1503_v42, %v3177_v36 }
 0x1a7   : > { %1271 = vrot.lane.b32.xlu2 %v1267_v1, %s2649_s28  ;;  %v838_v5 = vadd.f32 %v834_v38, %v817_v63  ;;  %v1369_v38 = vsel %vm376_vm3, %v1367_v26, %v1368_v31  ;;  %v1403_v63 = vmul.f32 %v1402_v55, %v3156_v54  ;;  %v1404_v1 = vmul.f32 %v1402_v55, %v3177_v36 }
 0x1a8   : > { %v832_v6 = vpop.permute.xlu1 %831  ;;  %v853_v8 = vpop.permute.xlu0 %852  ;;  %v1430_v10 = vrot.slane %v1424_v60, 1  ;;  %v1431_v11 = vrot.slane %v1425_v23, 1  ;;  %v1511_v60 = vrot.slane %v1505_v49, 2 }
 0x1a9   : > { %v837_v43 = vadd.f32 %v832_v6, %v816_v4  ;;  %v897_v9 = vpop.permute.xlu2 %896  ;;  %v1382_v4 = vmul.f32 %v1381_v21, %v3156_v54 }
 0x1aa   : > { %v1432_v26 = vsel %vm376_vm3, %v1430_v10, %v1431_v11 }
 0x1ab   : > { %v858_v12 = vadd.f32 %v853_v8, %v837_v43  ;;  %v953_v8 = vrot.slane %v947_v25, 5  ;;  %v955_v43 = vrot.slane %v948_v59, 5  ;;  %v1388_v15 = vrot.slane %v1382_v4, 1 }
 0x1ad   : > { %v879_v19 = vadd.f32 %v874_v56, %v858_v12  ;;  %v956_v16 = vsel %vm247_vm2, %v953_v8, %v955_v43 }
 0x1ae   : > { %1315 = vrot.lane.b32.xlu0 %v1310_v13, %s2652_s11  ;;  %1301 = vrot.lane.b32.xlu1 %v1296_v14, %s2650_s7  ;;  %v1409_v13 = vrot.slane %v1403_v63, 1  ;;  %v1410_v14 = vrot.slane %v1404_v1, 1 }
 0x1af   : > { %1287 = vrot.lane.b32.xlu2 %v1282_v52, %s2651_s4  ;;  %v1444_v52 = vstv %s2405_s24  ;;  %s2417_s24 = sld [smem:[#allocation3 + $0x4a]] }
 0x1b0   : > { %v855_v22 = vpop.permute.xlu1 %854  ;;  %v876_v18 = vpop.permute.xlu0 %875  ;;  %v1411_v21 = vsel %vm376_vm3, %v1409_v13, %v1410_v14 }
 0x1b1   : > { %v859_v27 = vadd.f32 %v855_v22, %v838_v5  ;;  %v937_v29 = vpop.permute.xlu2 %936  ;;  %v946_v5 = vmul.f32 %v945_v53, %v2790_v28  ;;  %v1447_v22 = vmul.f32 %v1444_v52, %v3217_v20 }
 0x1b3   : > { %v880_v34 = vadd.f32 %v876_v18, %v859_v27  ;;  %v952_v17 = vrot.slane %v946_v5, 5  ;;  %v1426_v27 = vmul.f32 %v1423_v50, %v3217_v20 }
 0x1b5   : > { %v901_v40 = vadd.f32 %v897_v9, %v880_v34  ;;  %v954_v31 = vsel %vm247_vm2, %v952_v17, %v953_v8  ;;  %v1566_v17 = vstv %s2411_s23  ;;  %s2423_s23 = sld [smem:[#allocation3 + $0x50]] }
 0x1b6   : > { %1372 = vrot.lane.b32.xlu0 %v1369_v38, %s2647_s18  ;;  %1351 = vrot.lane.b32.xlu1 %v1348_v7, %s2648_s20  ;;  %v1454_v38 = vrot.slane %v1447_v22, 1  ;;  %v1088_v22 = vstv %s2385_s21  ;;  %s2421_s21 = sld [smem:[#allocation3 + $0x4e]] }
 0x1b7   : > { %1313 = vrot.lane.b32.xlu2 %v1309_v37, %s2652_s11 }
 0x1b8   : > { %v895_v44 = vpop.permute.xlu1 %894  ;;  %v916_v45 = vpop.permute.xlu0 %915 }
 0x1b9   : > { %v900_v47 = vadd.f32 %v895_v44, %v879_v19  ;;  %v977_v48 = vpop.permute.xlu2 %976  ;;  %v1446_v19 = vmul.f32 %v1444_v52, %v3177_v36  ;;  %v1412_v44 = vrot.slane %v1405_v32, 1  ;;  %v1568_v32 = vmul.f32 %v1566_v17, %v3177_v36 }
 0x1bb   : > { %v921_v56 = vadd.f32 %v916_v45, %v900_v47  ;;  %v1452_v30 = vrot.slane %v1446_v19, 1  ;;  %v1482_v45 = vstv %s2407_s5  ;;  %v1504_v47 = vmul.f32 %v1503_v42, %v3156_v54  ;;  %s3331_s5 = sld [smem:[#allocation3 + $0x31]] }
 0x1bc   : > { %v1483_v50 = vmul.f32 %v1482_v45, %v3156_v54  ;;  %v1484_v51 = vmul.f32 %v1482_v45, %v3177_v36  ;;  %v1413_v55 = vsel %vm376_vm3, %v1410_v14, %v1412_v44  ;;  %v1574_v44 = vrot.slane %v1568_v32, 2 }
 0x1bd   : > { %v942_v61 = vadd.f32 %v937_v29, %v921_v56  ;;  %v1390_v29 = vsel %vm376_vm3, %v1388_v15, %v1389_v46  ;;  %v1455_v41 = vsel %vm376_vm3, %v1452_v30, %v1454_v38  ;;  %v1445_v56 = vmul.f32 %v1444_v52, %v3156_v54 }
 0x1be   : > { %1395 = vrot.lane.b32.xlu0 %v1392_v58, %s2649_s28  ;;  %1374 = vrot.lane.b32.xlu1 %v1371_v62, %s2647_s18  ;;  %v1510_v59 = vrot.slane %v1504_v47, 2  ;;  %v1489_v62 = vrot.slane %v1483_v50, 2  ;;  %v1490_v63 = vrot.slane %v1484_v51, 2 }
 0x1bf   : > { %1353 = vrot.lane.b32.xlu2 %v1350_v3, %s2648_s20  ;;  %v959_v33 = vadd.f32 %v954_v31, %v942_v61  ;;  %v1451_v1 = vrot.slane %v1445_v56, 1  ;;  %v1524_v3 = vstv %s2409_s10  ;;  %v1567_v31 = vmul.f32 %v1566_v17, %v3156_v54  ;;  %s2422_s10 = sld [smem:[#allocation3 + $0x4f]] }
 0x1c0   : > { %v918_v6 = vpop.permute.xlu1 %917  ;;  %v939_v9 = vpop.permute.xlu0 %938  ;;  %v1512_v5 = vsel %vm520_vm4, %v1510_v59, %v1511_v60  ;;  %v1491_v8 = vsel %vm520_vm4, %v1489_v62, %v1490_v63  ;;  %v3273_v43 = vmul.f32 %v1524_v3, %v3177_v36 }
 0x1c1   : > { %v922_v2 = vadd.f32 %v918_v6, %v901_v40  ;;  %v1017_v12 = vpop.permute.xlu2 %1016  ;;  %v1433_v40 = vrot.slane %v1426_v27, 1  ;;  %v1506_v6 = vmul.f32 %v1503_v42, %v3217_v20  ;;  %v1573_v42 = vrot.slane %v1567_v31, 2 }
 0x1c3   : > { %v943_v39 = vadd.f32 %v939_v9, %v922_v2  ;;  %v1527_v9 = vmul.f32 %v1524_v3, %v3217_v20  ;;  %v1485_v2 = vmul.f32 %v1482_v45, %v3217_v20  ;;  %v1513_v14 = vrot.slane %v1506_v6, 2 }
 0x1c5   : > { %v960_v18 = vadd.f32 %v956_v16, %v943_v39  ;;  %v1532_v39 = vrot.slane %v3273_v43, 2  ;;  %v1534_v16 = vrot.slane %v1527_v9, 2  ;;  %v1492_v19 = vrot.slane %v1485_v2, 2 }
 0x1c6   : > { %1435 = vrot.lane.b32.xlu0 %v1432_v26, %s2650_s7  ;;  %1414 = vrot.lane.b32.xlu1 %v1411_v21, %s2651_s4  ;;  %v1090_v21 = vmul.f32 %v1088_v22, %v2799_v35  ;;  %v1514_v27 = vsel %vm520_vm4, %v1511_v60, %v1513_v14  ;;  %v1646_v9 = vstv %s2415_s6  ;;  %s2424_s6 = sld [smem:[#allocation3 + $0x51]] }
 0x1c7   : > { %1393 = vrot.lane.b32.xlu2 %v1390_v29, %s2649_s28  ;;  %v981_v34 = vadd.f32 %v977_v48, %v960_v18  ;;  %v1434_v48 = vsel %vm376_vm3, %v1431_v11, %v1433_v40  ;;  %v1453_v11 = vsel %vm376_vm3, %v1451_v1, %v1452_v30  ;;  %v1545_v18 = vstv %s2410_s29  ;;  %s2399_s29 = sld [smem:[#allocation3 + $0x38]] }
 0x1c8   : > { %v975_v37 = vpop.permute.xlu1 %974  ;;  %v996_v24 = vpop.permute.xlu0 %995  ;;  %v1091_v29 = vmul.f32 %v1088_v22, %v2827_v57  ;;  %v1493_v35 = vsel %vm520_vm4, %v1490_v63, %v1492_v19  ;;  %v1525_v30 = vmul.f32 %v1524_v3, %v3156_v54  ;;  %v1089_v57 = vmul.f32 %v1088_v22, %v2790_v28 }
 0x1c9   : > { %v980_v7 = vadd.f32 %v975_v37, %v959_v33  ;;  %v1040_v0 = vpop.permute.xlu2 %1039  ;;  %v1546_v37 = vmul.f32 %v1545_v18, %v3156_v54  ;;  %v1648_v14 = vmul.f32 %v1646_v9, %v3177_v36 }
 0x1ca   : > { %v1531_v49 = vrot.slane %v1525_v30, 2  ;;  %v1096_v28 = vrot.slane %v1089_v57, 6 }
 0x1cb   : > { %v1001_v46 = vadd.f32 %v996_v24, %v980_v7  ;;  %v1547_v24 = vmul.f32 %v1545_v18, %v3177_v36  ;;  %v1097_v7 = vrot.slane %v1090_v21, 6  ;;  %v1654_v21 = vrot.slane %v1648_v14, 3 }
 0x1cc   : > { %v1533_v60 = vsel %vm520_vm4, %v1531_v49, %v1532_v39 }
 0x1cd   : > { %v1022_v53 = vadd.f32 %v1017_v12, %v1001_v46  ;;  %v1553_v47 = vrot.slane %v1547_v24, 2 }
 0x1ce   : > { %1458 = vrot.lane.b32.xlu0 %v1455_v41, %s2652_s11  ;;  %1437 = vrot.lane.b32.xlu1 %v1434_v48, %s2650_s7  ;;  %v1552_v41 = vrot.slane %v1546_v37, 2  ;;  %v1587_v48 = vstv %s2412_s30  ;;  %s2425_s30 = sld [smem:[#allocation3 + $0x52]] }
 0x1cf   : > { %1416 = vrot.lane.b32.xlu2 %v1413_v55, %s2651_s4  ;;  %v1569_v55 = vmul.f32 %v1566_v17, %v3217_v20  ;;  %v1590_v59 = vmul.f32 %v1587_v48, %v3217_v20  ;;  %v1588_v19 = vmul.f32 %v1587_v48, %v3156_v54 }
 0x1d0   : > { %v998_v25 = vpop.permute.xlu1 %997  ;;  %v1019_v58 = vpop.permute.xlu0 %1018 }
 0x1d1   : > { %v1002_v23 = vadd.f32 %v998_v25, %v981_v34  ;;  %v1080_v61 = vpop.permute.xlu2 %1079  ;;  %v1535_v34 = vsel %vm520_vm4, %v1532_v39, %v1534_v16  ;;  %v1554_v25 = vsel %vm520_vm4, %v1552_v41, %v1553_v47  ;;  %v1597_v43 = vrot.slane %v1590_v59, 2 }
 0x1d3   : > { %v1023_v4 = vadd.f32 %v1019_v58, %v1002_v23  ;;  %v1589_v58 = vmul.f32 %v1587_v48, %v3177_v36  ;;  %v1098_v23 = vsel %vm1095_vm7, %v1096_v28, %v1097_v7  ;;  %v1709_v48 = vstv %s2418_s13  ;;  %s2428_s13 = sld [smem:[#allocation3 + $0x55]] }
 0x1d5   : > { %v1044_v10 = vadd.f32 %v1040_v0, %v1023_v4  ;;  %v1099_v0 = vrot.slane %v1091_v29, 6  ;;  %v1576_v4 = vrot.slane %v1569_v55, 2  ;;  %v1710_v55 = vmul.f32 %v1709_v48, %v3156_v54 }
 0x1d6   : > { %1515 = vrot.lane.b32.xlu0 %v1512_v5, %s2647_s18  ;;  %1494 = vrot.lane.b32.xlu1 %v1491_v8, %s2648_s20  ;;  %v1595_v8 = vrot.slane %v1589_v58, 2 }
 0x1d7   : > { %1456 = vrot.lane.b32.xlu2 %v1453_v11, %s2652_s11  ;;  %v1100_v51 = vsel %vm1095_vm7, %v1097_v7, %v1099_v0  ;;  %v1625_v11 = vstv %s2414_s8  ;;  %s2426_s8 = sld [smem:[#allocation3 + $0x53]] }
 0x1d8   : > { %v1038_v12 = vpop.permute.xlu1 %1037  ;;  %v1059_v13 = vpop.permute.xlu0 %1058  ;;  %v1627_v39 = vmul.f32 %v1625_v11, %v3177_v36 }
 0x1d9   : > { %v1043_v52 = vadd.f32 %v1038_v12, %v1022_v53  ;;  %v1121_v15 = vpop.permute.xlu2 %1120  ;;  %v1575_v53 = vsel %vm520_vm4, %v1573_v42, %v1574_v44  ;;  %v1577_v12 = vsel %vm520_vm4, %v1574_v44, %v1576_v4 }
 0x1da   : > { %v1633_v32 = vrot.slane %v1627_v39, 3 }
 0x1db   : > { %v1064_v26 = vadd.f32 %v1059_v13, %v1043_v52  ;;  %v1647_v13 = vmul.f32 %v1646_v9, %v3156_v54  ;;  %v1598_v52 = vsel %vm520_vm4, %v1595_v8, %v1597_v43 }
 0x1dd   : > { %v1085_v33 = vadd.f32 %v1080_v61, %v1064_v26  ;;  %v1548_v61 = vmul.f32 %v1545_v18, %v3217_v20  ;;  %v1653_v26 = vrot.slane %v1647_v13, 3 }
 0x1de   : > { %1538 = vrot.lane.b32.xlu0 %v1535_v34, %s2649_s28  ;;  %1517 = vrot.lane.b32.xlu1 %v1514_v27, %s2647_s18  ;;  %v1594_v34 = vrot.slane %v1588_v19, 2 }
 0x1df   : > { %1496 = vrot.lane.b32.xlu2 %v1493_v35, %s2648_s20  ;;  %v1103_v62 = vadd.f32 %v1098_v23, %v1085_v33  ;;  %v1667_v33 = vstv %s2416_s12  ;;  %v1655_v30 = vsel %vm664_vm5, %v1653_v26, %v1654_v21  ;;  %s2429_s12 = sld [smem:[#allocation3 + $0x56]] }
 0x1e0   : > { %v1061_v38 = vpop.permute.xlu1 %1060  ;;  %v1082_v40 = vpop.permute.xlu0 %1081  ;;  %v1669_v24 = vmul.f32 %v1667_v33, %v3177_v36  ;;  %v1670_v35 = vmul.f32 %v1667_v33, %v3217_v20  ;;  %v1596_v0 = vsel %vm520_vm4, %v1594_v34, %v1595_v8 }
 0x1e1   : > { %v1065_v45 = vadd.f32 %v1061_v38, %v1044_v10  ;;  %v1161_v46 = vpop.permute.xlu2 %1160  ;;  %v1555_v10 = vrot.slane %v1548_v61, 2  ;;  %v1649_v38 = vmul.f32 %v1646_v9, %v3217_v20  ;;  %v1668_v61 = vmul.f32 %v1667_v33, %v3156_v54 }
 0x1e2   : > { %v1730_v9 = vstv %s2419_s27  ;;  %s2406_s27 = sld [smem:[#allocation3 + $0x3f]] }
 0x1e3   : > { %v1086_v50 = vadd.f32 %v1082_v40, %v1065_v45  ;;  %v1556_v17 = vsel %vm520_vm4, %v1553_v47, %v1555_v10  ;;  %v1628_v40 = vmul.f32 %v1625_v11, %v3217_v20  ;;  %v1675_v45 = vrot.slane %v1669_v24, 3 }
 0x1e4   : > { %v1656_v49 = vrot.slane %v1649_v38, 3  ;;  %v1674_v43 = vrot.slane %v1668_v61, 3  ;;  %v1732_v14 = vmul.f32 %v1730_v9, %v3177_v36 }
 0x1e5   : > { %v1104_v56 = vadd.f32 %v1100_v51, %v1086_v50  ;;  %v1635_v50 = vrot.slane %v1628_v40, 3  ;;  %v1688_v51 = vstv %s2417_s24  ;;  %v1731_v40 = vmul.f32 %v1730_v9, %v3156_v54  ;;  %s2430_s24 = sld [smem:[#allocation3 + $0x57]] }
 0x1e6   : > { %1578 = vrot.lane.b32.xlu0 %v1575_v53, %s2650_s7  ;;  %1557 = vrot.lane.b32.xlu1 %v1554_v25, %s2651_s4  ;;  %v1657_v58 = vsel %vm664_vm5, %v1654_v21, %v1656_v49  ;;  %v1689_v59 = vmul.f32 %v1688_v51, %v3156_v54  ;;  %v1691_v39 = vmul.f32 %v1688_v51, %v3217_v20  ;;  %v1738_v21 = vrot.slane %v1732_v14, 3 }
 0x1e7   : > { %1536 = vrot.lane.b32.xlu2 %v1533_v60, %s2649_s28  ;;  %v1125_v63 = vadd.f32 %v1121_v15, %v1104_v56  ;;  %v1626_v15 = vmul.f32 %v1625_v11, %v3156_v54  ;;  %v1711_v56 = vmul.f32 %v1709_v48, %v3177_v36  ;;  %v1690_v60 = vmul.f32 %v1688_v51, %v3177_v36 }
 0x1e8   : > { %v1119_v1 = vpop.permute.xlu1 %1118  ;;  %v1140_v3 = vpop.permute.xlu0 %1139  ;;  %v1636_v23 = vsel %vm664_vm5, %v1633_v32, %v1635_v50  ;;  %v1232_v11 = vstv %s3331_s5  ;;  %s2431_s5 = sld [smem:[#allocation3 + $0x58]] }
 0x1e9   : > { %v1124_v5 = vadd.f32 %v1119_v1, %v1103_v62  ;;  %v1184_v6 = vpop.permute.xlu2 %1183  ;;  %v1632_v31 = vrot.slane %v1626_v15, 3  ;;  %v1716_v1 = vrot.slane %v1710_v55, 3  ;;  %v1696_v8 = vrot.slane %v1690_v60, 3 }
 0x1ea   : > { %v1676_v15 = vsel %vm664_vm5, %v1674_v43, %v1675_v45  ;;  %v1234_v34 = vmul.f32 %v1232_v11, %v3177_v36  ;;  %v1322_v43 = vstv %s2399_s29  ;;  %s2436_s29 = sld [smem:[#allocation3 + $0x5d]] }
 0x1eb   : > { %v1145_v2 = vadd.f32 %v1140_v3, %v1124_v5  ;;  %v1634_v57 = vsel %vm664_vm5, %v1632_v31, %v1633_v32  ;;  %v1717_v5 = vrot.slane %v1711_v56, 3  ;;  %v1698_v31 = vrot.slane %v1691_v39, 3 }
 0x1ec   : > { %v1768_v32 = vstv %s2421_s21  ;;  %v1324_v14 = vmul.f32 %v1322_v43, %v3177_v36  ;;  %s2433_s21 = sld [smem:[#allocation3 + $0x5a]] }
 0x1ed   : > { %v1166_v16 = vadd.f32 %v1161_v46, %v1145_v2  ;;  %v1677_v46 = vrot.slane %v1670_v35, 3  ;;  %v1712_v2 = vmul.f32 %v1709_v48, %v3217_v20  ;;  %v1770_v38 = vmul.f32 %v1768_v32, %v3177_v36 }
 0x1ee   : > { %1601 = vrot.lane.b32.xlu0 %v1598_v52, %s2652_s11  ;;  %1580 = vrot.lane.b32.xlu1 %v1577_v12, %s2650_s7  ;;  %v1718_v12 = vsel %vm664_vm5, %v1716_v1, %v1717_v5  ;;  %v1733_v52 = vmul.f32 %v1730_v9, %v3217_v20  ;;  %v1852_v9 = vstv %s2425_s30  ;;  %s2437_s30 = sld [smem:[#allocation3 + $0x5e]] }
 0x1ef   : > { %1559 = vrot.lane.b32.xlu2 %v1556_v17, %s2651_s4  ;;  %v1678_v28 = vsel %vm664_vm5, %v1675_v45, %v1677_v46  ;;  %v1776_v51 = vrot.slane %v1770_v38, 4  ;;  %v1854_v39 = vmul.f32 %v1852_v9, %v3177_v36 }
 0x1f0   : > { %v1142_v22 = vpop.permute.xlu1 %1141  ;;  %v1163_v18 = vpop.permute.xlu0 %1162 }
 0x1f1   : > { %v1146_v27 = vadd.f32 %v1142_v22, %v1125_v63  ;;  %v1224_v29 = vpop.permute.xlu2 %1223  ;;  %v1719_v22 = vrot.slane %v1712_v2, 3  ;;  %v1831_v2 = vstv %s2424_s6  ;;  %s2413_s6 = sld [smem:[#allocation3 + $0x46]] }
 0x1f3   : > { %v1167_v37 = vadd.f32 %v1163_v18, %v1146_v27  ;;  %v1740_v27 = vrot.slane %v1733_v52, 3  ;;  %v1325_v52 = vmul.f32 %v1322_v43, %v3217_v20 }
 0x1f5   : > { %v1188_v7 = vadd.f32 %v1184_v6, %v1167_v37  ;;  %v1695_v6 = vrot.slane %v1689_v59, 3  ;;  %v1720_v37 = vsel %vm664_vm5, %v1717_v5, %v1719_v22  ;;  %v1833_v22 = vmul.f32 %v1831_v2, %v3177_v36 }
 0x1f6   : > { %1658 = vrot.lane.b32.xlu0 %v1655_v30, %s2647_s18  ;;  %1637 = vrot.lane.b32.xlu1 %v1634_v57, %s2648_s20  ;;  %v1741_v30 = vsel %vm664_vm5, %v1738_v21, %v1740_v27  ;;  %v1769_v57 = vmul.f32 %v1768_v32, %v3156_v54 }
 0x1f7   : > { %1599 = vrot.lane.b32.xlu2 %v1596_v0, %s2652_s11  ;;  %v1697_v13 = vsel %vm664_vm5, %v1695_v6, %v1696_v8  ;;  %v1699_v0 = vsel %vm664_vm5, %v1696_v8, %v1698_v31  ;;  %v1332_v31 = vrot.slane %v1325_v52, 1 }
 0x1f8   : > { %v1182_v42 = vpop.permute.xlu1 %1181  ;;  %v1203_v44 = vpop.permute.xlu0 %1202  ;;  %v1775_v50 = vrot.slane %v1769_v57, 4  ;;  %v1873_v57 = vstv %s2426_s8  ;;  %s2438_s8 = sld [smem:[#allocation3 + $0x5f]] }
 0x1f9   : > { %v1187_v41 = vadd.f32 %v1182_v42, %v1166_v16  ;;  %v3329_v47 = vpop.permute.xlu2 %1245  ;;  %v1233_v16 = vmul.f32 %v1232_v11, %v3156_v54 }
 0x1fa   : > { %v1250_v42 = vadd.f32 %v3329_v47, %v1234_v34  ;;  %v1777_v59 = vsel %vm808_vm6, %v1775_v50, %v1776_v51  ;;  %v1860_v34 = vrot.slane %v1854_v39, 4 }
 0x1fb   : > { %v1208_v53 = vadd.f32 %v1203_v44, %v1187_v41 }
 0x1fd   : > { %v3336_v25 = vadd.f32 %v1224_v29, %v1208_v53  ;;  %v1789_v29 = vstv %s2422_s10  ;;  %v1810_v53 = vstv %s2423_s23  ;;  %s2432_s10 = sld [smem:[#allocation3 + $0x59]] }
 0x1fe   : > { %1681 = vrot.lane.b32.xlu0 %v1678_v28, %s2649_s28  ;;  %1660 = vrot.lane.b32.xlu1 %v1657_v58, %s2647_s18  ;;  %v1790_v24 = vmul.f32 %v1789_v29, %v3156_v54  ;;  %v1791_v35 = vmul.f32 %v1789_v29, %v3177_v36  ;;  %v1737_v28 = vrot.slane %v1731_v40, 3  ;;  %v1792_v56 = vmul.f32 %v1789_v29, %v3217_v20  ;;  %s2435_s23 = sld [smem:[#allocation3 + $0x5c]] }
 0x1ff   : > { %1639 = vrot.lane.b32.xlu2 %v1636_v23, %s2648_s20  ;;  %v3375_v47 = vmul.f32 %v1810_v53, %v3177_v36  ;;  %v1813_v60 = vmul.f32 %v1810_v53, %v3217_v20  ;;  %v1330_v29 = vrot.slane %v1324_v14, 1 }
 0x200   : > { %v1205_v62 = vpop.permute.xlu1 %1204  ;;  %v1226_v63 = vpop.permute.xlu0 %1225  ;;  %v1796_v46 = vrot.slane %v1790_v24, 4  ;;  %v1797_v41 = vrot.slane %v1791_v35, 4  ;;  %v1739_v61 = vsel %vm664_vm5, %v1737_v28, %v1738_v21  ;;  %v1323_v21 = vmul.f32 %v1322_v43, %v3156_v54 }
 0x201   : > { %v1209_v3 = vadd.f32 %v1205_v62, %v1188_v7  ;;  %v1272_v4 = vpop.permute.xlu2 %1271  ;;  %v1771_v62 = vmul.f32 %v1768_v32, %v3217_v20  ;;  %v1820_v8 = vrot.slane %v1813_v60, 4  ;;  %v1333_v40 = vsel %vm376_vm3, %v1330_v29, %v1332_v31 }
 0x202   : > { %v1798_v58 = vsel %vm808_vm6, %v1796_v46, %v1797_v41 }
 0x203   : > { %v3346_v10 = vadd.f32 %v1226_v63, %v1209_v3  ;;  %v1799_v63 = vrot.slane %v1792_v56, 4  ;;  %v1778_v11 = vrot.slane %v1771_v62, 4 }
 0x206   : > { %1721 = vrot.lane.b32.xlu0 %v1718_v12, %s2650_s7  ;;  %1700 = vrot.lane.b32.xlu1 %v1697_v13, %s2651_s4  ;;  %v1800_v13 = vsel %vm808_vm6, %v1797_v41, %v1799_v63  ;;  %v1911_v63 = vstv %s2428_s13  ;;  %s2440_s13 = sld [smem:[#allocation3 + $0x61]] }
 0x207   : > { %1679 = vrot.lane.b32.xlu2 %v1676_v15, %s2649_s28  ;;  %v1853_v15 = vmul.f32 %v1852_v9, %v3156_v54  ;;  %v1913_v43 = vmul.f32 %v1911_v63, %v3177_v36 }
 0x208   : > { %v1244_v17 = vpop.permute.xlu1 %1243  ;;  %v1258_v19 = vpop.permute.xlu0 %1257 }
 0x209   : > { %v1249_v18 = vadd.f32 %v1244_v17, %v1233_v16  ;;  %v1288_v26 = vpop.permute.xlu2 %1287 }
 0x20b   : > { %v1263_v33 = vadd.f32 %v1258_v19, %v1249_v18  ;;  %v1832_v19 = vmul.f32 %v1831_v2, %v3156_v54  ;;  %v1779_v18 = vsel %vm808_vm6, %v1776_v51, %v1778_v11  ;;  %v1834_v51 = vmul.f32 %v1831_v2, %v3217_v20 }
 0x20c   : > { %v1874_v2 = vmul.f32 %v1873_v57, %v3156_v54 }
 0x20d   : > { %v1277_v7 = vadd.f32 %v1272_v4, %v1263_v33  ;;  %v1818_v4 = vrot.slane %v3375_v47, 4  ;;  %v1859_v33 = vrot.slane %v1853_v15, 4  ;;  %v1838_v35 = vrot.slane %v1832_v19, 4 }
 0x20e   : > { %1744 = vrot.lane.b32.xlu0 %v1741_v30, %s2652_s11  ;;  %1723 = vrot.lane.b32.xlu1 %v1720_v37, %s2650_s7  ;;  %v1839_v30 = vrot.slane %v1833_v22, 4  ;;  %v1841_v62 = vrot.slane %v1834_v51, 4  ;;  %v1880_v19 = vrot.slane %v1874_v2, 4  ;;  %v1953_v22 = vstv %s2430_s24 }
 0x20f   : > { %1702 = vrot.lane.b32.xlu2 %v1699_v0, %s2651_s4  ;;  %v1821_v17 = vsel %vm808_vm6, %v1818_v4, %v1820_v8  ;;  %v1861_v46 = vsel %vm808_vm6, %v1859_v33, %v1860_v34  ;;  %v1912_v8 = vmul.f32 %v1911_v63, %v3156_v54  ;;  %v1956_v31 = vmul.f32 %v1953_v22, %v3217_v20 }
 0x210   : > { %v1260_v44 = vpop.permute.xlu1 %1259  ;;  %v1274_v45 = vpop.permute.xlu0 %1273  ;;  %v1840_v41 = vsel %vm808_vm6, %v1838_v35, %v1839_v30  ;;  %v1842_v11 = vsel %vm808_vm6, %v1839_v30, %v1841_v62  ;;  %v1465_v30 = vstv %s2406_s27 }
 0x211   : > { %v1264_v49 = vadd.f32 %v1260_v44, %v1250_v42  ;;  %v1314_v48 = vpop.permute.xlu2 %1313  ;;  %v1875_v42 = vmul.f32 %v1873_v57, %v3177_v36  ;;  %v1876_v44 = vmul.f32 %v1873_v57, %v3217_v20 }
 0x213   : > { %v1278_v55 = vadd.f32 %v1274_v45, %v1264_v49  ;;  %v1855_v49 = vmul.f32 %v1852_v9, %v3217_v20  ;;  %v1881_v47 = vrot.slane %v1875_v42, 4 }
 0x215   : > { %v1292_v23 = vadd.f32 %v1288_v26, %v1278_v55  ;;  %v1811_v26 = vmul.f32 %v1810_v53, %v3156_v54  ;;  %v1882_v33 = vsel %vm808_vm6, %v1880_v19, %v1881_v47 }
 0x216   : > { %1801 = vrot.lane.b32.xlu0 %v1798_v58, %s2647_s18  ;;  %1780 = vrot.lane.b32.xlu1 %v1777_v59, %s2648_s20  ;;  %v1883_v58 = vrot.slane %v1876_v44, 4  ;;  %v1995_v44 = vstv %s2432_s10 }
 0x217   : > { %1742 = vrot.lane.b32.xlu2 %v1739_v61, %s2652_s11  ;;  %v1817_v38 = vrot.slane %v1811_v26, 4  ;;  %v1932_v61 = vstv %s2429_s12  ;;  %s2439_s12 = sld [smem:[#allocation3 + $0x60]] }
 0x218   : > { %v1286_v1 = vpop.permute.xlu1 %1285  ;;  %v1300_v3 = vpop.permute.xlu0 %1299 }
 0x219   : > { %v1291_v5 = vadd.f32 %v1286_v1, %v1277_v7  ;;  %v1354_v6 = vpop.permute.xlu2 %1353  ;;  %v1329_v7 = vrot.slane %v1323_v21, 1  ;;  %v1935_v21 = vmul.f32 %v1932_v61, %v3217_v20 }
 0x21b   : > { %v1305_v12 = vadd.f32 %v1300_v3, %v1291_v5  ;;  %v1331_v50 = vsel %vm376_vm3, %v1329_v7, %v1330_v29  ;;  %v1884_v3 = vsel %vm808_vm6, %v1881_v47, %v1883_v58  ;;  %v1934_v5 = vmul.f32 %v1932_v61, %v3177_v36 }
 0x21c   : > { %v1955_v29 = vmul.f32 %v1953_v22, %v3177_v36  ;;  %v1942_v35 = vrot.slane %v1935_v21, 5  ;;  %v1954_v47 = vmul.f32 %v1953_v22, %v3156_v54  ;;  %v1466_v58 = vmul.f32 %v1465_v30, %v3156_v54 }
 0x21d   : > { %v1319_v16 = vadd.f32 %v1314_v48, %v1305_v12  ;;  %v1819_v48 = vsel %vm808_vm6, %v1817_v38, %v1818_v4  ;;  %v1933_v4 = vmul.f32 %v1932_v61, %v3156_v54  ;;  %v1940_v52 = vrot.slane %v1934_v5, 5 }
 0x21e   : > { %1824 = vrot.lane.b32.xlu0 %v1821_v17, %s2649_s28  ;;  %1803 = vrot.lane.b32.xlu1 %v1800_v13, %s2647_s18  ;;  %v1919_v17 = vrot.slane %v1913_v43, 5  ;;  %v1961_v7 = vrot.slane %v1955_v29, 5  ;;  %v2016_v43 = vstv %s2433_s21 }
 0x21f   : > { %1782 = vrot.lane.b32.xlu2 %v1779_v18, %s2648_s20  ;;  %v1336_v53 = vadd.f32 %v1331_v50, %v1319_v16  ;;  %v1939_v14 = vrot.slane %v1933_v4, 5  ;;  %v1918_v16 = vrot.slane %v1912_v8, 5  ;;  %v1472_v8 = vrot.slane %v1466_v58, 2 }
 0x220   : > { %v1302_v27 = vpop.permute.xlu1 %1301  ;;  %v1316_v32 = vpop.permute.xlu0 %1315 }
 0x221   : > { %v1306_v37 = vadd.f32 %v1302_v27, %v1292_v23  ;;  %v1394_v24 = vpop.permute.xlu2 %1393  ;;  %v1862_v23 = vrot.slane %v1855_v49, 4  ;;  %v1941_v26 = vsel %vm247_vm2, %v1939_v14, %v1940_v52  ;;  %v1920_v27 = vsel %vm247_vm2, %v1918_v16, %v1919_v17 }
 0x222   : > { %v1468_v49 = vmul.f32 %v1465_v30, %v3217_v20 }
 0x223   : > { %v1320_v0 = vadd.f32 %v1316_v32, %v1306_v37 }
 0x225   : > { %v1337_v45 = vadd.f32 %v1333_v40, %v1320_v0  ;;  %v1963_v0 = vrot.slane %v1956_v31, 5  ;;  %v1974_v40 = vstv %s2431_s5 }
 0x226   : > { %1864 = vrot.lane.b32.xlu0 %v1861_v46, %s2650_s7  ;;  %1843 = vrot.lane.b32.xlu1 %v1840_v41, %s2651_s4  ;;  %v1467_v46 = vmul.f32 %v1465_v30, %v3177_v36  ;;  %v1943_v41 = vsel %vm247_vm2, %v1940_v52, %v1942_v35  ;;  %v3438_v50 = vmul.f32 %v1974_v40, %v3177_v36 }
 0x227   : > { %1822 = vrot.lane.b32.xlu2 %v1819_v48, %s2649_s28  ;;  %v1358_v28 = vadd.f32 %v1354_v6, %v1337_v45  ;;  %v1863_v6 = vsel %vm808_vm6, %v1860_v34, %v1862_v23  ;;  %v1914_v34 = vmul.f32 %v1911_v63, %v3217_v20  ;;  %v1975_v48 = vmul.f32 %v1974_v40, %v3156_v54 }
 0x228   : > { %v1352_v55 = vpop.permute.xlu1 %1351  ;;  %v1373_v56 = vpop.permute.xlu0 %1372  ;;  %v1475_v23 = vrot.slane %v1468_v49, 2  ;;  %v1982_v63 = vrot.slane %v3438_v50, 5  ;;  %v2018_v52 = vmul.f32 %v2016_v43, %v3177_v36 }
 0x229   : > { %v1357_v59 = vadd.f32 %v1352_v55, %v1336_v53  ;;  %v1417_v60 = vpop.permute.xlu2 %1416  ;;  %v1921_v42 = vrot.slane %v1914_v34, 5  ;;  %v1964_v53 = vsel %vm247_vm2, %v1961_v7, %v1963_v0  ;;  %v1997_v55 = vmul.f32 %v1995_v44, %v3177_v36 }
 0x22a   : > { %v1981_v62 = vrot.slane %v1975_v48, 5  ;;  %v2024_v31 = vrot.slane %v2018_v52, 5 }
 0x22b   : > { %v1378_v1 = vadd.f32 %v1373_v56, %v1357_v59  ;;  %v1922_v56 = vsel %vm247_vm2, %v1919_v17, %v1921_v42  ;;  %v2003_v5 = vrot.slane %v1997_v55, 5  ;;  %v1977_v17 = vmul.f32 %v1974_v40, %v3217_v20 }
 0x22c   : > { %v1983_v2 = vsel %vm247_vm2, %v1981_v62, %v1982_v63  ;;  %v2096_v55 = vstv %s2437_s30 }
 0x22d   : > { %v1399_v9 = vadd.f32 %v1394_v24, %v1378_v1  ;;  %v1984_v34 = vrot.slane %v1977_v17, 5 }
 0x22e   : > { %1887 = vrot.lane.b32.xlu0 %v1884_v3, %s2652_s11  ;;  %1866 = vrot.lane.b32.xlu1 %v1863_v6, %s2650_s7  ;;  %v1960_v6 = vrot.slane %v1954_v47, 5 }
 0x22f   : > { %1845 = vrot.lane.b32.xlu2 %v1842_v11, %s2651_s4  ;;  %v1985_v42 = vsel %vm247_vm2, %v1982_v63, %v1984_v34 }
 0x230   : > { %v1375_v12 = vpop.permute.xlu1 %1374  ;;  %v1396_v13 = vpop.permute.xlu0 %1395 }
 0x231   : > { %v1379_v15 = vadd.f32 %v1375_v12, %v1358_v28  ;;  %v1457_v39 = vpop.permute.xlu2 %1456  ;;  %v1996_v28 = vmul.f32 %v1995_v44, %v3156_v54  ;;  %v1998_v12 = vmul.f32 %v1995_v44, %v3217_v20  ;;  %v2017_v44 = vmul.f32 %v2016_v43, %v3156_v54 }
 0x233   : > { %v1400_v18 = vadd.f32 %v1396_v13, %v1379_v15  ;;  %v2002_v4 = vrot.slane %v1996_v28, 5  ;;  %v2019_v15 = vmul.f32 %v2016_v43, %v3217_v20  ;;  %v2005_v21 = vrot.slane %v1998_v12, 5 }
 0x234   : > { %v2023_v28 = vrot.slane %v2017_v44, 5  ;;  %v2138_v12 = vstv %s2439_s12  ;;  %s2591_s12 = scalar_lea.hbm %s3574_s3, 32 }
 0x235   : > { %v1421_v32 = vadd.f32 %v1417_v60, %v1400_v18  ;;  %v1473_v60 = vrot.slane %v1467_v46, 2  ;;  %v2004_v14 = vsel %vm247_vm2, %v2002_v4, %v2003_v5  ;;  %v2006_v35 = vsel %vm247_vm2, %v2003_v5, %v2005_v21 }
 0x236   : > { %1944 = vrot.lane.b32.xlu0 %v1941_v26, %s2647_s18  ;;  %1923 = vrot.lane.b32.xlu1 %v1920_v27, %s2648_s20  ;;  %v2025_v62 = vsel %vm247_vm2, %v2023_v28, %v2024_v31  ;;  %v1608_v5 = vstv %s2413_s6  ;;  %v2097_v21 = vmul.f32 %v2096_v55, %v3156_v54 }
 0x237   : > { %1885 = vrot.lane.b32.xlu2 %v1882_v33, %s2652_s11  ;;  %v1476_v11 = vsel %vm520_vm4, %v1473_v60, %v1475_v23  ;;  %v1474_v16 = vsel %vm520_vm4, %v1472_v8, %v1473_v60  ;;  %v2054_v33 = vstv %s2435_s23  ;;  %v2098_v60 = vmul.f32 %v2096_v55, %v3177_v36  ;;  %s2227_s23 = scalar_lea.sflag [#allocation5], %s2779_s9 }
 0x238   : > { %v1415_v37 = vpop.permute.xlu1 %1414  ;;  %v1436_v24 = vpop.permute.xlu0 %1435  ;;  %v2055_v30 = vmul.f32 %v2054_v33, %v3156_v54  ;;  %v2099_v23 = vmul.f32 %v2096_v55, %v3217_v20  ;;  %v2057_v63 = vmul.f32 %v2054_v33, %v3217_v20 }
 0x239   : > { %v1420_v57 = vadd.f32 %v1415_v37, %v1399_v9  ;;  %v1497_v38 = vpop.permute.xlu2 %1496  ;;  %v2075_v37 = vstv %s2436_s29  ;;  %v2104_v43 = vrot.slane %v2098_v60, 6 }
 0x23a   : > { %v2077_v0 = vmul.f32 %v2075_v37, %v3177_v36  ;;  %v2078_v58 = vmul.f32 %v2075_v37, %v3217_v20 }
 0x23b   : > { %v1441_v45 = vadd.f32 %v1436_v24, %v1420_v57  ;;  %v2056_v57 = vmul.f32 %v2054_v33, %v3177_v36 }
 0x23c   : > { %v2085_v4 = vrot.slane %v2078_v58, 6 }
 0x23d   : > { %v1462_v51 = vadd.f32 %v1457_v39, %v1441_v45  ;;  %v1962_v39 = vsel %vm247_vm2, %v1960_v6, %v1961_v7  ;;  %v2076_v7 = vmul.f32 %v2075_v37, %v3156_v54  ;;  %v2062_v49 = vrot.slane %v2056_v57, 6 }
 0x23e   : > { %1946 = vrot.lane.b32.xlu1 %v1943_v41, %s2647_s18  ;;  %1967 = vrot.lane.b32.xlu0 %v1964_v53, %s2649_s28  ;;  %v2061_v41 = vrot.slane %v2055_v30, 6  ;;  %v2083_v53 = vrot.slane %v2077_v0, 6  ;;  %v2159_v0 = vstv %s2440_s13 }
 0x23f   : > { %1925 = vrot.lane.b32.xlu2 %v1922_v56, %s2648_s20  ;;  %v1479_v19 = vadd.f32 %v1474_v16, %v1462_v51  ;;  %v2082_v51 = vrot.slane %v2076_v7, 6 }
 0x240   : > { %v1438_v59 = vpop.permute.xlu1 %1437  ;;  %v1459_v61 = vpop.permute.xlu0 %1458  ;;  %v2063_v47 = vsel %vm1095_vm7, %v2061_v41, %v2062_v49  ;;  %v2086_v52 = vsel %vm1095_vm7, %v2083_v53, %v2085_v4 }
 0x241   : > { %v1442_v1 = vadd.f32 %v1438_v59, %v1421_v32  ;;  %v1537_v3 = vpop.permute.xlu2 %1536  ;;  %v2026_v32 = vrot.slane %v2019_v15, 5  ;;  %v2084_v59 = vsel %vm1095_vm7, %v2082_v51, %v2083_v53  ;;  %v1611_v15 = vmul.f32 %v1608_v5, %v3217_v20 }
 0x243   : > { %v1463_v9 = vadd.f32 %v1459_v61, %v1442_v1 }
 0x245   : > { %v1480_v13 = vadd.f32 %v1476_v11, %v1463_v9  ;;  %v2106_v9 = vrot.slane %v2099_v23, 6  ;;  %v2117_v11 = vstv %s2438_s8 }
 0x246   : > { %1986 = vrot.lane.b32.xlu1 %v1983_v2, %s2651_s4  ;;  %2007 = vrot.lane.b32.xlu0 %v2004_v14, %s2650_s7  ;;  %v2064_v2 = vrot.slane %v2057_v63, 6  ;;  %v1610_v14 = vmul.f32 %v1608_v5, %v3177_v36  ;;  %v2119_v16 = vmul.f32 %v2117_v11, %v3177_v36  ;;  %v2120_v53 = vmul.f32 %v2117_v11, %v3217_v20 }
 0x247   : > { %1965 = vrot.lane.b32.xlu2 %v1962_v39, %s2649_s28  ;;  %v1501_v22 = vadd.f32 %v1497_v38, %v1480_v13  ;;  %v2027_v38 = vsel %vm247_vm2, %v2024_v31, %v2026_v32  ;;  %v2118_v39 = vmul.f32 %v2117_v11, %v3156_v54  ;;  %v1618_v32 = vrot.slane %v1611_v15, 3 }
 0x248   : > { %v1495_v18 = vpop.permute.xlu1 %1494  ;;  %v1516_v26 = vpop.permute.xlu0 %1515  ;;  %v1616_v31 = vrot.slane %v1610_v14, 3  ;;  %v2125_v37 = vrot.slane %v2119_v16, 6 }
 0x249   : > { %v1500_v27 = vadd.f32 %v1495_v18, %v1479_v19  ;;  %v1560_v29 = vpop.permute.xlu2 %1559  ;;  %v2107_v19 = vsel %vm1095_vm7, %v2104_v43, %v2106_v9  ;;  %v2140_v18 = vmul.f32 %v2138_v12, %v3177_v36  ;;  %v2124_v34 = vrot.slane %v2118_v39, 6 }
 0x24b   : > { %v1521_v24 = vadd.f32 %v1516_v26, %v1500_v27  ;;  %v2065_v26 = vsel %vm1095_vm7, %v2062_v49, %v2064_v2  ;;  %v1609_v27 = vmul.f32 %v1608_v5, %v3156_v54  ;;  %v2146_v57 = vrot.slane %v2140_v18, 6 }
 0x24c   : > { %v2126_v44 = vsel %vm1095_vm7, %v2124_v34, %v2125_v37  ;;  %v2161_v49 = vmul.f32 %v2159_v0, %v3177_v36 }
 0x24d   : > { %v1542_v40 = vadd.f32 %v1537_v3, %v1521_v24  ;;  %v1615_v7 = vrot.slane %v1609_v27, 3 }
 0x24e   : > { %2009 = vrot.lane.b32.xlu1 %v2006_v35, %s2650_s7  ;;  %2030 = vrot.lane.b32.xlu0 %v2027_v38, %s2652_s11  ;;  %v2103_v38 = vrot.slane %v2097_v21, 6  ;;  %v2167_v23 = vrot.slane %v2161_v49, 6 }
 0x24f   : > { %1988 = vrot.lane.b32.xlu2 %v1985_v42, %s2651_s4  ;;  %v1619_v42 = vsel %vm664_vm5, %v1616_v31, %v1618_v32  ;;  %v1617_v51 = vsel %vm664_vm5, %v1615_v7, %v1616_v31 }
 0x250   : > { %v1518_v45 = vpop.permute.xlu1 %1517  ;;  %v1539_v46 = vpop.permute.xlu0 %1538 }
 0x251   : > { %v1522_v48 = vadd.f32 %v1518_v45, %v1501_v22  ;;  %v1600_v50 = vpop.permute.xlu2 %1599  ;;  %v2139_v22 = vmul.f32 %v2138_v12, %v3156_v54  ;;  %v2141_v45 = vmul.f32 %v2138_v12, %v3217_v20 }
 0x253   : > { %v1543_v56 = vadd.f32 %v1539_v46, %v1522_v48  ;;  %v2145_v30 = vrot.slane %v2139_v22, 6  ;;  %v2162_v48 = vmul.f32 %v2159_v0, %v3217_v20  ;;  %v2148_v60 = vrot.slane %v2141_v45, 6 }
 0x255   : > { %v1564_v61 = vadd.f32 %v1560_v29, %v1543_v56  ;;  %v2147_v41 = vsel %vm1095_vm7, %v2145_v30, %v2146_v57 }
 0x256   : > { %2066 = vrot.lane.b32.xlu1 %v2063_v47, %s2648_s20  ;;  %2087 = vrot.lane.b32.xlu0 %v2084_v59, %s2647_s18 }
 0x257   : > { %2028 = vrot.lane.b32.xlu2 %v2025_v62, %s2652_s11  ;;  %v2127_v62 = vrot.slane %v2120_v53, 6 }
 0x258   : > { %v1558_v1 = vpop.permute.xlu1 %1557  ;;  %v1579_v3 = vpop.permute.xlu0 %1578 }
 0x259   : > { %v1563_v6 = vadd.f32 %v1558_v1, %v1542_v40  ;;  %v1640_v8 = vpop.permute.xlu2 %1639  ;;  %v2149_v1 = vsel %vm1095_vm7, %v2146_v57, %v2148_v60  ;;  %v2128_v5 = vsel %vm1095_vm7, %v2125_v37, %v2127_v62 }
 0x25b   : > { %v1584_v13 = vadd.f32 %v1579_v3, %v1563_v6  ;;  %v2160_v6 = vmul.f32 %v2159_v0, %v3156_v54 }
 0x25d   : > { %v1605_v17 = vadd.f32 %v1600_v50, %v1584_v13  ;;  %v2105_v50 = vsel %vm1095_vm7, %v2103_v38, %v2104_v43  ;;  %v2166_v2 = vrot.slane %v2160_v6, 6 }
 0x25e   : > { %2089 = vrot.lane.b32.xlu1 %v2086_v52, %s2647_s18  ;;  %2110 = vrot.lane.b32.xlu0 %v2107_v19, %s2649_s28  ;;  %s2420_s18 = sld [smem:[#allocation3 + $0x4d]] }
 0x25f   : > { %2068 = vrot.lane.b32.xlu2 %v2065_v26, %s2648_s20  ;;  %v1622_v28 = vadd.f32 %v1617_v51, %v1605_v17  ;;  %v2168_v14 = vsel %vm1095_vm7, %v2166_v2, %v2167_v23  ;;  %s2427_s20 = sld [smem:[#allocation3 + $0x54]] }
 0x260   : > { %v1581_v29 = vpop.permute.xlu1 %1580  ;;  %v1602_v33 = vpop.permute.xlu0 %1601 }
 0x261   : > { %v1585_v24 = vadd.f32 %v1581_v29, %v1564_v61  ;;  %v1680_v35 = vpop.permute.xlu2 %1679  ;;  %v2169_v61 = vrot.slane %v2162_v48, 6 }
 0x263   : > { %v1606_v40 = vadd.f32 %v1602_v33, %v1585_v24  ;;  %v2170_v3 = vsel %vm1095_vm7, %v2167_v23, %v2169_v61 }
 0x264   : > { %v1751_v31 = vstv %s2420_s18 }
 0x265   : > { %v1623_v46 = vadd.f32 %v1619_v42, %v1606_v40  ;;  %v1753_v33 = vmul.f32 %v1751_v31, %v3177_v36  ;;  %v1752_v34 = vmul.f32 %v1751_v31, %v3156_v54  ;;  %v1754_v24 = vmul.f32 %v1751_v31, %v3217_v20 }
 0x266   : > { %2129 = vrot.lane.b32.xlu1 %v2126_v44, %s2651_s4  ;;  %2150 = vrot.lane.b32.xlu0 %v2147_v41, %s2650_s7  ;;  %v1894_v23 = vstv %s2427_s20 }
 0x267   : > { %2108 = vrot.lane.b32.xlu2 %v2105_v50, %s2649_s28  ;;  %v1644_v55 = vadd.f32 %v1640_v8, %v1623_v46  ;;  %v1758_v30 = vrot.slane %v1752_v34, 4  ;;  %v1761_v42 = vrot.slane %v1754_v24, 4  ;;  %s2434_s28 = sld [smem:[#allocation3 + $0x5b]] }
 0x268   : > { %v1638_v56 = vpop.permute.xlu1 %1637  ;;  %v1659_v47 = vpop.permute.xlu0 %1658 }
 0x269   : > { %v1643_v58 = vadd.f32 %v1638_v56, %v1622_v28  ;;  %v1703_v59 = vpop.permute.xlu2 %1702 }
 0x26b   : > { %v1664_v63 = vadd.f32 %v1659_v47, %v1643_v58 }
 0x26d   : > { %v1685_v4 = vadd.f32 %v1680_v35, %v1664_v63  ;;  %v1759_v35 = vrot.slane %v1753_v33, 4  ;;  %v1896_v63 = vmul.f32 %v1894_v23, %v3177_v36  ;;  %v2037_v34 = vstv %s2434_s28 }
 0x26e   : > { %2152 = vrot.lane.b32.xlu1 %v2149_v1, %s2650_s7  ;;  %2173 = vrot.lane.b32.xlu0 %v2170_v3, %s2652_s11  ;;  %v1895_v1 = vmul.f32 %v1894_v23, %v3156_v54  ;;  %v2039_v24 = vmul.f32 %v2037_v34, %v3177_v36  ;;  %s2181_s7 = sld [smem:[#allocation2]] }
 0x26f   : > { %2131 = vrot.lane.b32.xlu2 %v2128_v5, %s2651_s4  ;;  %v1760_v44 = vsel %vm808_vm6, %v1758_v30, %v1759_v35  ;;  %v1762_v49 = vsel %vm808_vm6, %v1759_v35, %v1761_v42  ;;  %v1897_v5 = vmul.f32 %v1894_v23, %v3217_v20  ;;  %v1902_v6 = vrot.slane %v1896_v63, 5  ;;  %s2337_s4 = sshll.u32 %s2779_s9, 4 }
 0x270   : > { %v1661_v8 = vpop.permute.xlu1 %1660  ;;  %v1682_v43 = vpop.permute.xlu0 %1681  ;;  %v2038_v35 = vmul.f32 %v2037_v34, %v3156_v54 }
 0x271   : > { %v1665_v9 = vadd.f32 %v1661_v8, %v1644_v55  ;;  %v1743_v11 = vpop.permute.xlu2 %1742  ;;  %v1901_v8 = vrot.slane %v1895_v1, 5 }
 0x272   : > { %v2044_v42 = vrot.slane %v2038_v35, 6 }
 0x273   : > { %v1686_v12 = vadd.f32 %v1682_v43, %v1665_v9 }
 0x275   : > { %v1707_v13 = vadd.f32 %v1703_v59, %v1686_v12 }
 0x277   : > { %2171 = vrot.lane.b32.xlu2 %v2168_v14, %s2652_s11  ;;  %v1903_v14 = vsel %vm247_vm2, %v1901_v8, %v1902_v6  ;;  %s2449_s11 = sshll.u32 %s2699_s1, 4  ;;  %s205_s1 = scalar_lea.vmem [#allocation8], %s2337_s4 }
 0x278   : > { %v1701_v52 = vpop.permute.xlu1 %1700  ;;  %v1722_v15 = vpop.permute.xlu0 %1721  ;;  %s2238_s5 = scalar_lea.hbm %s3574_s3, %s2449_s11  ;;  %s2239_s10 = sshll.u32 %s205_s1, 4  ;;  %s2240_s10 = int_to_ptr.vmem [resolvable:$true] %s2239_s10 }
 0x279   : > { %v1783_v39 = vpop.permute.xlu2 %1782  ;;  %v1706_v29 = vadd.f32 %v1701_v52, %v1685_v4  ;;  %s2241_s21 = sshll.u32 %s2238_s5, 4  ;;  %s2242_s21 = int_to_ptr.hbm [resolvable:$true] %s2241_s21 }
 0x27a   : > { %s2585_s29 = sshra.s32 %s2242_s21, 4  ;;  %s2586_s29 = int_to_ptr.hbm [resolvable:$true] %s2585_s29 }
 0x27b   : > { %v1727_v37 = vadd.f32 %v1722_v15, %v1706_v29  ;;  %s2587_s30 = scalar_lea.hbm %s2586_s29, 16  ;;  %p2592_p0 = scmp.lt.s32.totalorder %s2586_s29, %s3574_s3 }
 0x27c   : > { %p2588_p4 = scmp.ne.s32.totalorder %s2586_s29, %s2587_s30  ;;  %p2593_p3 = scmp.lt.s32.totalorder %s2591_s12, %s2587_s30 }
 0x27d   : > { %v1748_v7 = vadd.f32 %v1743_v11, %v1727_v37 }
 0x27e   : > { %p2589_p6 = pnand %p2588_p4, %p2730_p11  ;;  %p2594_p5 = por %p2593_p3, %p2592_p0 }
 0x27f   : > { %v1765_v46 = vadd.f32 %v1760_v44, %v1748_v7  ;;  %v2040_v7 = vmul.f32 %v2037_v34, %v3217_v20 }
 0x280   : > { %v1724_v16 = vpop.permute.xlu1 %1723  ;;  %v1745_v17 = vpop.permute.xlu0 %1744  ;;  %p2590_p13 = pneg %p2589_p6 }
 0x281   : > { %v1823_v19 = vpop.permute.xlu2 %1822  ;;  %v1728_v0 = vadd.f32 %v1724_v16, %v1707_v13  ;;  %v1904_v13 = vrot.slane %v1897_v5, 5 }
 0x282   : > { %p2595_p8 = pnand %p2594_p5, %p2590_p13 }
 0x283   : > { %v1749_v45 = vadd.f32 %v1745_v17, %v1728_v0  ;;  %v1905_v16 = vsel %vm247_vm2, %v1902_v6, %v1904_v13  ;;  %v2045_v0 = vrot.slane %v2039_v24, 6 }
 0x285   : > { %v1766_v51 = vadd.f32 %v1762_v49, %v1749_v45  ;;  %v2046_v49 = vsel %vm1095_vm7, %v2044_v42, %v2045_v0 }
 0x287   : > { %v1787_v55 = vadd.f32 %v1783_v39, %v1766_v51 }
 0x288   : > { %v1781_v22 = vpop.permute.xlu1 %1780  ;;  %v1802_v18 = vpop.permute.xlu0 %1801 }
 0x289   : > { %v1846_v26 = vpop.permute.xlu2 %1845  ;;  %v1786_v41 = vadd.f32 %v1781_v22, %v1765_v46 }
 0x28b   : > { %v1807_v28 = vadd.f32 %v1802_v18, %v1786_v41  ;;  %v2047_v41 = vrot.slane %v2040_v7, 6 }
 0x28d   : > { %v1828_v47 = vadd.f32 %v1823_v19, %v1807_v28  ;;  %v2048_v36 = vsel %vm1095_vm7, %v2045_v0, %v2047_v41 }
 0x290   : > { %v1804_v21 = vpop.permute.xlu1 %1803  ;;  %v1825_v27 = vpop.permute.xlu0 %1824 }
 0x291   : > { %v1886_v32 = vpop.permute.xlu2 %1885  ;;  %v1808_v56 = vadd.f32 %v1804_v21, %v1787_v55 }
 0x293   : > { %v1829_v62 = vadd.f32 %v1825_v27, %v1808_v56 }
 0x295   : > { %v1850_v4 = vadd.f32 %v1846_v26, %v1829_v62 }
 0x298   : > { %v1844_v57 = vpop.permute.xlu1 %1843  ;;  %v1865_v38 = vpop.permute.xlu0 %1864 }
 0x299   : > { %v1926_v40 = vpop.permute.xlu2 %1925  ;;  %v1849_v60 = vadd.f32 %v1844_v57, %v1828_v47 }
 0x29b   : > { %v1870_v3 = vadd.f32 %v1865_v38, %v1849_v60 }
 0x29d   : > { %v1891_v11 = vadd.f32 %v1886_v32, %v1870_v3  ;;  %v2182_v3 = vstv %s2181_s7 }
 0x29f   : > { %v1908_v15 = vadd.f32 %v1903_v14, %v1891_v11 }
 0x2a0   : > { %v1867_v48 = vpop.permute.xlu1 %1866  ;;  %v1888_v50 = vpop.permute.xlu0 %1887 }
 0x2a1   : > { %v1966_v53 = vpop.permute.xlu2 %1965  ;;  %v1871_v2 = vadd.f32 %v1867_v48, %v1850_v4 }
 0x2a3   : > { %v1892_v52 = vadd.f32 %v1888_v50, %v1871_v2 }
 0x2a5   : > { %v1909_v22 = vadd.f32 %v1905_v16, %v1892_v52 }
 0x2a7   : > { %v1930_v26 = vadd.f32 %v1926_v40, %v1909_v22 }
 0x2a8   : > { %v1924_v58 = vpop.permute.xlu1 %1923  ;;  %v1945_v59 = vpop.permute.xlu0 %1944 }
 0x2a9   : > { %v1989_v61 = vpop.permute.xlu2 %1988  ;;  %v1929_v39 = vadd.f32 %v1924_v58, %v1908_v15 }
 0x2ab   : > { %v1950_v18 = vadd.f32 %v1945_v59, %v1929_v39 }
 0x2ad   : > { %v1971_v29 = vadd.f32 %v1966_v53, %v1950_v18 }
 0x2b0   : > { %v1947_v43 = vpop.permute.xlu1 %1946  ;;  %v1968_v9 = vpop.permute.xlu0 %1967 }
 0x2b1   : > { %v2029_v12 = vpop.permute.xlu2 %2028  ;;  %v1951_v27 = vadd.f32 %v1947_v43, %v1930_v26 }
 0x2b3   : > { %v1972_v37 = vadd.f32 %v1968_v9, %v1951_v27 }
 0x2b5   : > { %v1993_v57 = vadd.f32 %v1989_v61, %v1972_v37 }
 0x2b8   : > { %v1987_v17 = vpop.permute.xlu1 %1986  ;;  %v2008_v19 = vpop.permute.xlu0 %2007 }
 0x2b9   : > { %v2069_v21 = vpop.permute.xlu2 %2068  ;;  %v1992_v33 = vadd.f32 %v1987_v17, %v1971_v29 }
 0x2bb   : > { %v2013_v30 = vadd.f32 %v2008_v19, %v1992_v33 }
 0x2bd   : > { %v2034_v45 = vadd.f32 %v2029_v12, %v2013_v30 }
 0x2bf   : > { %v2051_v50 = vadd.f32 %v2046_v49, %v2034_v45 }
 0x2c0   : > { %v2010_v31 = vpop.permute.xlu1 %2009  ;;  %v2031_v32 = vpop.permute.xlu0 %2030 }
 0x2c1   : > { %v2109_v38 = vpop.permute.xlu2 %2108  ;;  %v2014_v46 = vadd.f32 %v2010_v31, %v1993_v57 }
 0x2c3   : > { %v2035_v48 = vadd.f32 %v2031_v32, %v2014_v46 }
 0x2c5   : > { %v2052_v28 = vadd.f32 %v2048_v36, %v2035_v48 }
 0x2c7   : > { %v2073_v20 = vadd.f32 %v2069_v21, %v2052_v28 }
 0x2c8   : > { %v2067_v40 = vpop.permute.xlu1 %2066  ;;  %v2088_v44 = vpop.permute.xlu0 %2087 }
 0x2c9   : > { %v2072_v51 = vadd.f32 %v2067_v40, %v2051_v50  ;;  %v2132_v55 = vpop.permute.xlu2 %2131 }
 0x2cb   : > { %v2093_v56 = vadd.f32 %v2088_v44, %v2072_v51 }
 0x2cd   : > { %v2114_v58 = vadd.f32 %v2109_v38, %v2093_v56 }
 0x2d0   : > { %v2090_v54 = vpop.permute.xlu1 %2089  ;;  %v2111_v53 = vpop.permute.xlu0 %2110 }
 0x2d1   : > { %v2094_v47 = vadd.f32 %v2090_v54, %v2073_v20  ;;  %v2172_v63 = vpop.permute.xlu2 %2171 }
 0x2d3   : > { %v2115_v61 = vadd.f32 %v2111_v53, %v2094_v47 }
 0x2d5   : > { %v2136_v5 = vadd.f32 %v2132_v55, %v2115_v61 }
 0x2d8   : > { %v2130_v59 = vpop.permute.xlu1 %2129  ;;  %v2151_v60 = vpop.permute.xlu0 %2150 }
 0x2d9   : > { %v2135_v23 = vadd.f32 %v2130_v59, %v2114_v58 }
 0x2db   : > { %v2156_v62 = vadd.f32 %v2151_v60, %v2135_v23 }
 0x2dd   : > { %v2177_v1 = vadd.f32 %v2172_v63, %v2156_v62 }
 0x2df   : > { %v2179_v4 = vadd.f32 %v2177_v1, %v3336_v25 }
 0x2e0   : > { %v2153_v6 = vpop.permute.xlu1 %2152  ;;  %v2174_v9 = vpop.permute.xlu0 %2173 }
 0x2e1   : > { %v2157_v8 = vadd.f32 %v2153_v6, %v2136_v5  ;;  %v2183_v43 = vadd.f32 %v2182_v3, %v2179_v4 }
 0x2e3   : > { %v2441_v11 = vmul.f32 -1.442695, %v2183_v43  ;;  %v2178_v2 = vadd.f32 %v2174_v9, %v2157_v8 }
 0x2e5   : > { %2518 = vpow2.f32 %v2441_v11  ;;  %v2180_v12 = vadd.f32 %v2178_v2, %v3346_v10 }
 0x2e7   : > { %v2184_v13 = vadd.f32 %v2182_v3, %v2180_v12 }
 0x2e9   : > { %v2442_v14 = vmul.f32 -1.442695, %v2184_v13 }
 0x2eb   : > { %v2519_v52 = vpop.eup %2518  ;;  %2520 = vpow2.f32 %v2442_v14 }
 0x2ec   : > { %v2191_v15 = vadd.f32 1.0, %v2519_v52 }
 0x2ee   : > { %2522 = vrcp.f32 %v2191_v15  ;;  %v2204_v22 = vand.u32 2147483648, %v2191_v15  ;;  %v2202_v26 = vand.u32 2147483647, %v2191_v15  ;;  %vm2198_vm9 = vweird.f32 %v2191_v15 }
 0x2f0   : > { %v2205_v29 = vor.u32 1.1754944e-38, %v2204_v22  ;;  %vm2203_vm12 = vcmp.eq.f32.partialorder %v2202_v26, 8.507059e+37 }
 0x2f1   : > { %v2521_v39 = vpop.eup %2520 }
 0x2f2   : > { %v2192_v25 = vadd.f32 1.0, %v2521_v39 }
 0x2f4   : > { %v2523_v16 = vpop.eup %2522  ;;  %2524 = vrcp.f32 %v2192_v25  ;;  %v2219_v34 = vand.u32 2147483648, %v2192_v25  ;;  %v2217_v24 = vand.u32 2147483647, %v2192_v25  ;;  %vm2213_vm14 = vweird.f32 %v2192_v25 }
 0x2f5   : > { %v2194_v17 = vmul.f32 %v2523_v16, %v2191_v15  ;;  %vm2199_vm8 = vweird.f32 %v2523_v16 }
 0x2f6   : > { %vm2200_vm10 = vmor %vm2198_vm9, %vm2199_vm8  ;;  %v2220_v30 = vor.u32 1.1754944e-38, %v2219_v34  ;;  %vm2218_vm0 = vcmp.eq.f32.partialorder %v2217_v24, 8.507059e+37 }
 0x2f7   : > { %v2195_v19 = vsub.f32 1.0, %v2194_v17 }
 0x2f9   : > { %v2196_v18 = vmul.f32 %v2523_v16, %v2195_v19 }
 0x2fa   : > { %v2525_v10 = vpop.eup %2524 }
 0x2fb   : > { %v2209_v21 = vmul.f32 %v2525_v10, %v2192_v25  ;;  %v2197_v27 = vadd.f32 %v2523_v16, %v2196_v18  ;;  %vm2214_vm13 = vweird.f32 %v2525_v10 }
 0x2fc   : > { %vm2215_vm15 = vmor %vm2213_vm14, %vm2214_vm13 }
 0x2fd   : > { %v2210_v31 = vsub.f32 1.0, %v2209_v21  ;;  %v2201_v32 = vsel %vm2200_vm10, %v2523_v16, %v2197_v27 }
 0x2fe   : > { %v2206_v33 = vsel %vm2203_vm12, %v2205_v29, %v2201_v32 }
 0x2ff   : > { %v2211_v37 = vmul.f32 %v2525_v10, %v2210_v31  ;;  %2224 = vst.msk [vmem:[%s205_s1] sm:$0xff] %vm2223_vm11, %v2206_v33 }
 0x301   : > { %v2212_v35 = vadd.f32 %v2525_v10, %v2211_v37 }
 0x303   : > { %v2216_v57 = vsel %vm2215_vm15, %v2525_v10, %v2212_v35 }
 0x304   : > { %v2221_v38 = vsel %vm2218_vm0, %v2220_v30, %v2216_v57 }
 0x305   : > { %2225 = vst.msk [vmem:[%s205_s1 + $0x8] sm:$0xff] %vm2223_vm11, %v2221_v38 }
 0x306   : > { %2598 = shalt.err (!%p2595_p8)
}
 0x307   : > { %s2653_s9 = smov 128   ;;  %s2654_s20 = smov 8  }
 0x308   : > { %2456 = dma.vmem_to_hbm [thread:$0]  (%p2730_p11), %s2240_s10, 256, %s2242_s21, %s2227_s23, %s2653_s9, %s2653_s9, %s2654_s20  }
 0x309 PF: > { %s2256_s28 = sand.u32 1, %s2629_s14   ;;  %p3581_p9 = scmp.ge.s32.totalorder %s2641_s17, 2 }
 0x30a   : > { %s2257_s7 = scalar_lea.sflag [#allocation5], %s2256_s28 }
 0x30b   : > { %p2467_p10 = pnand %p3581_p9, %p2734_p12 }
 0x30d   : > { %p2468_p1 = pneg %p2467_p10 }
 0x30f   : > { %2624 = dma.done.wait (%p2468_p1), %s2257_s7, 256  }
 0x310   : > { %2626 = vsyncadd (%p2468_p1), %s2257_s7, 4294967040  ;;  %p18_p2 = scmp.ge.s32.totalorder %s2703_s19, 4   ;;  %s3582_s14 = smov %s2633_s15 }
 0x311   : > { %s3583_s15 = smov %s2637_s16  ;;  %s3584_s16 = smov %s2715_s22 }
 0x312   : > { %s3585_s17 = smov %s2703_s19  ;;  %20 = sbr.rel (!%p18_p2) target bundleno = 8 (0x8), region = 85 }
 0x317   :  { %2263 = vsyncpa [#allocation4], 1 }
 0x318   :  { %2265 = vsyncpa [#allocation4 + $0x1], 1 }
 0x319   :  { %2266 = vsyncpa [#allocation5], 1 }
 0x31a   :  { %2268 = vsyncpa [#allocation5 + $0x1], 1 }
 0x31b   :  { %2269 = vsyncpa [#allocation6], 1 }
 0x31c   :  { %2271 = vsyncpa [#allocation6 + $0x1], 1 }

</bundles_post_ra>
